<compile_context>
chip_gen: v6e
topology: v6e:2x2x1
jax: 0.10.0
libtpu: 0.0.40
codegen_flags: <defaults>
</compile_context>

<pallas_src>
import functools
import math

import jax
import jax.numpy as jnp
from jax import lax
from jax.experimental import pallas as pl
from jax.experimental.pallas import tpu as pltpu

LEAKY_SLOPE = 0.2
BN_EPS = 1e-5
KW = 4            # kernel size of every conv in the module
PADW = 2          # int(ceil((4 - 1) / 2))

TK_CANDIDATES = (1024, 512, 256, 128)  # K tile; K is always a multiple of 128 by construction


def _round_up(x, m):
    return (x + m - 1) // m * m


def _cdiv(a, b):
    return (a + b - 1) // b


def _pick_tk(k):
    for t in TK_CANDIDATES:
        if k % t == 0:
            return t
    return k


def _chip_config():
    """Generation-conditional tiling: (tm_pref, vmem_limit_bytes, num_tensorcores).

    128 MiB VMEM parts (v5e/v6e) -> TM=1024, ~96 MiB scoped limit (fewer grid steps,
    better HBM streaming).  64 MiB parts (v7x) -> TM=512, 48 MiB.  Conservative
    defaults if the query is unavailable (e.g. interpret mode on CPU).
    """
    tm_pref, vmem_limit, num_cores = 512, 48 * 1024 * 1024, 1
    try:
        info = pltpu.get_tpu_info()
        vmem = getattr(info, "vmem_capacity_bytes", None)
        if vmem and vmem >= 100 * 1024 * 1024:          # v5e / v6e class (128 MiB VMEM)
            tm_pref, vmem_limit = 1024, 96 * 1024 * 1024
        cores = (getattr(info, "num_tensorcores", None)
                 or getattr(info, "tensorcores_per_chip", None)
                 or getattr(info, "num_cores", None))
        if cores:
            num_cores = int(cores)
        elif vmem and vmem < 100 * 1024 * 1024:         # 64 MiB part -> v7x-class, 2 TCs/chip
            num_cores = 2
    except Exception:
        pass                                            # non-TPU / older jax: safe defaults
    return tm_pref, vmem_limit, num_cores


# ------------------------------ Pallas kernel ---------------------------------
def _conv_mm_kernel(x_ref, w_ref, b_ref, y_ref, *rest, fuse_act):
    """Conv-as-matmul tile: (TM, TK)bf16 @ (TK, C)bf16 accumulated in f32 VMEM.

    Grid = (M tiles [parallel], K tiles [arbitrary]).  The full weight slab is
    VMEM-resident (constant index_map); the K grid index selects a slice of it.
    The conv bias is folded into the k==0 accumulator init.  At the last K step,
    unmasked per-tile BatchNorm partial statistics are emitted (the padded rows'
    exact contribution -- `bias` per row -- is corrected outside the kernel) and
    LeakyReLU(0.2) is fused for layers without BatchNorm.

    NOTE: pl.program_id / pl.num_programs are only read at the top level of the
    kernel body (not inside pl.when bodies), which is required for interpret mode.
    """
    if len(rest) == 2:
        stats_ref, acc_ref = rest
    else:
        stats_ref = None
        (acc_ref,) = rest

    k = pl.program_id(1)
    nk = pl.num_programs(1)

    @pl.when(k == 0)
    def _():
        # fold the conv bias into the accumulator init (saves a (TM, C) add later)
        acc_ref[...] = jnp.broadcast_to(b_ref[...], acc_ref.shape)

    acc_ref[...] += jnp.dot(x_ref[...], w_ref[k],
                            preferred_element_type=jnp.float32)

    @pl.when(k == nk - 1)
    def _():
        y = acc_ref[...]                                     # (TM, C) f32
        if stats_ref is not None:
            # Unmasked BatchNorm partials in f32 (before the bf16 store).  Rows padded
            # past m_true are exact zeros in the im2col matrix, so y == bias there; that
            # contribution is subtracted outside the kernel (no in-kernel row masking).
            s1 = jnp.sum(y, axis=0, keepdims=True)           # (1, C)  sum
            s2 = jnp.sum(y * y, axis=0, keepdims=True)       # (1, C)  sum of squares
            stats_ref[...] = jnp.concatenate([s1, s2], axis=0)[None]
        if fuse_act:
            y = jnp.where(y >= 0, y, LEAKY_SLOPE * y)        # LeakyReLU(0.2)
        y_ref[...] = y.astype(y_ref.dtype)


# ------------------------------- layer wrapper --------------------------------
def conv_block_pallas(x, weight, bias, gamma, beta, *, stride, use_bn, use_act,
                      tm_pref, vmem_limit, num_cores):
    """One (Conv2d k=4, pad=2 -> [BatchNorm2d train stats] -> [LeakyReLU]) block.

    x: (N, H, W, Cin_pad) NHWC activation, channels already padded to a multiple of 8.
    Returns (N, Ho, Wo, round_up(Cout, 8)): bf16 for hidden layers, f32 for the final
    (no-BN / no-activation) layer.  Padded channels stay exactly zero.
    """
    n, h, w_sp, cin_pad = x.shape
    cout, cin, kh, kw = weight.shape
    assert cin <= cin_pad and kh == KW and kw == KW

    cout_pad = _round_up(cout, 128)    # lane-dense stores (handles Cout==1 and small ndf)
    c_carry = _round_up(cout, 8)       # channels carried to the next layer (no 128-pad in next K)

    # weights (Cout, Cin, kh, kw) -> (kh, kw, Cin_pad, Cout_pad) -> (num_k, TK, Cout_pad) bf16
    wt = jnp.transpose(weight, (2, 3, 1, 0))
    wt = jnp.pad(wt, ((0, 0), (0, 0), (0, cin_pad - cin), (0, cout_pad - cout)))
    K = kh * kw * cin_pad
    bias_pad = jnp.pad(bias, (0, cout_pad - cout)).astype(jnp.float32)   # (Cout_pad,)
    bm = bias_pad.reshape(1, cout_pad)

    # spatial zero padding (PyTorch Conv2d padding=2) and output geometry
    xp = jnp.pad(x, ((0, 0), (PADW, PADW), (PADW, PADW), (0, 0)))
    ho = (h + 2 * PADW - kh) // stride + 1
    wo = (w_sp + 2 * PADW - kw) // stride + 1
    m_true = n * ho * wo

    # im2col -> (M, K) bf16; patch layout (kh, kw, cin) matches the weight reshape.
    # TODO(synk): this XLA-side im2col still has ~16x activation read amplification; the full
    # fix is keeping the NHWC activation in HBM (memory_space=pl.ANY) and accumulating the 16
    # shifted (TM,Cin)x(Cin,Cout) matmuls in-kernel with manual make_async_copy row-slab DMA.
    # Not done here because the odd spatial extents (ho/wo not multiples of 8) make the
    # in-kernel gather/reshape fragile on Mosaic.
    patches = [xp[:, i:i + stride * ho:stride, j:j + stride * wo:stride, :]
               for i in range(kh) for j in range(kw)]
    xm = jnp.stack(patches, axis=3).reshape(m_true, K).astype(jnp.bfloat16)

    # M tiling: generation-conditional TM; keep num_m >= 2 on 2-TensorCore chips so the
    # "parallel" M axis actually spans both cores.
    tm = min(tm_pref, max(256, _round_up(m_true, 256)))
    if num_cores >= 2 and m_true > 256 and _cdiv(m_true, tm) == 1:
        tm = max(256, _round_up(_cdiv(m_true, 2), 256))
    m_pad = _round_up(m_true, tm)
    if m_pad != m_true:
        xm = jnp.pad(xm, ((0, m_pad - m_true), (0, 0)))
    num_m = m_pad // tm

    tk = _pick_tk(K)
    num_k = K // tk
    wm = wt.reshape(num_k, tk, cout_pad).astype(jnp.bfloat16)

    fuse_act = use_act and not use_bn              # first layer: fuse LeakyReLU into pass 1
    # hidden-layer intermediates in bf16 (halves HBM writeback / re-read); final layer f32
    y_dtype = jnp.bfloat16 if (use_bn or fuse_act) else jnp.float32

    out_shapes = [jax.ShapeDtypeStruct((m_pad, cout_pad), y_dtype)]
    out_specs = [pl.BlockSpec((tm, cout_pad), lambda i, k: (i, 0))]
    if use_bn:
        out_shapes.append(jax.ShapeDtypeStruct((num_m, 2, cout_pad), jnp.float32))
        out_specs.append(pl.BlockSpec((1, 2, cout_pad), lambda i, k: (i, 0, 0)))

    kernel = functools.partial(_conv_mm_kernel, fuse_act=fuse_act)
    # TODO(synk): on v7x, pipeline_mode=pl.Buffered(1) on the resident weight/bias specs would
    # drop their redundant second buffer (up to 8 MiB); left at defaults for API compatibility.
    res = pl.pallas_call(
        kernel,
        grid=(num_m, num_k),
        in_specs=[
            # streamed activation tiles
            pl.BlockSpec((tm, tk), lambda i, k: (i, k)),
            # full weight slab, VMEM-resident for the whole grid
            pl.BlockSpec((num_k, tk, cout_pad), lambda i, k: (0, 0, 0)),
            # bias, resident
            pl.BlockSpec((1, cout_pad), lambda i, k: (0, 0)),
        ],
        out_specs=out_specs,
        out_shape=out_shapes,
        scratch_shapes=[pltpu.VMEM((tm, cout_pad), jnp.float32)],
        compiler_params=pltpu.CompilerParams(
            dimension_semantics=("parallel", "arbitrary"),
            vmem_limit_bytes=vmem_limit),
    )(xm, wm, bm)

    if use_bn:
        y, stats = res
        # Finalize train-mode batch statistics: subtract the exact contribution of the
        # padded im2col rows (each produces y == bias), then fold BatchNorm into a
        # per-channel affine out = y*scale + shift.
        s = jnp.sum(stats, axis=0)                           # (2, C) f32
        pad_rows = jnp.float32(m_pad - m_true)
        s1 = s[0] - pad_rows * bias_pad
        s2 = s[1] - pad_rows * bias_pad * bias_pad
        mean = s1 / m_true
        var = s2 / m_true - mean * mean                      # biased batch variance
        g = jnp.pad(gamma, (0, cout_pad - cout), constant_values=1.0).astype(jnp.float32)
        bt = jnp.pad(beta, (0, cout_pad - cout)).astype(jnp.float32)
        scale = g * lax.rsqrt(var + BN_EPS)
        shift = bt - mean * scale
        # Apply BN + LeakyReLU in plain jnp so XLA fuses it into the next layer's im2col
        # producer (no extra Pallas round trip over the activation).
        out = y[:m_true, :c_carry].astype(jnp.float32) * scale[:c_carry] + shift[:c_carry]
        if use_act:
            out = jnp.where(out >= 0, out, LEAKY_SLOPE * out)
        out = out.astype(jnp.bfloat16)
    else:
        out = res[0][:m_true, :c_carry]                      # act already fused (or final layer)

    return out.reshape(n, ho, wo, c_carry)


# --------------------------- parameter construction ---------------------------
def init_params(key, input_nc, ndf=64, n_layers=3):
    """Deterministic synthetic parameters with the exact shapes of the module."""
    layers = [(input_nc, ndf, 2, False, True)]          # (cin, cout, stride, use_bn, use_act)
    nf = ndf
    for _ in range(1, n_layers):
        nf_prev, nf = nf, min(nf * 2, 512)
        layers.append((nf_prev, nf, 2, True, True))
    nf_prev, nf = nf, min(nf * 2, 512)
    layers.append((nf_prev, nf, 1, True, True))
    layers.append((nf, 1, 1, False, False))

    params = []
    for (cin, cout, stride, use_bn, use_act) in layers:
        key, k1, k2 = jax.random.split(key, 3)
        wscale = 1.0 / math.sqrt(cin * KW * KW)
        w = jax.random.normal(k1, (cout, cin, KW, KW), jnp.float32) * wscale
        b = jax.random.normal(k2, (cout,), jnp.float32) * 0.01
        gamma = jnp.ones((cout,), jnp.float32)    # BatchNorm2d default weight init
        beta = jnp.zeros((cout,), jnp.float32)    # BatchNorm2d default bias init
        params.append(dict(w=w, b=b, gamma=gamma, beta=beta, stride=stride,
                           use_bn=use_bn, use_act=use_act))
    return params


# -------------------------------- forward pass ---------------------------------
def nlayer_discriminator(x_nchw, params):
    tm_pref, vmem_limit, num_cores = _chip_config()
    x = jnp.transpose(x_nchw, (0, 2, 3, 1))              # NCHW -> NHWC (once, at the boundary)
    cin = x.shape[-1]
    cin_pad = _round_up(cin, 8)                          # K = 16*Cin becomes a multiple of 128
    if cin_pad != cin:
        x = jnp.pad(x, ((0, 0), (0, 0), (0, 0), (0, cin_pad - cin)))
    x = x.astype(jnp.bfloat16)                           # bf16 activations between layers
    for p in params:
        x = conv_block_pallas(x, p["w"], p["b"], p["gamma"], p["beta"],
                              stride=p["stride"], use_bn=p["use_bn"], use_act=p["use_act"],
                              tm_pref=tm_pref, vmem_limit=vmem_limit, num_cores=num_cores)
    cout_final = params[-1]["w"].shape[0]                # == 1
    x = x[..., :cout_final].astype(jnp.float32)          # drop channel padding of the last layer
    return jnp.transpose(x, (0, 3, 1, 2))                # NHWC -> NCHW


# pure-JAX f32 reference (module semantics) for the correctness check
def reference(x_nchw, params):
    x = x_nchw
    for p in params:
        y = lax.conv_general_dilated(
            x, p["w"], (p["stride"], p["stride"]),
            padding=[(PADW, PADW), (PADW, PADW)],
            dimension_numbers=("NCHW", "OIHW", "NCHW"),
            precision=lax.Precision.HIGHEST)
        y = y + p["b"][None, :, None, None]
        if p["use_bn"]:
            mean = jnp.mean(y, axis=(0, 2, 3), keepdims=True)
            var = jnp.mean(jnp.square(y - mean), axis=(0, 2, 3), keepdims=True)
            y = (y - mean) * lax.rsqrt(var + BN_EPS) \
                * p["gamma"][None, :, None, None] + p["beta"][None, :, None, None]
        if p["use_act"]:
            y = jnp.where(y >= 0, y, LEAKY_SLOPE * y)
        x = y
    return x


if __name__ == "__main__":
    key = jax.random.PRNGKey(0)
    key, kx = jax.random.split(key)

    # small shapes consistent with the module: batch=2, input_nc=4, spatial 16x16, ndf=8
    input_nc, ndf, n_layers = 4, 8, 3
    x = jax.random.normal(kx, (2, input_nc, 16, 16), jnp.float32)
    params = init_params(key, input_nc=input_nc, ndf=ndf, n_layers=n_layers)

    forward = jax.jit(lambda inp: nlayer_discriminator(inp, params))
    out = jax.block_until_ready(forward(x))
    ref = jax.block_until_ready(reference(x, params))

    assert out.shape == ref.shape, (out.shape, ref.shape)
    assert out.dtype == jnp.float32
    # bf16 MXU operands / bf16 inter-layer activations vs the f32 HIGHEST reference
    max_err = float(jnp.max(jnp.abs(out - ref)))
    assert jnp.allclose(out, ref, rtol=6e-2, atol=6e-2), max_err

    print("KERNEL_OK")
</pallas_src>

<mosaic_0001>
module attributes {stable_mosaic.version = 11 : i64} {
  func.func @_conv_mm_kernel(%arg0: i32, %arg1: i32, %arg2: memref<256x128xbf16, #tpu.memory_space<vmem>>, %arg3: memref<1x128x128xbf16, #tpu.memory_space<vmem>>, %arg4: memref<1x128xf32, #tpu.memory_space<vmem>>, %arg5: memref<256x128xbf16, #tpu.memory_space<vmem>>, %arg6: memref<256x128xf32, #tpu.memory_space<vmem>>) attributes {dimension_semantics = [#tpu.dimension_semantics<parallel>, #tpu.dimension_semantics<arbitrary>], iteration_bounds = array<i64: 1, 1>, scalar_prefetch = 0 : i64, scratch_operands = 1 : i64, tpu.core_type = #tpu.core_type<tc>, window_params = [{transform_indices = @transform_0, window_bounds = array<i64: 256, 128>}, {pipeline_mode = #tpu.pipeline_mode<synchronous>, transform_indices = @transform_1, window_bounds = array<i64: 1, 128, 128>}, {pipeline_mode = #tpu.pipeline_mode<synchronous>, transform_indices = @transform_2, window_bounds = array<i64: 1, 128>}, {transform_indices = @transform_3, window_bounds = array<i64: 256, 128>}]} {
    %c0_i32 = arith.constant 0 : i32
    %0 = arith.cmpi eq, %arg1, %c0_i32 : i32
    %1 = arith.extui %0 : i1 to i32
    %c0_i32_0 = arith.constant 0 : i32
    %2 = arith.cmpi ne, %1, %c0_i32_0 : i32
    scf.if %2 {
      %c0_10 = arith.constant 0 : index
      %c0_11 = arith.constant 0 : index
      %14 = vector.load %arg4[%c0_10, %c0_11] : memref<1x128xf32, #tpu.memory_space<vmem>>, vector<1x128xf32>
      %15 = vector.shape_cast %14 : vector<1x128xf32> to vector<1x128xf32>
      %16 = vector.broadcast %15 : vector<1x128xf32> to vector<256x128xf32>
      %c0_12 = arith.constant 0 : index
      %c0_13 = arith.constant 0 : index
      %17 = vector.load %arg6[%c0_12, %c0_13] : memref<256x128xf32, #tpu.memory_space<vmem>>, vector<256x128xf32>
      tpu.vector_store %arg6[%c0_12, %c0_13], %16 {strides = array<i32>} : memref<256x128xf32, #tpu.memory_space<vmem>>, vector<256x128xf32>,
    } else {
    }
    %c0 = arith.constant 0 : index
    %c0_1 = arith.constant 0 : index
    %3 = vector.load %arg6[%c0, %c0_1] : memref<256x128xf32, #tpu.memory_space<vmem>>, vector<256x128xf32>
    %c0_2 = arith.constant 0 : index
    %c0_3 = arith.constant 0 : index
    %4 = vector.load %arg2[%c0_2, %c0_3] : memref<256x128xbf16, #tpu.memory_space<vmem>>, vector<256x128xbf16>
    %5 = arith.index_cast %arg1 : i32 to index
    %c0_4 = arith.constant 0 : index
    %c0_5 = arith.constant 0 : index
    %6 = vector.load %arg3[%5, %c0_4, %c0_5] : memref<1x128x128xbf16, #tpu.memory_space<vmem>>, vector<1x128x128xbf16>
    %7 = vector.shape_cast %6 : vector<1x128x128xbf16> to vector<128x128xbf16>
    %cst = arith.constant dense<0.000000e+00> : vector<256x128xf32>
    %8 = tpu.matmul %4, %7, %cst {dimension_numbers = #tpu.dot_dimension_numbers<[1], [0], [0], [1], [0, 0, 1, 1], [], []>} : vector<256x128xbf16>, vector<128x128xbf16>, vector<256x128xf32> -> vector<256x128xf32>
    %9 = arith.addf %3, %8 : vector<256x128xf32>
    %c0_6 = arith.constant 0 : index
    %c0_7 = arith.constant 0 : index
    %10 = vector.load %arg6[%c0_6, %c0_7] : memref<256x128xf32, #tpu.memory_space<vmem>>, vector<256x128xf32>
    tpu.vector_store %arg6[%c0_6, %c0_7], %9 {strides = array<i32>} : memref<256x128xf32, #tpu.memory_space<vmem>>, vector<256x128xf32>,
    %c0_i32_8 = arith.constant 0 : i32
    %11 = arith.cmpi eq, %arg1, %c0_i32_8 : i32
    %12 = arith.extui %11 : i1 to i32
    %c0_i32_9 = arith.constant 0 : i32
    %13 = arith.cmpi ne, %12, %c0_i32_9 : i32
    scf.if %13 {
      %c0_10 = arith.constant 0 : index
      %c0_11 = arith.constant 0 : index
      %14 = vector.load %arg6[%c0_10, %c0_11] : memref<256x128xf32, #tpu.memory_space<vmem>>, vector<256x128xf32>
      %cst_12 = arith.constant 0.000000e+00 : f32
      %15 = vector.broadcast %cst_12 : f32 to vector<256x128xf32>
      %16 = arith.cmpf oge, %14, %15 : vector<256x128xf32>
      %cst_13 = arith.constant 2.000000e-01 : f32
      %17 = vector.broadcast %cst_13 : f32 to vector<256x128xf32>
      %18 = arith.mulf %17, %14 : vector<256x128xf32>
      %19 = arith.select %16, %14, %18 : vector<256x128xi1>, vector<256x128xf32>
      %20 = arith.truncf %19 : vector<256x128xf32> to vector<256x128xbf16>
      %c0_14 = arith.constant 0 : index
      %c0_15 = arith.constant 0 : index
      %21 = vector.load %arg5[%c0_14, %c0_15] : memref<256x128xbf16, #tpu.memory_space<vmem>>, vector<256x128xbf16>
      tpu.vector_store %arg5[%c0_14, %c0_15], %20 {strides = array<i32>} : memref<256x128xbf16, #tpu.memory_space<vmem>>, vector<256x128xbf16>,
    } else {
    }
    return
  }
  func.func @transform_0(%arg0: i32, %arg1: i32) -> (i32, i32) {
    %c0_i32 = arith.constant 0 : i32
    return %arg0, %arg1 : i32, i32
  }
  func.func @transform_1(%arg0: i32, %arg1: i32) -> (i32, i32, i32) {
    %c0_i32 = arith.constant 0 : i32
    %c0_i32_0 = arith.constant 0 : i32
    %c0_i32_1 = arith.constant 0 : i32
    %c0_i32_2 = arith.constant 0 : i32
    return %c0_i32, %c0_i32_0, %c0_i32_1 : i32, i32, i32
  }
  func.func @transform_2(%arg0: i32, %arg1: i32) -> (i32, i32) {
    %c0_i32 = arith.constant 0 : i32
    %c0_i32_0 = arith.constant 0 : i32
    %c0_i32_1 = arith.constant 0 : i32
    return %c0_i32, %c0_i32_0 : i32, i32
  }
  func.func @transform_3(%arg0: i32, %arg1: i32) -> (i32, i32) {
    %c0_i32 = arith.constant 0 : i32
    %c0_i32_0 = arith.constant 0 : i32
    return %arg0, %c0_i32 : i32, i32
  }
}

module attributes {stable_mosaic.version = 11 : i64} {
  func.func @_conv_mm_kernel(%arg0: i32, %arg1: i32, %arg2: memref<256x128xbf16, #tpu.memory_space<vmem>>, %arg3: memref<1x128x128xbf16, #tpu.memory_space<vmem>>, %arg4: memref<1x128xf32, #tpu.memory_space<vmem>>, %arg5: memref<256x128xbf16, #tpu.memory_space<vmem>>, %arg6: memref<1x2x128xf32, #tpu.memory_space<vmem>>, %arg7: memref<256x128xf32, #tpu.memory_space<vmem>>) attributes {dimension_semantics = [#tpu.dimension_semantics<parallel>, #tpu.dimension_semantics<arbitrary>], iteration_bounds = array<i64: 1, 1>, scalar_prefetch = 0 : i64, scratch_operands = 1 : i64, tpu.core_type = #tpu.core_type<tc>, window_params = [{transform_indices = @transform_0, window_bounds = array<i64: 256, 128>}, {pipeline_mode = #tpu.pipeline_mode<synchronous>, transform_indices = @transform_1, window_bounds = array<i64: 1, 128, 128>}, {pipeline_mode = #tpu.pipeline_mode<synchronous>, transform_indices = @transform_2, window_bounds = array<i64: 1, 128>}, {transform_indices = @transform_3, window_bounds = array<i64: 256, 128>}, {transform_indices = @transform_4, window_bounds = array<i64: 1, 2, 128>}]} {
    %c0_i32 = arith.constant 0 : i32
    %0 = arith.cmpi eq, %arg1, %c0_i32 : i32
    %1 = arith.extui %0 : i1 to i32
    %c0_i32_0 = arith.constant 0 : i32
    %2 = arith.cmpi ne, %1, %c0_i32_0 : i32
    scf.if %2 {
      %c0_10 = arith.constant 0 : index
      %c0_11 = arith.constant 0 : index
      %14 = vector.load %arg4[%c0_10, %c0_11] : memref<1x128xf32, #tpu.memory_space<vmem>>, vector<1x128xf32>
      %15 = vector.shape_cast %14 : vector<1x128xf32> to vector<1x128xf32>
      %16 = vector.broadcast %15 : vector<1x128xf32> to vector<256x128xf32>
      %c0_12 = arith.constant 0 : index
      %c0_13 = arith.constant 0 : index
      %17 = vector.load %arg7[%c0_12, %c0_13] : memref<256x128xf32, #tpu.memory_space<vmem>>, vector<256x128xf32>
      tpu.vector_store %arg7[%c0_12, %c0_13], %16 {strides = array<i32>} : memref<256x128xf32, #tpu.memory_space<vmem>>, vector<256x128xf32>,
    } else {
    }
    %c0 = arith.constant 0 : index
    %c0_1 = arith.constant 0 : index
    %3 = vector.load %arg7[%c0, %c0_1] : memref<256x128xf32, #tpu.memory_space<vmem>>, vector<256x128xf32>
    %c0_2 = arith.constant 0 : index
    %c0_3 = arith.constant 0 : index
    %4 = vector.load %arg2[%c0_2, %c0_3] : memref<256x128xbf16, #tpu.memory_space<vmem>>, vector<256x128xbf16>
    %5 = arith.index_cast %arg1 : i32 to index
    %c0_4 = arith.constant 0 : index
    %c0_5 = arith.constant 0 : index
    %6 = vector.load %arg3[%5, %c0_4, %c0_5] : memref<1x128x128xbf16, #tpu.memory_space<vmem>>, vector<1x128x128xbf16>
    %7 = vector.shape_cast %6 : vector<1x128x128xbf16> to vector<128x128xbf16>
    %cst = arith.constant dense<0.000000e+00> : vector<256x128xf32>
    %8 = tpu.matmul %4, %7, %cst {dimension_numbers = #tpu.dot_dimension_numbers<[1], [0], [0], [1], [0, 0, 1, 1], [], []>} : vector<256x128xbf16>, vector<128x128xbf16>, vector<256x128xf32> -> vector<256x128xf32>
    %9 = arith.addf %3, %8 : vector<256x128xf32>
    %c0_6 = arith.constant 0 : index
    %c0_7 = arith.constant 0 : index
    %10 = vector.load %arg7[%c0_6, %c0_7] : memref<256x128xf32, #tpu.memory_space<vmem>>, vector<256x128xf32>
    tpu.vector_store %arg7[%c0_6, %c0_7], %9 {strides = array<i32>} : memref<256x128xf32, #tpu.memory_space<vmem>>, vector<256x128xf32>,
    %c0_i32_8 = arith.constant 0 : i32
    %11 = arith.cmpi eq, %arg1, %c0_i32_8 : i32
    %12 = arith.extui %11 : i1 to i32
    %c0_i32_9 = arith.constant 0 : i32
    %13 = arith.cmpi ne, %12, %c0_i32_9 : i32
    scf.if %13 {
      %c0_10 = arith.constant 0 : index
      %c0_11 = arith.constant 0 : index
      %14 = vector.load %arg7[%c0_10, %c0_11] : memref<256x128xf32, #tpu.memory_space<vmem>>, vector<256x128xf32>
      %cst_12 = arith.constant dense<0.000000e+00> : vector<128xf32>
      %15 = vector.multi_reduction <add>, %14, %cst_12 [0] : vector<256x128xf32> to vector<128xf32>
      %16 = vector.shape_cast %15 : vector<128xf32> to vector<1x128xf32>
      %17 = arith.mulf %14, %14 : vector<256x128xf32>
      %cst_13 = arith.constant dense<0.000000e+00> : vector<128xf32>
      %18 = vector.multi_reduction <add>, %17, %cst_13 [0] : vector<256x128xf32> to vector<128xf32>
      %19 = vector.shape_cast %18 : vector<128xf32> to vector<1x128xf32>
      %20 = tpu.concatenate %16, %19 in 0 : vector<1x128xf32>, vector<1x128xf32> -> vector<2x128xf32>
      %21 = vector.shape_cast %20 : vector<2x128xf32> to vector<1x2x128xf32>
      %c0_14 = arith.constant 0 : index
      %c0_15 = arith.constant 0 : index
      %c0_16 = arith.constant 0 : index
      %22 = vector.load %arg6[%c0_14, %c0_15, %c0_16] : memref<1x2x128xf32, #tpu.memory_space<vmem>>, vector<1x2x128xf32>
      tpu.vector_store %arg6[%c0_14, %c0_15, %c0_16], %21 {strides = array<i32>} : memref<1x2x128xf32, #tpu.memory_space<vmem>>, vector<1x2x128xf32>,
      %23 = arith.truncf %14 : vector<256x128xf32> to vector<256x128xbf16>
      %c0_17 = arith.constant 0 : index
      %c0_18 = arith.constant 0 : index
      %24 = vector.load %arg5[%c0_17, %c0_18] : memref<256x128xbf16, #tpu.memory_space<vmem>>, vector<256x128xbf16>
      tpu.vector_store %arg5[%c0_17, %c0_18], %23 {strides = array<i32>} : memref<256x128xbf16, #tpu.memory_space<vmem>>, vector<256x128xbf16>,
    } else {
    }
    return
  }
  func.func @transform_0(%arg0: i32, %arg1: i32) -> (i32, i32) {
    %c0_i32 = arith.constant 0 : i32
    return %arg0, %arg1 : i32, i32
  }
  func.func @transform_1(%arg0: i32, %arg1: i32) -> (i32, i32, i32) {
    %c0_i32 = arith.constant 0 : i32
    %c0_i32_0 = arith.constant 0 : i32
    %c0_i32_1 = arith.constant 0 : i32
    %c0_i32_2 = arith.constant 0 : i32
    return %c0_i32, %c0_i32_0, %c0_i32_1 : i32, i32, i32
  }
  func.func @transform_2(%arg0: i32, %arg1: i32) -> (i32, i32) {
    %c0_i32 = arith.constant 0 : i32
    %c0_i32_0 = arith.constant 0 : i32
    %c0_i32_1 = arith.constant 0 : i32
    return %c0_i32, %c0_i32_0 : i32, i32
  }
  func.func @transform_3(%arg0: i32, %arg1: i32) -> (i32, i32) {
    %c0_i32 = arith.constant 0 : i32
    %c0_i32_0 = arith.constant 0 : i32
    return %arg0, %c0_i32 : i32, i32
  }
  func.func @transform_4(%arg0: i32, %arg1: i32) -> (i32, i32, i32) {
    %c0_i32 = arith.constant 0 : i32
    %c0_i32_0 = arith.constant 0 : i32
    %c0_i32_1 = arith.constant 0 : i32
    return %arg0, %c0_i32, %c0_i32_0 : i32, i32, i32
  }
}

module attributes {stable_mosaic.version = 11 : i64} {
  func.func @_conv_mm_kernel(%arg0: i32, %arg1: i32, %arg2: memref<256x256xbf16, #tpu.memory_space<vmem>>, %arg3: memref<1x256x128xbf16, #tpu.memory_space<vmem>>, %arg4: memref<1x128xf32, #tpu.memory_space<vmem>>, %arg5: memref<256x128xbf16, #tpu.memory_space<vmem>>, %arg6: memref<1x2x128xf32, #tpu.memory_space<vmem>>, %arg7: memref<256x128xf32, #tpu.memory_space<vmem>>) attributes {dimension_semantics = [#tpu.dimension_semantics<parallel>, #tpu.dimension_semantics<arbitrary>], iteration_bounds = array<i64: 1, 1>, scalar_prefetch = 0 : i64, scratch_operands = 1 : i64, tpu.core_type = #tpu.core_type<tc>, window_params = [{transform_indices = @transform_0, window_bounds = array<i64: 256, 256>}, {pipeline_mode = #tpu.pipeline_mode<synchronous>, transform_indices = @transform_1, window_bounds = array<i64: 1, 256, 128>}, {pipeline_mode = #tpu.pipeline_mode<synchronous>, transform_indices = @transform_2, window_bounds = array<i64: 1, 128>}, {transform_indices = @transform_3, window_bounds = array<i64: 256, 128>}, {transform_indices = @transform_4, window_bounds = array<i64: 1, 2, 128>}]} {
    %c0_i32 = arith.constant 0 : i32
    %0 = arith.cmpi eq, %arg1, %c0_i32 : i32
    %1 = arith.extui %0 : i1 to i32
    %c0_i32_0 = arith.constant 0 : i32
    %2 = arith.cmpi ne, %1, %c0_i32_0 : i32
    scf.if %2 {
      %c0_10 = arith.constant 0 : index
      %c0_11 = arith.constant 0 : index
      %14 = vector.load %arg4[%c0_10, %c0_11] : memref<1x128xf32, #tpu.memory_space<vmem>>, vector<1x128xf32>
      %15 = vector.shape_cast %14 : vector<1x128xf32> to vector<1x128xf32>
      %16 = vector.broadcast %15 : vector<1x128xf32> to vector<256x128xf32>
      %c0_12 = arith.constant 0 : index
      %c0_13 = arith.constant 0 : index
      %17 = vector.load %arg7[%c0_12, %c0_13] : memref<256x128xf32, #tpu.memory_space<vmem>>, vector<256x128xf32>
      tpu.vector_store %arg7[%c0_12, %c0_13], %16 {strides = array<i32>} : memref<256x128xf32, #tpu.memory_space<vmem>>, vector<256x128xf32>,
    } else {
    }
    %c0 = arith.constant 0 : index
    %c0_1 = arith.constant 0 : index
    %3 = vector.load %arg7[%c0, %c0_1] : memref<256x128xf32, #tpu.memory_space<vmem>>, vector<256x128xf32>
    %c0_2 = arith.constant 0 : index
    %c0_3 = arith.constant 0 : index
    %4 = vector.load %arg2[%c0_2, %c0_3] : memref<256x256xbf16, #tpu.memory_space<vmem>>, vector<256x256xbf16>
    %5 = arith.index_cast %arg1 : i32 to index
    %c0_4 = arith.constant 0 : index
    %c0_5 = arith.constant 0 : index
    %6 = vector.load %arg3[%5, %c0_4, %c0_5] : memref<1x256x128xbf16, #tpu.memory_space<vmem>>, vector<1x256x128xbf16>
    %7 = vector.shape_cast %6 : vector<1x256x128xbf16> to vector<256x128xbf16>
    %cst = arith.constant dense<0.000000e+00> : vector<256x128xf32>
    %8 = tpu.matmul %4, %7, %cst {dimension_numbers = #tpu.dot_dimension_numbers<[1], [0], [0], [1], [0, 0, 1, 1], [], []>} : vector<256x256xbf16>, vector<256x128xbf16>, vector<256x128xf32> -> vector<256x128xf32>
    %9 = arith.addf %3, %8 : vector<256x128xf32>
    %c0_6 = arith.constant 0 : index
    %c0_7 = arith.constant 0 : index
    %10 = vector.load %arg7[%c0_6, %c0_7] : memref<256x128xf32, #tpu.memory_space<vmem>>, vector<256x128xf32>
    tpu.vector_store %arg7[%c0_6, %c0_7], %9 {strides = array<i32>} : memref<256x128xf32, #tpu.memory_space<vmem>>, vector<256x128xf32>,
    %c0_i32_8 = arith.constant 0 : i32
    %11 = arith.cmpi eq, %arg1, %c0_i32_8 : i32
    %12 = arith.extui %11 : i1 to i32
    %c0_i32_9 = arith.constant 0 : i32
    %13 = arith.cmpi ne, %12, %c0_i32_9 : i32
    scf.if %13 {
      %c0_10 = arith.constant 0 : index
      %c0_11 = arith.constant 0 : index
      %14 = vector.load %arg7[%c0_10, %c0_11] : memref<256x128xf32, #tpu.memory_space<vmem>>, vector<256x128xf32>
      %cst_12 = arith.constant dense<0.000000e+00> : vector<128xf32>
      %15 = vector.multi_reduction <add>, %14, %cst_12 [0] : vector<256x128xf32> to vector<128xf32>
      %16 = vector.shape_cast %15 : vector<128xf32> to vector<1x128xf32>
      %17 = arith.mulf %14, %14 : vector<256x128xf32>
      %cst_13 = arith.constant dense<0.000000e+00> : vector<128xf32>
      %18 = vector.multi_reduction <add>, %17, %cst_13 [0] : vector<256x128xf32> to vector<128xf32>
      %19 = vector.shape_cast %18 : vector<128xf32> to vector<1x128xf32>
      %20 = tpu.concatenate %16, %19 in 0 : vector<1x128xf32>, vector<1x128xf32> -> vector<2x128xf32>
      %21 = vector.shape_cast %20 : vector<2x128xf32> to vector<1x2x128xf32>
      %c0_14 = arith.constant 0 : index
      %c0_15 = arith.constant 0 : index
      %c0_16 = arith.constant 0 : index
      %22 = vector.load %arg6[%c0_14, %c0_15, %c0_16] : memref<1x2x128xf32, #tpu.memory_space<vmem>>, vector<1x2x128xf32>
      tpu.vector_store %arg6[%c0_14, %c0_15, %c0_16], %21 {strides = array<i32>} : memref<1x2x128xf32, #tpu.memory_space<vmem>>, vector<1x2x128xf32>,
      %23 = arith.truncf %14 : vector<256x128xf32> to vector<256x128xbf16>
      %c0_17 = arith.constant 0 : index
      %c0_18 = arith.constant 0 : index
      %24 = vector.load %arg5[%c0_17, %c0_18] : memref<256x128xbf16, #tpu.memory_space<vmem>>, vector<256x128xbf16>
      tpu.vector_store %arg5[%c0_17, %c0_18], %23 {strides = array<i32>} : memref<256x128xbf16, #tpu.memory_space<vmem>>, vector<256x128xbf16>,
    } else {
    }
    return
  }
  func.func @transform_0(%arg0: i32, %arg1: i32) -> (i32, i32) {
    %c0_i32 = arith.constant 0 : i32
    return %arg0, %arg1 : i32, i32
  }
  func.func @transform_1(%arg0: i32, %arg1: i32) -> (i32, i32, i32) {
    %c0_i32 = arith.constant 0 : i32
    %c0_i32_0 = arith.constant 0 : i32
    %c0_i32_1 = arith.constant 0 : i32
    %c0_i32_2 = arith.constant 0 : i32
    return %c0_i32, %c0_i32_0, %c0_i32_1 : i32, i32, i32
  }
  func.func @transform_2(%arg0: i32, %arg1: i32) -> (i32, i32) {
    %c0_i32 = arith.constant 0 : i32
    %c0_i32_0 = arith.constant 0 : i32
    %c0_i32_1 = arith.constant 0 : i32
    return %c0_i32, %c0_i32_0 : i32, i32
  }
  func.func @transform_3(%arg0: i32, %arg1: i32) -> (i32, i32) {
    %c0_i32 = arith.constant 0 : i32
    %c0_i32_0 = arith.constant 0 : i32
    return %arg0, %c0_i32 : i32, i32
  }
  func.func @transform_4(%arg0: i32, %arg1: i32) -> (i32, i32, i32) {
    %c0_i32 = arith.constant 0 : i32
    %c0_i32_0 = arith.constant 0 : i32
    %c0_i32_1 = arith.constant 0 : i32
    return %arg0, %c0_i32, %c0_i32_0 : i32, i32, i32
  }
}

module attributes {stable_mosaic.version = 11 : i64} {
  func.func @_conv_mm_kernel(%arg0: i32, %arg1: i32, %arg2: memref<256x512xbf16, #tpu.memory_space<vmem>>, %arg3: memref<1x512x128xbf16, #tpu.memory_space<vmem>>, %arg4: memref<1x128xf32, #tpu.memory_space<vmem>>, %arg5: memref<256x128xbf16, #tpu.memory_space<vmem>>, %arg6: memref<1x2x128xf32, #tpu.memory_space<vmem>>, %arg7: memref<256x128xf32, #tpu.memory_space<vmem>>) attributes {dimension_semantics = [#tpu.dimension_semantics<parallel>, #tpu.dimension_semantics<arbitrary>], iteration_bounds = array<i64: 1, 1>, scalar_prefetch = 0 : i64, scratch_operands = 1 : i64, tpu.core_type = #tpu.core_type<tc>, window_params = [{transform_indices = @transform_0, window_bounds = array<i64: 256, 512>}, {pipeline_mode = #tpu.pipeline_mode<synchronous>, transform_indices = @transform_1, window_bounds = array<i64: 1, 512, 128>}, {pipeline_mode = #tpu.pipeline_mode<synchronous>, transform_indices = @transform_2, window_bounds = array<i64: 1, 128>}, {transform_indices = @transform_3, window_bounds = array<i64: 256, 128>}, {transform_indices = @transform_4, window_bounds = array<i64: 1, 2, 128>}]} {
    %c0_i32 = arith.constant 0 : i32
    %0 = arith.cmpi eq, %arg1, %c0_i32 : i32
    %1 = arith.extui %0 : i1 to i32
    %c0_i32_0 = arith.constant 0 : i32
    %2 = arith.cmpi ne, %1, %c0_i32_0 : i32
    scf.if %2 {
      %c0_10 = arith.constant 0 : index
      %c0_11 = arith.constant 0 : index
      %14 = vector.load %arg4[%c0_10, %c0_11] : memref<1x128xf32, #tpu.memory_space<vmem>>, vector<1x128xf32>
      %15 = vector.shape_cast %14 : vector<1x128xf32> to vector<1x128xf32>
      %16 = vector.broadcast %15 : vector<1x128xf32> to vector<256x128xf32>
      %c0_12 = arith.constant 0 : index
      %c0_13 = arith.constant 0 : index
      %17 = vector.load %arg7[%c0_12, %c0_13] : memref<256x128xf32, #tpu.memory_space<vmem>>, vector<256x128xf32>
      tpu.vector_store %arg7[%c0_12, %c0_13], %16 {strides = array<i32>} : memref<256x128xf32, #tpu.memory_space<vmem>>, vector<256x128xf32>,
    } else {
    }
    %c0 = arith.constant 0 : index
    %c0_1 = arith.constant 0 : index
    %3 = vector.load %arg7[%c0, %c0_1] : memref<256x128xf32, #tpu.memory_space<vmem>>, vector<256x128xf32>
    %c0_2 = arith.constant 0 : index
    %c0_3 = arith.constant 0 : index
    %4 = vector.load %arg2[%c0_2, %c0_3] : memref<256x512xbf16, #tpu.memory_space<vmem>>, vector<256x512xbf16>
    %5 = arith.index_cast %arg1 : i32 to index
    %c0_4 = arith.constant 0 : index
    %c0_5 = arith.constant 0 : index
    %6 = vector.load %arg3[%5, %c0_4, %c0_5] : memref<1x512x128xbf16, #tpu.memory_space<vmem>>, vector<1x512x128xbf16>
    %7 = vector.shape_cast %6 : vector<1x512x128xbf16> to vector<512x128xbf16>
    %cst = arith.constant dense<0.000000e+00> : vector<256x128xf32>
    %8 = tpu.matmul %4, %7, %cst {dimension_numbers = #tpu.dot_dimension_numbers<[1], [0], [0], [1], [0, 0, 1, 1], [], []>} : vector<256x512xbf16>, vector<512x128xbf16>, vector<256x128xf32> -> vector<256x128xf32>
    %9 = arith.addf %3, %8 : vector<256x128xf32>
    %c0_6 = arith.constant 0 : index
    %c0_7 = arith.constant 0 : index
    %10 = vector.load %arg7[%c0_6, %c0_7] : memref<256x128xf32, #tpu.memory_space<vmem>>, vector<256x128xf32>
    tpu.vector_store %arg7[%c0_6, %c0_7], %9 {strides = array<i32>} : memref<256x128xf32, #tpu.memory_space<vmem>>, vector<256x128xf32>,
    %c0_i32_8 = arith.constant 0 : i32
    %11 = arith.cmpi eq, %arg1, %c0_i32_8 : i32
    %12 = arith.extui %11 : i1 to i32
    %c0_i32_9 = arith.constant 0 : i32
    %13 = arith.cmpi ne, %12, %c0_i32_9 : i32
    scf.if %13 {
      %c0_10 = arith.constant 0 : index
      %c0_11 = arith.constant 0 : index
      %14 = vector.load %arg7[%c0_10, %c0_11] : memref<256x128xf32, #tpu.memory_space<vmem>>, vector<256x128xf32>
      %cst_12 = arith.constant dense<0.000000e+00> : vector<128xf32>
      %15 = vector.multi_reduction <add>, %14, %cst_12 [0] : vector<256x128xf32> to vector<128xf32>
      %16 = vector.shape_cast %15 : vector<128xf32> to vector<1x128xf32>
      %17 = arith.mulf %14, %14 : vector<256x128xf32>
      %cst_13 = arith.constant dense<0.000000e+00> : vector<128xf32>
      %18 = vector.multi_reduction <add>, %17, %cst_13 [0] : vector<256x128xf32> to vector<128xf32>
      %19 = vector.shape_cast %18 : vector<128xf32> to vector<1x128xf32>
      %20 = tpu.concatenate %16, %19 in 0 : vector<1x128xf32>, vector<1x128xf32> -> vector<2x128xf32>
      %21 = vector.shape_cast %20 : vector<2x128xf32> to vector<1x2x128xf32>
      %c0_14 = arith.constant 0 : index
      %c0_15 = arith.constant 0 : index
      %c0_16 = arith.constant 0 : index
      %22 = vector.load %arg6[%c0_14, %c0_15, %c0_16] : memref<1x2x128xf32, #tpu.memory_space<vmem>>, vector<1x2x128xf32>
      tpu.vector_store %arg6[%c0_14, %c0_15, %c0_16], %21 {strides = array<i32>} : memref<1x2x128xf32, #tpu.memory_space<vmem>>, vector<1x2x128xf32>,
      %23 = arith.truncf %14 : vector<256x128xf32> to vector<256x128xbf16>
      %c0_17 = arith.constant 0 : index
      %c0_18 = arith.constant 0 : index
      %24 = vector.load %arg5[%c0_17, %c0_18] : memref<256x128xbf16, #tpu.memory_space<vmem>>, vector<256x128xbf16>
      tpu.vector_store %arg5[%c0_17, %c0_18], %23 {strides = array<i32>} : memref<256x128xbf16, #tpu.memory_space<vmem>>, vector<256x128xbf16>,
    } else {
    }
    return
  }
  func.func @transform_0(%arg0: i32, %arg1: i32) -> (i32, i32) {
    %c0_i32 = arith.constant 0 : i32
    return %arg0, %arg1 : i32, i32
  }
  func.func @transform_1(%arg0: i32, %arg1: i32) -> (i32, i32, i32) {
    %c0_i32 = arith.constant 0 : i32
    %c0_i32_0 = arith.constant 0 : i32
    %c0_i32_1 = arith.constant 0 : i32
    %c0_i32_2 = arith.constant 0 : i32
    return %c0_i32, %c0_i32_0, %c0_i32_1 : i32, i32, i32
  }
  func.func @transform_2(%arg0: i32, %arg1: i32) -> (i32, i32) {
    %c0_i32 = arith.constant 0 : i32
    %c0_i32_0 = arith.constant 0 : i32
    %c0_i32_1 = arith.constant 0 : i32
    return %c0_i32, %c0_i32_0 : i32, i32
  }
  func.func @transform_3(%arg0: i32, %arg1: i32) -> (i32, i32) {
    %c0_i32 = arith.constant 0 : i32
    %c0_i32_0 = arith.constant 0 : i32
    return %arg0, %c0_i32 : i32, i32
  }
  func.func @transform_4(%arg0: i32, %arg1: i32) -> (i32, i32, i32) {
    %c0_i32 = arith.constant 0 : i32
    %c0_i32_0 = arith.constant 0 : i32
    %c0_i32_1 = arith.constant 0 : i32
    return %arg0, %c0_i32, %c0_i32_0 : i32, i32, i32
  }
}

module attributes {stable_mosaic.version = 11 : i64} {
  func.func @_conv_mm_kernel(%arg0: i32, %arg1: i32, %arg2: memref<256x1024xbf16, #tpu.memory_space<vmem>>, %arg3: memref<1x1024x128xbf16, #tpu.memory_space<vmem>>, %arg4: memref<1x128xf32, #tpu.memory_space<vmem>>, %arg5: memref<256x128xf32, #tpu.memory_space<vmem>>, %arg6: memref<256x128xf32, #tpu.memory_space<vmem>>) attributes {dimension_semantics = [#tpu.dimension_semantics<parallel>, #tpu.dimension_semantics<arbitrary>], iteration_bounds = array<i64: 1, 1>, scalar_prefetch = 0 : i64, scratch_operands = 1 : i64, tpu.core_type = #tpu.core_type<tc>, window_params = [{transform_indices = @transform_0, window_bounds = array<i64: 256, 1024>}, {pipeline_mode = #tpu.pipeline_mode<synchronous>, transform_indices = @transform_1, window_bounds = array<i64: 1, 1024, 128>}, {pipeline_mode = #tpu.pipeline_mode<synchronous>, transform_indices = @transform_2, window_bounds = array<i64: 1, 128>}, {transform_indices = @transform_3, window_bounds = array<i64: 256, 128>}]} {
    %c0_i32 = arith.constant 0 : i32
    %0 = arith.cmpi eq, %arg1, %c0_i32 : i32
    %1 = arith.extui %0 : i1 to i32
    %c0_i32_0 = arith.constant 0 : i32
    %2 = arith.cmpi ne, %1, %c0_i32_0 : i32
    scf.if %2 {
      %c0_10 = arith.constant 0 : index
      %c0_11 = arith.constant 0 : index
      %14 = vector.load %arg4[%c0_10, %c0_11] : memref<1x128xf32, #tpu.memory_space<vmem>>, vector<1x128xf32>
      %15 = vector.shape_cast %14 : vector<1x128xf32> to vector<1x128xf32>
      %16 = vector.broadcast %15 : vector<1x128xf32> to vector<256x128xf32>
      %c0_12 = arith.constant 0 : index
      %c0_13 = arith.constant 0 : index
      %17 = vector.load %arg6[%c0_12, %c0_13] : memref<256x128xf32, #tpu.memory_space<vmem>>, vector<256x128xf32>
      tpu.vector_store %arg6[%c0_12, %c0_13], %16 {strides = array<i32>} : memref<256x128xf32, #tpu.memory_space<vmem>>, vector<256x128xf32>,
    } else {
    }
    %c0 = arith.constant 0 : index
    %c0_1 = arith.constant 0 : index
    %3 = vector.load %arg6[%c0, %c0_1] : memref<256x128xf32, #tpu.memory_space<vmem>>, vector<256x128xf32>
    %c0_2 = arith.constant 0 : index
    %c0_3 = arith.constant 0 : index
    %4 = vector.load %arg2[%c0_2, %c0_3] : memref<256x1024xbf16, #tpu.memory_space<vmem>>, vector<256x1024xbf16>
    %5 = arith.index_cast %arg1 : i32 to index
    %c0_4 = arith.constant 0 : index
    %c0_5 = arith.constant 0 : index
    %6 = vector.load %arg3[%5, %c0_4, %c0_5] : memref<1x1024x128xbf16, #tpu.memory_space<vmem>>, vector<1x1024x128xbf16>
    %7 = vector.shape_cast %6 : vector<1x1024x128xbf16> to vector<1024x128xbf16>
    %cst = arith.constant dense<0.000000e+00> : vector<256x128xf32>
    %8 = tpu.matmul %4, %7, %cst {dimension_numbers = #tpu.dot_dimension_numbers<[1], [0], [0], [1], [0, 0, 1, 1], [], []>} : vector<256x1024xbf16>, vector<1024x128xbf16>, vector<256x128xf32> -> vector<256x128xf32>
    %9 = arith.addf %3, %8 : vector<256x128xf32>
    %c0_6 = arith.constant 0 : index
    %c0_7 = arith.constant 0 : index
    %10 = vector.load %arg6[%c0_6, %c0_7] : memref<256x128xf32, #tpu.memory_space<vmem>>, vector<256x128xf32>
    tpu.vector_store %arg6[%c0_6, %c0_7], %9 {strides = array<i32>} : memref<256x128xf32, #tpu.memory_space<vmem>>, vector<256x128xf32>,
    %c0_i32_8 = arith.constant 0 : i32
    %11 = arith.cmpi eq, %arg1, %c0_i32_8 : i32
    %12 = arith.extui %11 : i1 to i32
    %c0_i32_9 = arith.constant 0 : i32
    %13 = arith.cmpi ne, %12, %c0_i32_9 : i32
    scf.if %13 {
      %c0_10 = arith.constant 0 : index
      %c0_11 = arith.constant 0 : index
      %14 = vector.load %arg6[%c0_10, %c0_11] : memref<256x128xf32, #tpu.memory_space<vmem>>, vector<256x128xf32>
      %c0_12 = arith.constant 0 : index
      %c0_13 = arith.constant 0 : index
      %15 = vector.load %arg5[%c0_12, %c0_13] : memref<256x128xf32, #tpu.memory_space<vmem>>, vector<256x128xf32>
      tpu.vector_store %arg5[%c0_12, %c0_13], %14 {strides = array<i32>} : memref<256x128xf32, #tpu.memory_space<vmem>>, vector<256x128xf32>,
    } else {
    }
    return
  }
  func.func @transform_0(%arg0: i32, %arg1: i32) -> (i32, i32) {
    %c0_i32 = arith.constant 0 : i32
    return %arg0, %arg1 : i32, i32
  }
  func.func @transform_1(%arg0: i32, %arg1: i32) -> (i32, i32, i32) {
    %c0_i32 = arith.constant 0 : i32
    %c0_i32_0 = arith.constant 0 : i32
    %c0_i32_1 = arith.constant 0 : i32
    %c0_i32_2 = arith.constant 0 : i32
    return %c0_i32, %c0_i32_0, %c0_i32_1 : i32, i32, i32
  }
  func.func @transform_2(%arg0: i32, %arg1: i32) -> (i32, i32) {
    %c0_i32 = arith.constant 0 : i32
    %c0_i32_0 = arith.constant 0 : i32
    %c0_i32_1 = arith.constant 0 : i32
    return %c0_i32, %c0_i32_0 : i32, i32
  }
  func.func @transform_3(%arg0: i32, %arg1: i32) -> (i32, i32) {
    %c0_i32 = arith.constant 0 : i32
    %c0_i32_0 = arith.constant 0 : i32
    return %arg0, %c0_i32 : i32, i32
  }
}

</mosaic_0001>

<bundles_post_ra>
// kernel: _lambda_.5
= control target key start
LH: loop header
LB: loop body
LE: loop exit
PB: predicated region body
PF: predicated region fallthrough
CT: control target
= control target key end

     0   :  { %s1282_s1 = inlined_call_operand.vmem [shape: bf16[1,128,128], index: 1, kind: input, shape index: {}]   ;;  %s1283_s0 = inlined_call_operand.vmem [shape: bf16[256,128], index: 0, kind: input, shape index: {}]   ;;  %s1284_s2 = inlined_call_operand.vmem [shape: f32[1,128], index: 2, kind: input, shape index: {}]   ;;  %s1285_s3 = inlined_call_operand.vmem [shape: bf16[256,128], index: 3, kind: output, shape index: {}]  }
   0x1   :  { %v1077_v0 = vld [vmem:[%s1282_s1 + $0x38] sm:$0xff]   ;;  %v1078_v1 = vld [vmem:[%s1282_s1 + $0x30] sm:$0xff]   ;;  %v1079_v2 = vld [vmem:[%s1282_s1 + $0x28] sm:$0xff]  }
   0x2   :  { %1013 = vmatprep.subr.bf16.mxu0 %v1077_v0  ;;  %1061 = vmatprep.subr.bf16.mxu1 %v1077_v0  ;;  %v1080_v3 = vld [vmem:[%s1282_s1 + $0x20] sm:$0xff]   ;;  %v1081_v6 = vld [vmem:[%s1282_s1 + $0x18] sm:$0xff]   ;;  %v1082_v7 = vld [vmem:[%s1282_s1 + $0x10] sm:$0xff]  }
   0x3   :  { %1014 = vmatpush3.bf16.msra.mxu0 %v1077_v0  ;;  %1069 = vmatpush3.bf16.msra.mxu1 %v1077_v0  ;;  %v1085_v4 = vld [vmem:[%s1283_s0] sm:$0xff]   ;;  %v1083_v8 = vld [vmem:[%s1282_s1 + $0x8] sm:$0xff]   ;;  %v1089_v12 = vld [vmem:[%s1283_s0 + $0x10] sm:$0xff]  }
   0x4   :  { %1015 = vmatprep.subr.bf16.mxu0 %v1078_v1  ;;  %1062 = vmatprep.subr.bf16.mxu1 %v1078_v1  ;;  %v1086_v5 = vld [vmem:[%s1283_s0 + $0x40] sm:$0xff]   ;;  %v1087_v10 = vld [vmem:[%s1283_s0 + $0x8] sm:$0xff]   ;;  %v1090_v13 = vld [vmem:[%s1283_s0 + $0x50] sm:$0xff]  }
   0x5   :  { %1029 = vmatprep.mubr.bf16.mxu0 %v1085_v4  ;;  %1045 = vmatprep.mubr.bf16.mxu1 %v1086_v5  ;;  %v1084_v9 = vld [vmem:[%s1282_s1] sm:$0xff]   ;;  %v1088_v11 = vld [vmem:[%s1283_s0 + $0x48] sm:$0xff]   ;;  %v1091_v14 = vld [vmem:[%s1283_s0 + $0x18] sm:$0xff]  }
   0x6   :  { %v1092_v15 = vld [vmem:[%s1283_s0 + $0x58] sm:$0xff]   ;;  %v1093_v16 = vld [vmem:[%s1283_s0 + $0x20] sm:$0xff]   ;;  %v1095_v18 = vld [vmem:[%s1283_s0 + $0x28] sm:$0xff]  }
   0x7   :  { %1016 = vmatpush3.bf16.msra.mxu0 %v1078_v1  ;;  %1070 = vmatpush3.bf16.msra.mxu1 %v1078_v1  ;;  %v1094_v17 = vld [vmem:[%s1283_s0 + $0x60] sm:$0xff]   ;;  %v1096_v19 = vld [vmem:[%s1283_s0 + $0x68] sm:$0xff]   ;;  %v1097_v20 = vld [vmem:[%s1283_s0 + $0x30] sm:$0xff]  }
   0x8   :  { %1017 = vmatprep.subr.bf16.mxu0 %v1079_v2  ;;  %1063 = vmatprep.subr.bf16.mxu1 %v1079_v2  ;;  %v1098_v21 = vld [vmem:[%s1283_s0 + $0x70] sm:$0xff]   ;;  %v1099_v22 = vld [vmem:[%s1283_s0 + $0x38] sm:$0xff]   ;;  %v1196_v24 = vld [vmem:[%s1284_s2] ss:$0 sm:$0xff] }
   0x9   :  { %v1100_v23 = vld [vmem:[%s1283_s0 + $0x78] sm:$0xff]  }
   0xb   :  { %1018 = vmatpush3.bf16.msra.mxu0 %v1079_v2  ;;  %1071 = vmatpush3.bf16.msra.mxu1 %v1079_v2 }
   0xc   :  { %1019 = vmatprep.subr.bf16.mxu0 %v1080_v3  ;;  %1064 = vmatprep.subr.bf16.mxu1 %v1080_v3 }
   0xf   :  { %1020 = vmatpush3.bf16.msra.mxu0 %v1080_v3  ;;  %1072 = vmatpush3.bf16.msra.mxu1 %v1080_v3 }
  0x10   :  { %1021 = vmatprep.subr.bf16.mxu0 %v1081_v6  ;;  %1065 = vmatprep.subr.bf16.mxu1 %v1081_v6 }
  0x13   :  { %1022 = vmatpush3.bf16.msra.mxu0 %v1081_v6  ;;  %1073 = vmatpush3.bf16.msra.mxu1 %v1081_v6 }
  0x14   :  { %1023 = vmatprep.subr.bf16.mxu0 %v1082_v7  ;;  %1066 = vmatprep.subr.bf16.mxu1 %v1082_v7 }
  0x17   :  { %1024 = vmatpush3.bf16.msra.mxu0 %v1082_v7  ;;  %1074 = vmatpush3.bf16.msra.mxu1 %v1082_v7 }
  0x18   :  { %1025 = vmatprep.subr.bf16.mxu0 %v1083_v8  ;;  %1067 = vmatprep.subr.bf16.mxu1 %v1083_v8 }
  0x1b   :  { %1026 = vmatpush3.bf16.msra.mxu0 %v1083_v8  ;;  %1075 = vmatpush3.bf16.msra.mxu1 %v1083_v8 }
  0x1c   :  { %1027 = vmatprep.subr.bf16.mxu0 %v1084_v9  ;;  %1068 = vmatprep.subr.bf16.mxu1 %v1084_v9 }
  0x1f   :  { %1028 = vmatpush3.bf16.msra.mxu0 %v1084_v9  ;;  %1076 = vmatpush3.bf16.msra.mxu1 %v1084_v9 }
  0x22   :  { %1030 = vmatmul.mubr.bf16.vlgmr.msra.gmra.mxu0 %v1087_v10  ;;  %1046 = vmatmul.mubr.bf16.vlgmr.msra.gmra.mxu1 %v1088_v11 }
  0x23   :  { %1033 = vmatprep.mubr.bf16.mxu0 %v1089_v12  ;;  %1049 = vmatprep.mubr.bf16.mxu1 %v1090_v13 }
  0x2a   :  { %1034 = vmatmul.mubr.bf16.gmra.mxu0 %v1091_v14  ;;  %1050 = vmatmul.mubr.bf16.gmra.mxu1 %v1092_v15 }
  0x2b   :  { %1037 = vmatprep.mubr.bf16.mxu0 %v1093_v16  ;;  %1053 = vmatprep.mubr.bf16.mxu1 %v1094_v17 }
  0x32   :  { %1038 = vmatmul.mubr.bf16.gmra.mxu0 %v1095_v18  ;;  %1054 = vmatmul.mubr.bf16.gmra.mxu1 %v1096_v19 }
  0x33   :  { %1041 = vmatprep.mubr.bf16.mxu0 %v1097_v20  ;;  %1057 = vmatprep.mubr.bf16.mxu1 %v1098_v21 }
  0x3a   :  { %1042 = vmatmul.mubr.bf16.gmra.mxu0 %v1099_v22  ;;  %1058 = vmatmul.mubr.bf16.gmra.mxu1 %v1100_v23 }
  0xe2   :  { %v1031_v25 = vpop.f32.mrf.mxu0  ;;  %v1047_v26 = vpop.f32.mrf.mxu1 }
  0xe3   :  { %v448_v27 = vadd.f32 %v1031_v25, %v1196_v24  ;;  %v464_v28 = vadd.f32 %v1047_v26, %v1196_v24 }
  0xe4   :  { %v319_v29 = vpop.f32.mrf.mxu0  ;;  %v383_v30 = vpop.f32.mrf.mxu1 }
  0xe5   :  { %vm547_vm0 = vcmp.ge.f32.partialorder %v448_v27, 0.0  ;;  %v579_v31 = vmul.f32 0.2, %v448_v27  ;;  %vm563_vm1 = vcmp.ge.f32.partialorder %v464_v28, 0.0  ;;  %v595_v32 = vmul.f32 0.2, %v464_v28 }
  0xe6   :  { %v446_v33 = vadd.f32 %v1196_v24, %v319_v29  ;;  %v462_v34 = vadd.f32 %v1196_v24, %v383_v30  ;;  %v1032_v35 = vpop.f32.mrf.mxu0  ;;  %v1048_v36 = vpop.f32.mrf.mxu1 }
  0xe7   :  { %v611_v37 = vsel %vm547_vm0, %v448_v27, %v579_v31  ;;  %v449_v38 = vadd.f32 %v1032_v35, %v1196_v24  ;;  %v465_v39 = vadd.f32 %v1048_v36, %v1196_v24  ;;  %v627_v40 = vsel %vm563_vm1, %v464_v28, %v595_v32 }
  0xe8   :  { %vm545_vm2 = vcmp.ge.f32.partialorder %v446_v33, 0.0  ;;  %v577_v41 = vmul.f32 0.2, %v446_v33  ;;  %vm561_vm3 = vcmp.ge.f32.partialorder %v462_v34, 0.0  ;;  %v322_v42 = vpop.f32.mrf.mxu0  ;;  %v386_v43 = vpop.f32.mrf.mxu1  ;;  %v593_v47 = vmul.f32 0.2, %v462_v34 }
  0xe9   :  { %vm548_vm4 = vcmp.ge.f32.partialorder %v449_v38, 0.0  ;;  %v580_v44 = vmul.f32 0.2, %v449_v38  ;;  %vm564_vm5 = vcmp.ge.f32.partialorder %v465_v39, 0.0  ;;  %v596_v45 = vmul.f32 0.2, %v465_v39 }
  0xea   :  { %v609_v46 = vsel %vm545_vm2, %v446_v33, %v577_v41  ;;  %v447_v48 = vadd.f32 %v1196_v24, %v322_v42  ;;  %v463_v49 = vadd.f32 %v1196_v24, %v386_v43  ;;  %v1035_v50 = vpop.f32.mrf.mxu0  ;;  %v1051_v51 = vpop.f32.mrf.mxu1  ;;  %v625_v63 = vsel %vm561_vm3, %v462_v34, %v593_v47 }
  0xeb   :  { %v612_v52 = vsel %vm548_vm4, %v449_v38, %v580_v44  ;;  %v628_v53 = vsel %vm564_vm5, %v465_v39, %v596_v45  ;;  %v452_v54 = vadd.f32 %v1035_v50, %v1196_v24  ;;  %v468_v55 = vadd.f32 %v1051_v51, %v1196_v24 }
  0xec   :  { %v902_v56 = vpack.c.bf16 %v612_v52, %v611_v37  ;;  %v942_v57 = vpack.c.bf16 %v628_v53, %v627_v40  ;;  %vm546_vm6 = vcmp.ge.f32.partialorder %v447_v48, 0.0  ;;  %v578_v58 = vmul.f32 0.2, %v447_v48  ;;  %v335_v59 = vpop.f32.mrf.mxu0  ;;  %v399_v60 = vpop.f32.mrf.mxu1 }
  0xed   :  { %vm562_vm7 = vcmp.ge.f32.partialorder %v463_v49, 0.0  ;;  %v594_v61 = vmul.f32 0.2, %v463_v49  ;;  %vm551_vm8 = vcmp.ge.f32.partialorder %v452_v54, 0.0  ;;  %v583_v62 = vmul.f32 0.2, %v452_v54 }
  0xee   :  { %974 = vst [vmem:[%s1285_s3 + $0x8] sm:$0xff] %v902_v56   ;;  %982 = vst [vmem:[%s1285_s3 + $0x48] sm:$0xff] %v942_v57   ;;  %v610_v0 = vsel %vm546_vm6, %v447_v48, %v578_v58  ;;  %v599_v1 = vmul.f32 0.2, %v468_v55  ;;  %v450_v2 = vadd.f32 %v1196_v24, %v335_v59  ;;  %v1036_v3 = vpop.f32.mrf.mxu0  ;;  %v1052_v4 = vpop.f32.mrf.mxu1  ;;  %vm567_vm9 = vcmp.ge.f32.partialorder %v468_v55, 0.0 }
  0xef   :  { %v897_v5 = vpack.c.bf16 %v610_v0, %v609_v46  ;;  %v626_v6 = vsel %vm562_vm7, %v463_v49, %v594_v61  ;;  %v466_v7 = vadd.f32 %v1196_v24, %v399_v60  ;;  %v615_v9 = vsel %vm551_vm8, %v452_v54, %v583_v62 }
  0xf0   :  { %v937_v8 = vpack.c.bf16 %v626_v6, %v625_v63  ;;  %vm549_vm10 = vcmp.ge.f32.partialorder %v450_v2, 0.0  ;;  %v581_v10 = vmul.f32 0.2, %v450_v2  ;;  %v338_v11 = vpop.f32.mrf.mxu0  ;;  %v402_v12 = vpop.f32.mrf.mxu1  ;;  %v453_v14 = vadd.f32 %v1036_v3, %v1196_v24 }
  0xf1   :  { %898 = vst [vmem:[%s1285_s3] sm:$0xff] %v897_v5   ;;  %vm565_vm11 = vcmp.ge.f32.partialorder %v466_v7, 0.0  ;;  %v597_v13 = vmul.f32 0.2, %v466_v7  ;;  %v469_v15 = vadd.f32 %v1052_v4, %v1196_v24  ;;  %v631_v16 = vsel %vm567_vm9, %v468_v55, %v599_v1 }
  0xf2   :  { %981 = vst [vmem:[%s1285_s3 + $0x40] sm:$0xff] %v937_v8   ;;  %v613_v17 = vsel %vm549_vm10, %v450_v2, %v581_v10  ;;  %v451_v18 = vadd.f32 %v1196_v24, %v338_v11  ;;  %v467_v19 = vadd.f32 %v1196_v24, %v402_v12  ;;  %v1039_v20 = vpop.f32.mrf.mxu0  ;;  %v1055_v21 = vpop.f32.mrf.mxu1  ;;  %vm552_vm12 = vcmp.ge.f32.partialorder %v453_v14, 0.0 }
  0xf3   :  { %v629_v22 = vsel %vm565_vm11, %v466_v7, %v597_v13  ;;  %v584_v23 = vmul.f32 0.2, %v453_v14  ;;  %vm568_vm13 = vcmp.ge.f32.partialorder %v469_v15, 0.0  ;;  %v600_v25 = vmul.f32 0.2, %v469_v15 }
  0xf4   :  { %vm550_vm14 = vcmp.ge.f32.partialorder %v451_v18, 0.0  ;;  %v582_v26 = vmul.f32 0.2, %v451_v18  ;;  %vm566_vm15 = vcmp.ge.f32.partialorder %v467_v19, 0.0  ;;  %v351_v27 = vpop.f32.mrf.mxu0  ;;  %v415_v28 = vpop.f32.mrf.mxu1  ;;  %v598_v30 = vmul.f32 0.2, %v467_v19 }
  0xf5   :  { %v616_v29 = vsel %vm552_vm12, %v453_v14, %v584_v23  ;;  %v456_v31 = vadd.f32 %v1039_v20, %v1196_v24  ;;  %v472_v32 = vadd.f32 %v1055_v21, %v1196_v24  ;;  %v632_v34 = vsel %vm568_vm13, %v469_v15, %v600_v25 }
  0xf6   :  { %v912_v33 = vpack.c.bf16 %v616_v29, %v615_v9  ;;  %v614_v35 = vsel %vm550_vm14, %v451_v18, %v582_v26  ;;  %v454_v36 = vadd.f32 %v1196_v24, %v351_v27  ;;  %v1040_v37 = vpop.f32.mrf.mxu0  ;;  %v1056_v38 = vpop.f32.mrf.mxu1  ;;  %v952_v39 = vpack.c.bf16 %v632_v34, %v631_v16 }
  0xf7   :  { %v907_v40 = vpack.c.bf16 %v614_v35, %v613_v17  ;;  %v630_v41 = vsel %vm566_vm15, %v467_v19, %v598_v30  ;;  %vm555_vm0 = vcmp.ge.f32.partialorder %v456_v31, 0.0  ;;  %v587_v43 = vmul.f32 0.2, %v456_v31 }
  0xf8   :  { %976 = vst [vmem:[%s1285_s3 + $0x18] sm:$0xff] %v912_v33   ;;  %v947_v42 = vpack.c.bf16 %v630_v41, %v629_v22  ;;  %vm571_vm1 = vcmp.ge.f32.partialorder %v472_v32, 0.0  ;;  %v603_v44 = vmul.f32 0.2, %v472_v32  ;;  %v354_v45 = vpop.f32.mrf.mxu0  ;;  %v418_v46 = vpop.f32.mrf.mxu1  ;;  %984 = vst [vmem:[%s1285_s3 + $0x58] sm:$0xff] %v952_v39   ;;  %vm553_vm2 = vcmp.ge.f32.partialorder %v454_v36, 0.0 }
  0xf9   :  { %975 = vst [vmem:[%s1285_s3 + $0x10] sm:$0xff] %v907_v40   ;;  %v585_v47 = vmul.f32 0.2, %v454_v36  ;;  %v470_v48 = vadd.f32 %v1196_v24, %v415_v28  ;;  %v457_v49 = vadd.f32 %v1040_v37, %v1196_v24  ;;  %v619_v50 = vsel %vm555_vm0, %v456_v31, %v587_v43 }
  0xfa   :  { %983 = vst [vmem:[%s1285_s3 + $0x50] sm:$0xff] %v947_v42   ;;  %v473_v51 = vadd.f32 %v1056_v38, %v1196_v24  ;;  %v455_v52 = vadd.f32 %v1196_v24, %v354_v45  ;;  %v1043_v53 = vpop.f32.mrf.mxu0  ;;  %v1059_v54 = vpop.f32.mrf.mxu1  ;;  %v635_v55 = vsel %vm571_vm1, %v472_v32, %v603_v44  ;;  %v471_v63 = vadd.f32 %v1196_v24, %v418_v46 }
  0xfb   :  { %v617_v56 = vsel %vm553_vm2, %v454_v36, %v585_v47  ;;  %vm569_vm3 = vcmp.ge.f32.partialorder %v470_v48, 0.0  ;;  %vm556_vm4 = vcmp.ge.f32.partialorder %v457_v49, 0.0  ;;  %v588_v57 = vmul.f32 0.2, %v457_v49 }
  0xfc   :  { %vm572_vm5 = vcmp.ge.f32.partialorder %v473_v51, 0.0  ;;  %v604_v58 = vmul.f32 0.2, %v473_v51  ;;  %vm554_vm6 = vcmp.ge.f32.partialorder %v455_v52, 0.0  ;;  %v367_v59 = vpop.f32.mrf.mxu0  ;;  %v431_v60 = vpop.f32.mrf.mxu1  ;;  %v601_v61 = vmul.f32 0.2, %v470_v48 }
  0xfd   :  { %v586_v62 = vmul.f32 0.2, %v455_v52  ;;  %v460_v0 = vadd.f32 %v1043_v53, %v1196_v24  ;;  %v620_v1 = vsel %vm556_vm4, %v457_v49, %v588_v57  ;;  %v476_v3 = vadd.f32 %v1059_v54, %v1196_v24 }
  0xfe   :  { %v636_v2 = vsel %vm572_vm5, %v473_v51, %v604_v58  ;;  %v458_v4 = vadd.f32 %v1196_v24, %v367_v59  ;;  %v1044_v5 = vpop.f32.mrf.mxu0  ;;  %v1060_v6 = vpop.f32.mrf.mxu1  ;;  %v922_v7 = vpack.c.bf16 %v620_v1, %v619_v50  ;;  %vm570_vm7 = vcmp.ge.f32.partialorder %v471_v63, 0.0 }
  0xff   :  { %v962_v8 = vpack.c.bf16 %v636_v2, %v635_v55  ;;  %v618_v9 = vsel %vm554_vm6, %v455_v52, %v586_v62  ;;  %v602_v11 = vmul.f32 0.2, %v471_v63  ;;  %v591_v12 = vmul.f32 0.2, %v460_v0 }
 0x100   :  { %v917_v10 = vpack.c.bf16 %v618_v9, %v617_v56  ;;  %v633_v13 = vsel %vm569_vm3, %v470_v48, %v601_v61  ;;  %978 = vst [vmem:[%s1285_s3 + $0x28] sm:$0xff] %v922_v7   ;;  %vm559_vm8 = vcmp.ge.f32.partialorder %v460_v0, 0.0  ;;  %v607_v15 = vmul.f32 0.2, %v476_v3  ;;  %v370_v18 = vpop.f32.mrf.mxu0  ;;  %v434_v19 = vpop.f32.mrf.mxu1 }
 0x101   :  { %986 = vst [vmem:[%s1285_s3 + $0x68] sm:$0xff] %v962_v8   ;;  %v634_v14 = vsel %vm570_vm7, %v471_v63, %v602_v11  ;;  %v474_v16 = vadd.f32 %v1196_v24, %v431_v60  ;;  %v461_v17 = vadd.f32 %v1044_v5, %v1196_v24  ;;  %vm575_vm9 = vcmp.ge.f32.partialorder %v476_v3, 0.0 }
 0x102   :  { %977 = vst [vmem:[%s1285_s3 + $0x20] sm:$0xff] %v917_v10   ;;  %v957_v20 = vpack.c.bf16 %v634_v14, %v633_v13  ;;  %vm557_vm10 = vcmp.ge.f32.partialorder %v458_v4, 0.0  ;;  %v477_v21 = vadd.f32 %v1060_v6, %v1196_v24  ;;  %v623_v22 = vsel %vm559_vm8, %v460_v0, %v591_v12 }
 0x103   :  { %v589_v23 = vmul.f32 0.2, %v458_v4  ;;  %vm560_vm11 = vcmp.ge.f32.partialorder %v461_v17, 0.0  ;;  %v592_v25 = vmul.f32 0.2, %v461_v17  ;;  %v459_v27 = vadd.f32 %v1196_v24, %v370_v18 }
 0x104   :  { %985 = vst [vmem:[%s1285_s3 + $0x60] sm:$0xff] %v957_v20   ;;  %vm576_vm12 = vcmp.ge.f32.partialorder %v477_v21, 0.0  ;;  %v608_v26 = vmul.f32 0.2, %v477_v21  ;;  %v475_v28 = vadd.f32 %v1196_v24, %v434_v19  ;;  %v639_v29 = vsel %vm575_vm9, %v476_v3, %v607_v15 }
 0x105   :  { %vm573_vm13 = vcmp.ge.f32.partialorder %v474_v16, 0.0  ;;  %v605_v30 = vmul.f32 0.2, %v474_v16  ;;  %v624_v31 = vsel %vm560_vm11, %v461_v17, %v592_v25  ;;  %vm558_vm14 = vcmp.ge.f32.partialorder %v459_v27, 0.0 }
 0x106   :  { %v932_v32 = vpack.c.bf16 %v624_v31, %v623_v22  ;;  %v640_v33 = vsel %vm576_vm12, %v477_v21, %v608_v26  ;;  %v590_v34 = vmul.f32 0.2, %v459_v27  ;;  %vm574_vm15 = vcmp.ge.f32.partialorder %v475_v28, 0.0 }
 0x107   :  { %v972_v35 = vpack.c.bf16 %v640_v33, %v639_v29  ;;  %v606_v36 = vmul.f32 0.2, %v475_v28  ;;  %v621_v37 = vsel %vm557_vm10, %v458_v4, %v589_v23  ;;  %v637_v39 = vsel %vm573_vm13, %v474_v16, %v605_v30 }
 0x108   :  { %980 = vst [vmem:[%s1285_s3 + $0x38] sm:$0xff] %v932_v32   ;;  %v622_v38 = vsel %vm558_vm14, %v459_v27, %v590_v34 }
 0x109   :  { %988 = vst [vmem:[%s1285_s3 + $0x78] sm:$0xff] %v972_v35   ;;  %v927_v24 = vpack.c.bf16 %v622_v38, %v621_v37  ;;  %v638_v40 = vsel %vm574_vm15, %v475_v28, %v606_v36 }
 0x10a   :  { %v967_v41 = vpack.c.bf16 %v638_v40, %v637_v39 }
 0x10b   :  { %979 = vst [vmem:[%s1285_s3 + $0x30] sm:$0xff] %v927_v24  }
 0x10c   :  { %987 = vst [vmem:[%s1285_s3 + $0x70] sm:$0xff] %v967_v41  }

// kernel: _lambda_.6
= control target key start
LH: loop header
LB: loop body
LE: loop exit
PB: predicated region body
PF: predicated region fallthrough
CT: control target
= control target key end

     0   :  { %vm653_vm0 = vcmask 1040384   ;;  %s1389_s1 = inlined_call_operand.vmem [shape: bf16[1,128,128], index: 1, kind: input, shape index: {}]   ;;  %s1390_s0 = inlined_call_operand.vmem [shape: bf16[256,128], index: 0, kind: input, shape index: {}]   ;;  %s1391_s2 = inlined_call_operand.vmem [shape: f32[1,128], index: 2, kind: input, shape index: {}]   ;;  %s1392_s3 = inlined_call_operand.vmem [shape: bf16[256,128], index: 3, kind: output, shape index: {0}]   ;;  %s1393_s4 = inlined_call_operand.vmem [shape: f32[1,2,128], index: 4, kind: output, shape index: {1}]  }
   0x1   :  { %v1096_v0 = vld [vmem:[%s1389_s1 + $0x38] sm:$0xff]   ;;  %v1097_v1 = vld [vmem:[%s1389_s1 + $0x30] sm:$0xff]   ;;  %v1098_v2 = vld [vmem:[%s1389_s1 + $0x28] sm:$0xff]  }
   0x2   :  { %1032 = vmatprep.subr.bf16.mxu0 %v1096_v0  ;;  %1080 = vmatprep.subr.bf16.mxu1 %v1096_v0  ;;  %v1099_v3 = vld [vmem:[%s1389_s1 + $0x20] sm:$0xff]   ;;  %v1100_v5 = vld [vmem:[%s1389_s1 + $0x18] sm:$0xff]   ;;  %v1101_v6 = vld [vmem:[%s1389_s1 + $0x10] sm:$0xff]  }
   0x3   :  { %1033 = vmatpush3.bf16.msra.mxu0 %v1096_v0  ;;  %1088 = vmatpush3.bf16.msra.mxu1 %v1096_v0  ;;  %v1104_v4 = vld [vmem:[%s1390_s0] sm:$0xff]   ;;  %v1102_v8 = vld [vmem:[%s1389_s1 + $0x8] sm:$0xff]   ;;  %v1106_v12 = vld [vmem:[%s1390_s0 + $0x10] sm:$0xff]  }
   0x4   :  { %1034 = vmatprep.subr.bf16.mxu0 %v1097_v1  ;;  %1081 = vmatprep.subr.bf16.mxu1 %v1097_v1  ;;  %v1112_v7 = vld [vmem:[%s1390_s0 + $0x40] sm:$0xff]   ;;  %v1105_v10 = vld [vmem:[%s1390_s0 + $0x8] sm:$0xff]   ;;  %v1114_v13 = vld [vmem:[%s1390_s0 + $0x50] sm:$0xff]  }
   0x5   :  { %1048 = vmatprep.mubr.bf16.mxu0 %v1104_v4  ;;  %1064 = vmatprep.mubr.bf16.mxu1 %v1112_v7  ;;  %v1103_v9 = vld [vmem:[%s1389_s1] sm:$0xff]   ;;  %v1113_v11 = vld [vmem:[%s1390_s0 + $0x48] sm:$0xff]   ;;  %v1107_v14 = vld [vmem:[%s1390_s0 + $0x18] sm:$0xff]  }
   0x6   :  { %v1115_v15 = vld [vmem:[%s1390_s0 + $0x58] sm:$0xff]   ;;  %v1108_v16 = vld [vmem:[%s1390_s0 + $0x20] sm:$0xff]   ;;  %v1109_v18 = vld [vmem:[%s1390_s0 + $0x28] sm:$0xff]  }
   0x7   :  { %1035 = vmatpush3.bf16.msra.mxu0 %v1097_v1  ;;  %1089 = vmatpush3.bf16.msra.mxu1 %v1097_v1  ;;  %v1116_v17 = vld [vmem:[%s1390_s0 + $0x60] sm:$0xff]   ;;  %v1117_v19 = vld [vmem:[%s1390_s0 + $0x68] sm:$0xff]   ;;  %v1110_v20 = vld [vmem:[%s1390_s0 + $0x30] sm:$0xff]  }
   0x8   :  { %1036 = vmatprep.subr.bf16.mxu0 %v1098_v2  ;;  %1082 = vmatprep.subr.bf16.mxu1 %v1098_v2  ;;  %v1118_v21 = vld [vmem:[%s1390_s0 + $0x70] sm:$0xff]   ;;  %v1111_v22 = vld [vmem:[%s1390_s0 + $0x38] sm:$0xff]   ;;  %v1220_v26 = vld [vmem:[%s1391_s2] ss:$0 sm:$0xff] }
   0x9   :  { %v1119_v23 = vld [vmem:[%s1390_s0 + $0x78] sm:$0xff]  }
   0xb   :  { %1037 = vmatpush3.bf16.msra.mxu0 %v1098_v2  ;;  %1090 = vmatpush3.bf16.msra.mxu1 %v1098_v2 }
   0xc   :  { %1038 = vmatprep.subr.bf16.mxu0 %v1099_v3  ;;  %1083 = vmatprep.subr.bf16.mxu1 %v1099_v3 }
   0xf   :  { %1039 = vmatpush3.bf16.msra.mxu0 %v1099_v3  ;;  %1091 = vmatpush3.bf16.msra.mxu1 %v1099_v3 }
  0x10   :  { %1040 = vmatprep.subr.bf16.mxu0 %v1100_v5  ;;  %1084 = vmatprep.subr.bf16.mxu1 %v1100_v5 }
  0x13   :  { %1041 = vmatpush3.bf16.msra.mxu0 %v1100_v5  ;;  %1092 = vmatpush3.bf16.msra.mxu1 %v1100_v5 }
  0x14   :  { %1042 = vmatprep.subr.bf16.mxu0 %v1101_v6  ;;  %1085 = vmatprep.subr.bf16.mxu1 %v1101_v6 }
  0x17   :  { %1043 = vmatpush3.bf16.msra.mxu0 %v1101_v6  ;;  %1093 = vmatpush3.bf16.msra.mxu1 %v1101_v6 }
  0x18   :  { %1044 = vmatprep.subr.bf16.mxu0 %v1102_v8  ;;  %1086 = vmatprep.subr.bf16.mxu1 %v1102_v8 }
  0x1b   :  { %1045 = vmatpush3.bf16.msra.mxu0 %v1102_v8  ;;  %1094 = vmatpush3.bf16.msra.mxu1 %v1102_v8 }
  0x1c   :  { %1046 = vmatprep.subr.bf16.mxu0 %v1103_v9  ;;  %1087 = vmatprep.subr.bf16.mxu1 %v1103_v9 }
  0x1f   :  { %1047 = vmatpush3.bf16.msra.mxu0 %v1103_v9  ;;  %1095 = vmatpush3.bf16.msra.mxu1 %v1103_v9 }
  0x22   :  { %1049 = vmatmul.mubr.bf16.vlgmr.msra.gmra.mxu0 %v1105_v10  ;;  %1065 = vmatmul.mubr.bf16.vlgmr.msra.gmra.mxu1 %v1113_v11 }
  0x23   :  { %1052 = vmatprep.mubr.bf16.mxu0 %v1106_v12  ;;  %1068 = vmatprep.mubr.bf16.mxu1 %v1114_v13 }
  0x2a   :  { %1053 = vmatmul.mubr.bf16.gmra.mxu0 %v1107_v14  ;;  %1069 = vmatmul.mubr.bf16.gmra.mxu1 %v1115_v15 }
  0x2b   :  { %1056 = vmatprep.mubr.bf16.mxu0 %v1108_v16  ;;  %1072 = vmatprep.mubr.bf16.mxu1 %v1116_v17 }
  0x32   :  { %1057 = vmatmul.mubr.bf16.gmra.mxu0 %v1109_v18  ;;  %1073 = vmatmul.mubr.bf16.gmra.mxu1 %v1117_v19 }
  0x33   :  { %1060 = vmatprep.mubr.bf16.mxu0 %v1110_v20  ;;  %1076 = vmatprep.mubr.bf16.mxu1 %v1118_v21 }
  0x3a   :  { %1061 = vmatmul.mubr.bf16.gmra.mxu0 %v1111_v22  ;;  %1077 = vmatmul.mubr.bf16.gmra.mxu1 %v1119_v23 }
  0xe2   :  { %v1050_v24 = vpop.f32.mrf.mxu0  ;;  %v1066_v25 = vpop.f32.mrf.mxu1 }
  0xe3   :  { %v1223_v30 = vadd.f32 %v1066_v25, %v1220_v26  ;;  %v450_v32 = vadd.f32 %v1050_v24, %v1220_v26 }
  0xe4   :  { %v321_v27 = vpop.f32.mrf.mxu0  ;;  %v385_v28 = vpop.f32.mrf.mxu1 }
  0xe5   :  { %v448_v33 = vadd.f32 %v1220_v26, %v321_v27  ;;  %v1232_v37 = vadd.f32 %v1220_v26, %v385_v28  ;;  %v586_v52 = vmul.f32 %v450_v32, %v450_v32 }
  0xe6   :  { %v1051_v29 = vpop.f32.mrf.mxu0  ;;  %v1067_v31 = vpop.f32.mrf.mxu1 }
  0xe7   :  { %v451_v34 = vadd.f32 %v1051_v29, %v1220_v26  ;;  %v1229_v35 = vadd.f32 %v1067_v31, %v1220_v26  ;;  %v584_v45 = vmul.f32 %v448_v33, %v448_v33 }
  0xe8   :  { %v324_v36 = vpop.f32.mrf.mxu0  ;;  %v388_v38 = vpop.f32.mrf.mxu1 }
  0xe9   :  { %v921_v39 = vpack.c.bf16 %v451_v34, %v450_v32  ;;  %v449_v40 = vadd.f32 %v1220_v26, %v324_v36  ;;  %v961_v42 = vpack.c.bf16 %v1229_v35, %v1223_v30  ;;  %v1238_v43 = vadd.f32 %v1220_v26, %v388_v38 }
  0xea   :  { %v1054_v41 = vpop.f32.mrf.mxu0  ;;  %v1070_v44 = vpop.f32.mrf.mxu1  ;;  %v587_v56 = vmul.f32 %v451_v34, %v451_v34 }
  0xeb   :  { %993 = vst [vmem:[%s1392_s3 + $0x8] sm:$0xff] %v921_v39   ;;  %v547_v46 = vadd.f32 %v449_v40, %v448_v33  ;;  %v585_v47 = vmul.f32 %v449_v40, %v449_v40  ;;  %v916_v48 = vpack.c.bf16 %v449_v40, %v448_v33  ;;  %1001 = vst [vmem:[%s1392_s3 + $0x48] sm:$0xff] %v961_v42  }
  0xec   :  { %v337_v49 = vpop.f32.mrf.mxu0  ;;  %v956_v50 = vpack.c.bf16 %v1238_v43, %v1232_v37  ;;  %v401_v51 = vpop.f32.mrf.mxu1  ;;  %v1256_v58 = vadd.f32 %v1070_v44, %v1220_v26  ;;  %v454_v61 = vadd.f32 %v1054_v41, %v1220_v26 }
  0xed   :  { %v548_v53 = vadd.f32 %v547_v46, %v450_v32  ;;  %v616_v54 = vadd.f32 %v585_v47, %v584_v45  ;;  %917 = vst [vmem:[%s1392_s3] sm:$0xff] %v916_v48   ;;  %v452_v55 = vadd.f32 %v1220_v26, %v337_v49  ;;  %v1261_v1 = vadd.f32 %v1220_v26, %v401_v51 }
  0xee   :  { %v1055_v57 = vpop.f32.mrf.mxu0  ;;  %1000 = vst [vmem:[%s1392_s3 + $0x40] sm:$0xff] %v956_v50   ;;  %v1071_v59 = vpop.f32.mrf.mxu1  ;;  %v590_v21 = vmul.f32 %v454_v61, %v454_v61 }
  0xef   :  { %v617_v60 = vadd.f32 %v616_v54, %v586_v52  ;;  %v549_v62 = vadd.f32 %v548_v53, %v451_v34  ;;  %v455_v63 = vadd.f32 %v1055_v57, %v1220_v26  ;;  %v1264_v2 = vadd.f32 %v1071_v59, %v1220_v26 }
  0xf0   :  { %v340_v0 = vpop.f32.mrf.mxu0  ;;  %v404_v3 = vpop.f32.mrf.mxu1  ;;  %v588_v5 = vmul.f32 %v452_v55, %v452_v55 }
  0xf1   :  { %v550_v4 = vadd.f32 %v549_v62, %v452_v55  ;;  %v618_v6 = vadd.f32 %v617_v60, %v587_v56  ;;  %v931_v7 = vpack.c.bf16 %v455_v63, %v454_v61  ;;  %v453_v8 = vadd.f32 %v1220_v26, %v340_v0 }
  0xf2   :  { %v1058_v9 = vpop.f32.mrf.mxu0  ;;  %v971_v10 = vpack.c.bf16 %v1264_v2, %v1256_v58  ;;  %v1270_v11 = vadd.f32 %v1220_v26, %v404_v3  ;;  %v1074_v12 = vpop.f32.mrf.mxu1  ;;  %v591_v32 = vmul.f32 %v455_v63, %v455_v63 }
  0xf3   :  { %v619_v13 = vadd.f32 %v618_v6, %v588_v5  ;;  %995 = vst [vmem:[%s1392_s3 + $0x18] sm:$0xff] %v931_v7   ;;  %v551_v14 = vadd.f32 %v550_v4, %v453_v8  ;;  %v589_v15 = vmul.f32 %v453_v8, %v453_v8  ;;  %v926_v16 = vpack.c.bf16 %v453_v8, %v452_v55 }
  0xf4   :  { %v353_v17 = vpop.f32.mrf.mxu0  ;;  %1003 = vst [vmem:[%s1392_s3 + $0x58] sm:$0xff] %v971_v10   ;;  %v417_v18 = vpop.f32.mrf.mxu1  ;;  %v966_v20 = vpack.c.bf16 %v1270_v11, %v1261_v1  ;;  %v1285_v25 = vadd.f32 %v1074_v12, %v1220_v26  ;;  %v458_v28 = vadd.f32 %v1058_v9, %v1220_v26 }
  0xf5   :  { %v456_v19 = vadd.f32 %v1220_v26, %v353_v17  ;;  %v552_v22 = vadd.f32 %v551_v14, %v454_v61  ;;  %v620_v23 = vadd.f32 %v619_v13, %v589_v15  ;;  %994 = vst [vmem:[%s1392_s3 + $0x10] sm:$0xff] %v926_v16   ;;  %v1296_v38 = vadd.f32 %v1220_v26, %v417_v18 }
  0xf6   :  { %v1059_v24 = vpop.f32.mrf.mxu0  ;;  %v1075_v27 = vpop.f32.mrf.mxu1  ;;  %1002 = vst [vmem:[%s1392_s3 + $0x50] sm:$0xff] %v966_v20   ;;  %v594_v59 = vmul.f32 %v458_v28, %v458_v28 }
  0xf7   :  { %v459_v29 = vadd.f32 %v1059_v24, %v1220_v26  ;;  %v1293_v31 = vadd.f32 %v1075_v27, %v1220_v26  ;;  %v621_v33 = vadd.f32 %v620_v23, %v590_v21  ;;  %v553_v34 = vadd.f32 %v552_v22, %v455_v63 }
  0xf8   :  { %v356_v36 = vpop.f32.mrf.mxu0  ;;  %v420_v39 = vpop.f32.mrf.mxu1  ;;  %v592_v40 = vmul.f32 %v456_v19, %v456_v19 }
  0xf9   :  { %v941_v41 = vpack.c.bf16 %v459_v29, %v458_v28  ;;  %v457_v42 = vadd.f32 %v1220_v26, %v356_v36  ;;  %v554_v44 = vadd.f32 %v553_v34, %v456_v19  ;;  %v622_v45 = vadd.f32 %v621_v33, %v591_v32 }
  0xfa   :  { %v1062_v46 = vpop.f32.mrf.mxu0  ;;  %v981_v47 = vpack.c.bf16 %v1293_v31, %v1285_v25  ;;  %v1302_v48 = vadd.f32 %v1220_v26, %v420_v39  ;;  %v1078_v49 = vpop.f32.mrf.mxu1  ;;  %v595_v6 = vmul.f32 %v459_v29, %v459_v29  ;;  %v600_v34 = vmul.f32 %v1232_v37, %v1232_v37 }
  0xfb   :  { %997 = vst [vmem:[%s1392_s3 + $0x28] sm:$0xff] %v941_v41   ;;  %v593_v50 = vmul.f32 %v457_v42, %v457_v42  ;;  %v936_v51 = vpack.c.bf16 %v457_v42, %v456_v19  ;;  %v623_v52 = vadd.f32 %v622_v45, %v592_v40  ;;  %v555_v53 = vadd.f32 %v554_v44, %v457_v42 }
  0xfc   :  { %v369_v54 = vpop.f32.mrf.mxu0  ;;  %1005 = vst [vmem:[%s1392_s3 + $0x68] sm:$0xff] %v981_v47   ;;  %v976_v55 = vpack.c.bf16 %v1302_v48, %v1296_v38  ;;  %v433_v56 = vpop.f32.mrf.mxu1  ;;  %v1320_v63 = vadd.f32 %v1078_v49, %v1220_v26  ;;  %v462_v3 = vadd.f32 %v1062_v46, %v1220_v26  ;;  %v601_v41 = vmul.f32 %v1238_v43, %v1238_v43 }
  0xfd   :  { %996 = vst [vmem:[%s1392_s3 + $0x20] sm:$0xff] %v936_v51   ;;  %v460_v57 = vadd.f32 %v1220_v26, %v369_v54  ;;  %v556_v60 = vadd.f32 %v555_v53, %v458_v28  ;;  %v624_v61 = vadd.f32 %v623_v52, %v593_v50  ;;  %v476_v10 = vadd.f32 %v1220_v26, %v433_v56 }
  0xfe   :  { %v1063_v62 = vpop.f32.mrf.mxu0  ;;  %1004 = vst [vmem:[%s1392_s3 + $0x60] sm:$0xff] %v976_v55   ;;  %v1079_v0 = vpop.f32.mrf.mxu1  ;;  %v598_v27 = vmul.f32 %v462_v3, %v462_v3  ;;  %v602_v44 = vmul.f32 %v1223_v30, %v1223_v30  ;;  %v603_v47 = vmul.f32 %v1229_v35, %v1229_v35  ;;  %v604_v51 = vmul.f32 %v1261_v1, %v1261_v1 }
  0xff   :  { %v463_v4 = vadd.f32 %v1063_v62, %v1220_v26  ;;  %v1325_v5 = vadd.f32 %v1079_v0, %v1220_v26  ;;  %v625_v7 = vadd.f32 %v624_v61, %v594_v59  ;;  %v557_v8 = vadd.f32 %v556_v60, %v459_v29 }
 0x100   :  { %v372_v9 = vpop.f32.mrf.mxu0  ;;  %v436_v12 = vpop.f32.mrf.mxu1  ;;  %v596_v13 = vmul.f32 %v460_v57, %v460_v57  ;;  %v605_v54 = vmul.f32 %v1270_v11, %v1270_v11  ;;  %v608_v60 = vmul.f32 %v1296_v38, %v1296_v38  ;;  %v609_v0 = vmul.f32 %v1302_v48, %v1302_v48 }
 0x101   :  { %v951_v14 = vpack.c.bf16 %v463_v4, %v462_v3  ;;  %v461_v15 = vadd.f32 %v1220_v26, %v372_v9  ;;  %v558_v16 = vadd.f32 %v557_v8, %v460_v57  ;;  %v626_v17 = vadd.f32 %v625_v7, %v595_v6 }
 0x102   :  { %v991_v18 = vpack.c.bf16 %v1325_v5, %v1320_v63  ;;  %v477_v19 = vadd.f32 %v1220_v26, %v436_v12  ;;  %v599_v29 = vmul.f32 %v463_v4, %v463_v4  ;;  %v612_v8 = vmul.f32 %v476_v10, %v476_v10 }
 0x103   :  { %999 = vst [vmem:[%s1392_s3 + $0x38] sm:$0xff] %v951_v14   ;;  %v597_v20 = vmul.f32 %v461_v15, %v461_v15  ;;  %v946_v21 = vpack.c.bf16 %v461_v15, %v460_v57  ;;  %v627_v22 = vadd.f32 %v626_v17, %v596_v13  ;;  %v559_v23 = vadd.f32 %v558_v16, %v461_v15 }
 0x104   :  { %1007 = vst [vmem:[%s1392_s3 + $0x78] sm:$0xff] %v991_v18   ;;  %v986_v24 = vpack.c.bf16 %v477_v19, %v476_v10  ;;  %v613_v14 = vmul.f32 %v477_v19, %v477_v19 }
 0x105   :  { %998 = vst [vmem:[%s1392_s3 + $0x30] sm:$0xff] %v946_v21   ;;  %v560_v28 = vadd.f32 %v559_v23, %v462_v3  ;;  %v628_v26 = vadd.f32 %v627_v22, %v597_v20 }
 0x106   :  { %1006 = vst [vmem:[%s1392_s3 + $0x70] sm:$0xff] %v986_v24  }
 0x107   :  { %v629_v32 = vadd.f32 %v628_v26, %v598_v27  ;;  %v561_v33 = vadd.f32 %v560_v28, %v463_v4 }
 0x109   :  { %v562_v36 = vadd.f32 %v561_v33, %v1232_v37  ;;  %v630_v39 = vadd.f32 %v629_v32, %v599_v29 }
 0x10b   :  { %v563_v40 = vadd.f32 %v562_v36, %v1238_v43  ;;  %v631_v42 = vadd.f32 %v630_v39, %v600_v34 }
 0x10d   :  { %v564_v45 = vadd.f32 %v563_v40, %v1223_v30  ;;  %v632_v46 = vadd.f32 %v631_v42, %v601_v41  ;;  %v606_v30 = vmul.f32 %v1256_v58, %v1256_v58 }
 0x10f   :  { %v633_v49 = vadd.f32 %v632_v46, %v602_v44  ;;  %v565_v50 = vadd.f32 %v564_v45, %v1229_v35  ;;  %v607_v35 = vmul.f32 %v1264_v2, %v1264_v2 }
 0x111   :  { %v566_v37 = vadd.f32 %v565_v50, %v1261_v1  ;;  %v634_v52 = vadd.f32 %v633_v49, %v603_v47 }
 0x113   :  { %v635_v43 = vadd.f32 %v634_v52, %v604_v51  ;;  %v567_v53 = vadd.f32 %v566_v37, %v1270_v11 }
 0x115   :  { %v568_v55 = vadd.f32 %v567_v53, %v1256_v58  ;;  %v636_v56 = vadd.f32 %v635_v43, %v605_v54  ;;  %v610_v58 = vmul.f32 %v1285_v25, %v1285_v25 }
 0x117   :  { %v637_v57 = vadd.f32 %v636_v56, %v606_v30  ;;  %v569_v59 = vadd.f32 %v568_v55, %v1264_v2  ;;  %v611_v2 = vmul.f32 %v1293_v31, %v1293_v31 }
 0x119   :  { %v570_v1 = vadd.f32 %v569_v59, %v1296_v38  ;;  %v638_v61 = vadd.f32 %v637_v57, %v607_v35 }
 0x11b   :  { %v639_v62 = vadd.f32 %v638_v61, %v608_v60  ;;  %v571_v11 = vadd.f32 %v570_v1, %v1302_v48  ;;  %v614_v48 = vmul.f32 %v1320_v63, %v1320_v63 }
 0x11d   :  { %v572_v3 = vadd.f32 %v571_v11, %v1285_v25  ;;  %v640_v4 = vadd.f32 %v639_v62, %v609_v0  ;;  %v615_v25 = vmul.f32 %v1325_v5, %v1325_v5 }
 0x11f   :  { %v641_v6 = vadd.f32 %v640_v4, %v610_v58  ;;  %v573_v7 = vadd.f32 %v572_v3, %v1293_v31 }
 0x121   :  { %v574_v38 = vadd.f32 %v573_v7, %v476_v10  ;;  %v642_v9 = vadd.f32 %v641_v6, %v611_v2 }
 0x123   :  { %v643_v12 = vadd.f32 %v642_v9, %v612_v8  ;;  %v575_v13 = vadd.f32 %v574_v38, %v477_v19 }
 0x125   :  { %v576_v15 = vadd.f32 %v575_v13, %v1320_v63  ;;  %v644_v16 = vadd.f32 %v643_v12, %v613_v14 }
 0x127   :  { %v577_v17 = vadd.f32 %v576_v15, %v1325_v5  ;;  %v645_v18 = vadd.f32 %v644_v16, %v614_v48 }
 0x129   :  { %v578_v20 = vrot.slane %v577_v17, 4  ;;  %v646_v31 = vadd.f32 %v645_v18, %v615_v25 }
 0x12b   :  { %v579_v21 = vadd.f32 %v578_v20, %v577_v17  ;;  %v647_v10 = vrot.slane %v646_v31, 4 }
 0x12d   :  { %v580_v22 = vrot.slane %v579_v21, 2  ;;  %v648_v23 = vadd.f32 %v647_v10, %v646_v31 }
 0x12f   :  { %v581_v24 = vadd.f32 %v580_v22, %v579_v21  ;;  %v649_v19 = vrot.slane %v648_v23, 2 }
 0x131   :  { %v582_v27 = vrot.slane %v581_v24, 1  ;;  %v650_v28 = vadd.f32 %v649_v19, %v648_v23 }
 0x133   :  { %v651_v26 = vrot.slane %v650_v28, 1  ;;  %v583_v63 = vadd.f32 %v582_v27, %v581_v24 }
 0x135   :  { %v652_v29 = vadd.f32 %v651_v26, %v650_v28 }
 0x137   :  { %v654_v32 = vsel %vm653_vm0, %v583_v63, %v652_v29 }
 0x138   :  { %655 = vst [vmem:[%s1393_s4] sm:$0x3] %v654_v32 }

// kernel: _lambda_.7
= control target key start
LH: loop header
LB: loop body
LE: loop exit
PB: predicated region body
PF: predicated region fallthrough
CT: control target
= control target key end

     0   :  { %vm781_vm0 = vcmask 1040384   ;;  %s1729_s1 = inlined_call_operand.vmem [shape: bf16[1,256,128], index: 1, kind: input, shape index: {}]   ;;  %s1730_s0 = inlined_call_operand.vmem [shape: bf16[256,256], index: 0, kind: input, shape index: {}]   ;;  %s1731_s2 = inlined_call_operand.vmem [shape: f32[1,128], index: 2, kind: input, shape index: {}]   ;;  %s1732_s3 = inlined_call_operand.vmem [shape: bf16[256,128], index: 3, kind: output, shape index: {0}]   ;;  %s1733_s4 = inlined_call_operand.vmem [shape: f32[1,2,128], index: 4, kind: output, shape index: {1}]  }
   0x1   :  { %v1288_v0 = vld [vmem:[%s1729_s1 + $0x78] sm:$0xff]   ;;  %v1290_v2 = vld [vmem:[%s1729_s1 + $0x70] sm:$0xff]   ;;  %v1292_v4 = vld [vmem:[%s1729_s1 + $0x68] sm:$0xff]  }
   0x2   :  { %v1289_v1 = vld [vmem:[%s1729_s1 + $0x38] sm:$0xff]   ;;  %1160 = vmatprep.subr.bf16.mxu0 %v1288_v0  ;;  %1272 = vmatprep.subr.bf16.mxu1 %v1288_v0  ;;  %v1291_v3 = vld [vmem:[%s1729_s1 + $0x30] sm:$0xff]   ;;  %v1293_v5 = vld [vmem:[%s1729_s1 + $0x28] sm:$0xff]  }
   0x3   :  { %1161 = vmatpush3.bf16.msra.mxu0 %v1289_v1  ;;  %1280 = vmatpush3.bf16.msra.mxu1 %v1289_v1  ;;  %v1294_v6 = vld [vmem:[%s1729_s1 + $0x60] sm:$0xff]   ;;  %v1296_v8 = vld [vmem:[%s1729_s1 + $0x58] sm:$0xff]   ;;  %v1298_v10 = vld [vmem:[%s1729_s1 + $0x50] sm:$0xff]  }
   0x4   :  { %1162 = vmatprep.subr.bf16.mxu0 %v1290_v2  ;;  %1273 = vmatprep.subr.bf16.mxu1 %v1290_v2  ;;  %v1295_v7 = vld [vmem:[%s1729_s1 + $0x20] sm:$0xff]   ;;  %v1297_v9 = vld [vmem:[%s1729_s1 + $0x18] sm:$0xff]   ;;  %v1299_v12 = vld [vmem:[%s1729_s1 + $0x10] sm:$0xff]  }
   0x5   :  { %v1306_v11 = vld [vmem:[%s1730_s0 + $0x4] ss:$8 sps:$4 sm:$0xff]   ;;  %v1304_v18 = vld [vmem:[%s1730_s0] ss:$8 sps:$4 sm:$0xff]   ;;  %v1307_v19 = vld [vmem:[%s1730_s0 + $0x14] ss:$8 sps:$4 sm:$0xff]  }
   0x6   :  { %447 = vmatprep.mubr.bf16.mxu0 %v1306_v11  ;;  %v1300_v13 = vld [vmem:[%s1729_s1 + $0x48] sm:$0xff]   ;;  %v1302_v16 = vld [vmem:[%s1729_s1 + $0x40] sm:$0xff]   ;;  %v1322_v21 = vld [vmem:[%s1730_s0 + $0x94] ss:$8 sps:$4 sm:$0xff]  }
   0x7   :  { %1163 = vmatpush3.bf16.msra.mxu0 %v1291_v3  ;;  %1281 = vmatpush3.bf16.msra.mxu1 %v1291_v3  ;;  %v1318_v14 = vld [vmem:[%s1730_s0 + $0x84] ss:$8 sps:$4 sm:$0xff]   ;;  %v1316_v20 = vld [vmem:[%s1730_s0 + $0x80] ss:$8 sps:$4 sm:$0xff]   ;;  %v1309_v22 = vld [vmem:[%s1730_s0 + $0x10] ss:$8 sps:$4 sm:$0xff]  }
   0x8   :  { %1164 = vmatprep.subr.bf16.mxu0 %v1292_v4  ;;  %1274 = vmatprep.subr.bf16.mxu1 %v1292_v4  ;;  %v1301_v15 = vld [vmem:[%s1729_s1 + $0x8] sm:$0xff]   ;;  %v1303_v17 = vld [vmem:[%s1729_s1] sm:$0xff]   ;;  %v1324_v24 = vld [vmem:[%s1730_s0 + $0x90] ss:$8 sps:$4 sm:$0xff]  }
   0x9   :  { %511 = vmatprep.mubr.bf16.mxu1 %v1318_v14  ;;  %v1310_v23 = vld [vmem:[%s1730_s0 + $0x24] ss:$8 sps:$4 sm:$0xff]   ;;  %v1312_v26 = vld [vmem:[%s1730_s0 + $0x20] ss:$8 sps:$4 sm:$0xff]   ;;  %v1313_v27 = vld [vmem:[%s1730_s0 + $0x34] ss:$8 sps:$4 sm:$0xff]  }
   0xa   :  { %v1328_v25 = vld [vmem:[%s1730_s0 + $0xa4] ss:$8 sps:$4 sm:$0xff]   ;;  %v1330_v28 = vld [vmem:[%s1730_s0 + $0xa0] ss:$8 sps:$4 sm:$0xff]   ;;  %v1334_v29 = vld [vmem:[%s1730_s0 + $0xb4] ss:$8 sps:$4 sm:$0xff]  }
   0xb   :  { %1165 = vmatpush3.bf16.msra.mxu0 %v1293_v5  ;;  %1282 = vmatpush3.bf16.msra.mxu1 %v1293_v5  ;;  %v1315_v30 = vld [vmem:[%s1730_s0 + $0x30] ss:$8 sps:$4 sm:$0xff]   ;;  %v1319_v31 = vld [vmem:[%s1730_s0 + $0x44] ss:$8 sps:$4 sm:$0xff]   ;;  %v1321_v34 = vld [vmem:[%s1730_s0 + $0x40] ss:$8 sps:$4 sm:$0xff]  }
   0xc   :  { %1166 = vmatprep.subr.bf16.mxu0 %v1294_v6  ;;  %1275 = vmatprep.subr.bf16.mxu1 %v1294_v6  ;;  %v1336_v32 = vld [vmem:[%s1730_s0 + $0xb0] ss:$8 sps:$4 sm:$0xff]   ;;  %v1340_v33 = vld [vmem:[%s1730_s0 + $0xc4] ss:$8 sps:$4 sm:$0xff]   ;;  %v1325_v35 = vld [vmem:[%s1730_s0 + $0x54] ss:$8 sps:$4 sm:$0xff]  }
   0xd   :  { %v1342_v36 = vld [vmem:[%s1730_s0 + $0xc0] ss:$8 sps:$4 sm:$0xff]   ;;  %v1343_v37 = vld [vmem:[%s1730_s0 + $0xd4] ss:$8 sps:$4 sm:$0xff]   ;;  %v1327_v38 = vld [vmem:[%s1730_s0 + $0x50] ss:$8 sps:$4 sm:$0xff]  }
   0xe   :  { %v1331_v39 = vld [vmem:[%s1730_s0 + $0x64] ss:$8 sps:$4 sm:$0xff]   ;;  %v1345_v40 = vld [vmem:[%s1730_s0 + $0xd0] ss:$8 sps:$4 sm:$0xff]   ;;  %v1333_v42 = vld [vmem:[%s1730_s0 + $0x60] ss:$8 sps:$4 sm:$0xff]  }
   0xf   :  { %1167 = vmatpush3.bf16.msra.mxu0 %v1295_v7  ;;  %1283 = vmatpush3.bf16.msra.mxu1 %v1295_v7  ;;  %v1346_v41 = vld [vmem:[%s1730_s0 + $0xe4] ss:$8 sps:$4 sm:$0xff]   ;;  %v1337_v43 = vld [vmem:[%s1730_s0 + $0x74] ss:$8 sps:$4 sm:$0xff]   ;;  %v1348_v44 = vld [vmem:[%s1730_s0 + $0xe0] ss:$8 sps:$4 sm:$0xff]  }
  0x10   :  { %1168 = vmatprep.subr.bf16.mxu0 %v1296_v8  ;;  %1276 = vmatprep.subr.bf16.mxu1 %v1296_v8  ;;  %v1349_v45 = vld [vmem:[%s1730_s0 + $0xf4] ss:$8 sps:$4 sm:$0xff]   ;;  %v1339_v46 = vld [vmem:[%s1730_s0 + $0x70] ss:$8 sps:$4 sm:$0xff]   ;;  %v1524_v56 = vld [vmem:[%s1731_s2] ss:$0 sm:$0xff] }
  0x11   :  { %v1351_v47 = vld [vmem:[%s1730_s0 + $0xf0] ss:$8 sps:$4 sm:$0xff]  }
  0x13   :  { %1169 = vmatpush3.bf16.msra.mxu0 %v1297_v9  ;;  %1284 = vmatpush3.bf16.msra.mxu1 %v1297_v9 }
  0x14   :  { %1170 = vmatprep.subr.bf16.mxu0 %v1298_v10  ;;  %1277 = vmatprep.subr.bf16.mxu1 %v1298_v10 }
  0x17   :  { %1171 = vmatpush3.bf16.msra.mxu0 %v1299_v12  ;;  %1285 = vmatpush3.bf16.msra.mxu1 %v1299_v12 }
  0x18   :  { %1172 = vmatprep.subr.bf16.mxu0 %v1300_v13  ;;  %1278 = vmatprep.subr.bf16.mxu1 %v1300_v13 }
  0x1b   :  { %1173 = vmatpush3.bf16.msra.mxu0 %v1301_v15  ;;  %1286 = vmatpush3.bf16.msra.mxu1 %v1301_v15 }
  0x1c   :  { %1174 = vmatprep.subr.bf16.mxu0 %v1302_v16  ;;  %1279 = vmatprep.subr.bf16.mxu1 %v1302_v16 }
  0x1f   :  { %1175 = vmatpush3.bf16.msra.mxu0 %v1303_v17  ;;  %1287 = vmatpush3.bf16.msra.mxu1 %v1303_v17 }
  0x22   :  { %448 = vmatmul.mubr.bf16.vlgmr.msra.gmra.mxu0 %v1304_v18  ;;  %512 = vmatmul.mubr.bf16.vlgmr.msra.gmra.mxu1 %v1316_v20 }
  0x23   :  { %455 = vmatprep.mubr.bf16.mxu0 %v1307_v19  ;;  %519 = vmatprep.mubr.bf16.mxu1 %v1322_v21 }
  0x2a   :  { %456 = vmatmul.mubr.bf16.gmra.mxu0 %v1309_v22  ;;  %520 = vmatmul.mubr.bf16.gmra.mxu1 %v1324_v24 }
  0x2b   :  { %463 = vmatprep.mubr.bf16.mxu0 %v1310_v23  ;;  %527 = vmatprep.mubr.bf16.mxu1 %v1328_v25 }
  0x32   :  { %464 = vmatmul.mubr.bf16.gmra.mxu0 %v1312_v26  ;;  %528 = vmatmul.mubr.bf16.gmra.mxu1 %v1330_v28 }
  0x33   :  { %471 = vmatprep.mubr.bf16.mxu0 %v1313_v27  ;;  %535 = vmatprep.mubr.bf16.mxu1 %v1334_v29 }
  0x3a   :  { %472 = vmatmul.mubr.bf16.gmra.mxu0 %v1315_v30  ;;  %536 = vmatmul.mubr.bf16.gmra.mxu1 %v1336_v32 }
  0x3b   :  { %479 = vmatprep.mubr.bf16.mxu0 %v1319_v31  ;;  %543 = vmatprep.mubr.bf16.mxu1 %v1340_v33 }
  0x42   :  { %480 = vmatmul.mubr.bf16.gmra.mxu0 %v1321_v34  ;;  %544 = vmatmul.mubr.bf16.gmra.mxu1 %v1342_v36 }
  0x43   :  { %487 = vmatprep.mubr.bf16.mxu0 %v1325_v35  ;;  %551 = vmatprep.mubr.bf16.mxu1 %v1343_v37 }
  0x4a   :  { %488 = vmatmul.mubr.bf16.gmra.mxu0 %v1327_v38  ;;  %552 = vmatmul.mubr.bf16.gmra.mxu1 %v1345_v40 }
  0x4b   :  { %495 = vmatprep.mubr.bf16.mxu0 %v1331_v39  ;;  %559 = vmatprep.mubr.bf16.mxu1 %v1346_v41 }
  0x52   :  { %496 = vmatmul.mubr.bf16.gmra.mxu0 %v1333_v42  ;;  %560 = vmatmul.mubr.bf16.gmra.mxu1 %v1348_v44 }
  0x53   :  { %503 = vmatprep.mubr.bf16.mxu0 %v1337_v43  ;;  %567 = vmatprep.mubr.bf16.mxu1 %v1349_v45 }
  0x5a   :  { %504 = vmatmul.mubr.bf16.gmra.mxu0 %v1339_v46  ;;  %568 = vmatmul.mubr.bf16.gmra.mxu1 %v1351_v47 }
  0xe2   :  { %v1176_v48 = vpop.f32.mrf.mxu0  ;;  %v1224_v49 = vpop.f32.mrf.mxu1 }
  0xe4   :  { %v1177_v50 = vpop.f32.mrf.mxu0  ;;  %v1225_v51 = vpop.f32.mrf.mxu1 }
  0xe5   :  { %v1226_v53 = vadd.f32 %v1225_v51, %v1224_v49  ;;  %v1178_v54 = vadd.f32 %v1177_v50, %v1176_v48 }
  0xe6   :  { %v1179_v52 = vpop.f32.mrf.mxu0  ;;  %v1227_v55 = vpop.f32.mrf.mxu1 }
  0xe7   :  { %v1527_v61 = vadd.f32 %v1226_v53, %v1524_v56  ;;  %v1530_v63 = vadd.f32 %v1178_v54, %v1524_v56 }
  0xe8   :  { %v1180_v57 = vpop.f32.mrf.mxu0  ;;  %v1228_v59 = vpop.f32.mrf.mxu1 }
  0xe9   :  { %v1181_v58 = vadd.f32 %v1180_v57, %v1179_v52  ;;  %v1229_v62 = vadd.f32 %v1228_v59, %v1227_v55 }
  0xea   :  { %v1182_v60 = vpop.f32.mrf.mxu0  ;;  %v1230_v1 = vpop.f32.mrf.mxu1 }
  0xeb   :  { %v1533_v0 = vadd.f32 %v1181_v58, %v1524_v56  ;;  %v1536_v3 = vadd.f32 %v1229_v62, %v1524_v56 }
  0xec   :  { %v1183_v2 = vpop.f32.mrf.mxu0  ;;  %v1231_v5 = vpop.f32.mrf.mxu1 }
  0xed   :  { %v1068_v4 = vpack.c.bf16 %v1533_v0, %v1530_v63  ;;  %v1108_v7 = vpack.c.bf16 %v1536_v3, %v1527_v61  ;;  %v1232_v8 = vadd.f32 %v1231_v5, %v1230_v1  ;;  %v1184_v9 = vadd.f32 %v1183_v2, %v1182_v60 }
  0xee   :  { %v1185_v6 = vpop.f32.mrf.mxu0  ;;  %v1233_v10 = vpop.f32.mrf.mxu1  ;;  %v713_v62 = vmul.f32 %v1533_v0, %v1533_v0 }
  0xef   :  { %1069 = vst [vmem:[%s1732_s3] sm:$0xff] %v1068_v4   ;;  %1152 = vst [vmem:[%s1732_s3 + $0x40] sm:$0xff] %v1108_v7   ;;  %v1549_v15 = vadd.f32 %v1232_v8, %v1524_v56  ;;  %v1552_v17 = vadd.f32 %v1184_v9, %v1524_v56  ;;  %v712_v7 = vmul.f32 %v1530_v63, %v1530_v63 }
  0xf0   :  { %v1186_v11 = vpop.f32.mrf.mxu0  ;;  %v1234_v13 = vpop.f32.mrf.mxu1 }
  0xf1   :  { %v1187_v12 = vadd.f32 %v1186_v11, %v1185_v6  ;;  %v1235_v16 = vadd.f32 %v1234_v13, %v1233_v10  ;;  %v714_v8 = vmul.f32 %v1552_v17, %v1552_v17  ;;  %v675_v10 = vadd.f32 %v1533_v0, %v1530_v63 }
  0xf2   :  { %v1188_v14 = vpop.f32.mrf.mxu0  ;;  %v1236_v19 = vpop.f32.mrf.mxu1  ;;  %v744_v13 = vadd.f32 %v713_v62, %v712_v7 }
  0xf3   :  { %v1555_v18 = vadd.f32 %v1187_v12, %v1524_v56  ;;  %v1558_v21 = vadd.f32 %v1235_v16, %v1524_v56 }
  0xf4   :  { %v1189_v20 = vpop.f32.mrf.mxu0  ;;  %v1237_v23 = vpop.f32.mrf.mxu1 }
  0xf5   :  { %v1073_v22 = vpack.c.bf16 %v1555_v18, %v1552_v17  ;;  %v1113_v25 = vpack.c.bf16 %v1558_v21, %v1549_v15  ;;  %v1238_v26 = vadd.f32 %v1237_v23, %v1236_v19  ;;  %v1190_v27 = vadd.f32 %v1189_v20, %v1188_v14 }
  0xf6   :  { %v1191_v24 = vpop.f32.mrf.mxu0  ;;  %v1239_v28 = vpop.f32.mrf.mxu1  ;;  %v715_v14 = vmul.f32 %v1555_v18, %v1555_v18 }
  0xf7   :  { %1145 = vst [vmem:[%s1732_s3 + $0x8] sm:$0xff] %v1073_v22   ;;  %1153 = vst [vmem:[%s1732_s3 + $0x48] sm:$0xff] %v1113_v25   ;;  %v1571_v33 = vadd.f32 %v1238_v26, %v1524_v56  ;;  %v580_v35 = vadd.f32 %v1190_v27, %v1524_v56  ;;  %v676_v22 = vadd.f32 %v675_v10, %v1552_v17 }
  0xf8   :  { %v1192_v29 = vpop.f32.mrf.mxu0  ;;  %v1240_v31 = vpop.f32.mrf.mxu1  ;;  %v745_v26 = vadd.f32 %v744_v13, %v714_v8 }
  0xf9   :  { %v1193_v30 = vadd.f32 %v1192_v29, %v1191_v24  ;;  %v1241_v34 = vadd.f32 %v1240_v31, %v1239_v28  ;;  %v716_v63 = vmul.f32 %v580_v35, %v580_v35  ;;  %v677_v28 = vadd.f32 %v676_v22, %v1555_v18 }
  0xfa   :  { %v1194_v32 = vpop.f32.mrf.mxu0  ;;  %v1242_v37 = vpop.f32.mrf.mxu1  ;;  %v746_v31 = vadd.f32 %v745_v26, %v715_v14 }
  0xfb   :  { %v1575_v36 = vadd.f32 %v1193_v30, %v1524_v56  ;;  %v1578_v39 = vadd.f32 %v1241_v34, %v1524_v56 }
  0xfc   :  { %v1195_v38 = vpop.f32.mrf.mxu0  ;;  %v1243_v41 = vpop.f32.mrf.mxu1 }
  0xfd   :  { %v1078_v40 = vpack.c.bf16 %v1575_v36, %v580_v35  ;;  %v1118_v43 = vpack.c.bf16 %v1578_v39, %v1571_v33  ;;  %v1244_v44 = vadd.f32 %v1243_v41, %v1242_v37  ;;  %v1196_v45 = vadd.f32 %v1195_v38, %v1194_v32 }
  0xfe   :  { %v1197_v42 = vpop.f32.mrf.mxu0  ;;  %v1245_v46 = vpop.f32.mrf.mxu1  ;;  %v717_v32 = vmul.f32 %v1575_v36, %v1575_v36  ;;  %v678_v38 = vadd.f32 %v677_v28, %v580_v35 }
  0xff   :  { %1146 = vst [vmem:[%s1732_s3 + $0x10] sm:$0xff] %v1078_v40   ;;  %1154 = vst [vmem:[%s1732_s3 + $0x50] sm:$0xff] %v1118_v43   ;;  %v1590_v51 = vadd.f32 %v1244_v44, %v1524_v56  ;;  %v582_v53 = vadd.f32 %v1196_v45, %v1524_v56 }
 0x100   :  { %v1198_v47 = vpop.f32.mrf.mxu0  ;;  %v1246_v49 = vpop.f32.mrf.mxu1  ;;  %v679_v44 = vadd.f32 %v678_v38, %v1575_v36 }
 0x101   :  { %v1199_v48 = vadd.f32 %v1198_v47, %v1197_v42  ;;  %v1247_v52 = vadd.f32 %v1246_v49, %v1245_v46  ;;  %v747_v42 = vadd.f32 %v746_v31, %v716_v63  ;;  %v718_v18 = vmul.f32 %v582_v53, %v582_v53 }
 0x102   :  { %v1200_v50 = vpop.f32.mrf.mxu0  ;;  %v1248_v55 = vpop.f32.mrf.mxu1 }
 0x103   :  { %v1594_v54 = vadd.f32 %v1199_v48, %v1524_v56  ;;  %v1597_v58 = vadd.f32 %v1247_v52, %v1524_v56  ;;  %v748_v47 = vadd.f32 %v747_v42, %v717_v32  ;;  %v680_v52 = vadd.f32 %v679_v44, %v582_v53 }
 0x104   :  { %v1201_v57 = vpop.f32.mrf.mxu0  ;;  %v1249_v60 = vpop.f32.mrf.mxu1 }
 0x105   :  { %v1083_v59 = vpack.c.bf16 %v1594_v54, %v582_v53  ;;  %v1123_v2 = vpack.c.bf16 %v1597_v58, %v1590_v51  ;;  %v1250_v4 = vadd.f32 %v1249_v60, %v1248_v55  ;;  %v1202_v5 = vadd.f32 %v1201_v57, %v1200_v50 }
 0x106   :  { %v1203_v1 = vpop.f32.mrf.mxu0  ;;  %v1251_v6 = vpop.f32.mrf.mxu1  ;;  %v719_v35 = vmul.f32 %v1594_v54, %v1594_v54  ;;  %v749_v60 = vadd.f32 %v748_v47, %v718_v18 }
 0x107   :  { %1147 = vst [vmem:[%s1732_s3 + $0x18] sm:$0xff] %v1083_v59   ;;  %1155 = vst [vmem:[%s1732_s3 + $0x58] sm:$0xff] %v1123_v2   ;;  %v1619_v19 = vadd.f32 %v1250_v4, %v1524_v56  ;;  %v584_v23 = vadd.f32 %v1202_v5, %v1524_v56  ;;  %v681_v2 = vadd.f32 %v680_v52, %v1594_v54 }
 0x108   :  { %v1204_v9 = vpop.f32.mrf.mxu0  ;;  %v1252_v12 = vpop.f32.mrf.mxu1  ;;  %v750_v7 = vadd.f32 %v749_v60, %v719_v35 }
 0x109   :  { %v1205_v11 = vadd.f32 %v1204_v9, %v1203_v1  ;;  %v1253_v20 = vadd.f32 %v1252_v12, %v1251_v6  ;;  %v720_v62 = vmul.f32 %v584_v23, %v584_v23 }
 0x10a   :  { %v1206_v16 = vpop.f32.mrf.mxu0  ;;  %v1254_v25 = vpop.f32.mrf.mxu1 }
 0x10b   :  { %v585_v24 = vadd.f32 %v1205_v11, %v1524_v56  ;;  %v1625_v27 = vadd.f32 %v1253_v20, %v1524_v56  ;;  %v682_v11 = vadd.f32 %v681_v2, %v584_v23  ;;  %v751_v13 = vadd.f32 %v750_v7, %v720_v62 }
 0x10c   :  { %v1207_v0 = vpop.f32.mrf.mxu0  ;;  %v1255_v30 = vpop.f32.mrf.mxu1 }
 0x10d   :  { %v1088_v29 = vpack.c.bf16 %v585_v24, %v584_v23  ;;  %v1128_v34 = vpack.c.bf16 %v1625_v27, %v1619_v19  ;;  %v1256_v37 = vadd.f32 %v1255_v30, %v1254_v25  ;;  %v1208_v40 = vadd.f32 %v1207_v0, %v1206_v16 }
 0x10e   :  { %v1209_v17 = vpop.f32.mrf.mxu0  ;;  %v1257_v41 = vpop.f32.mrf.mxu1  ;;  %v721_v8 = vmul.f32 %v585_v24, %v585_v24  ;;  %v683_v54 = vadd.f32 %v682_v11, %v585_v24 }
 0x10f   :  { %1148 = vst [vmem:[%s1732_s3 + $0x20] sm:$0xff] %v1088_v29   ;;  %1156 = vst [vmem:[%s1732_s3 + $0x60] sm:$0xff] %v1128_v34   ;;  %v1642_v49 = vadd.f32 %v1256_v37, %v1524_v56  ;;  %v586_v55 = vadd.f32 %v1208_v40, %v1524_v56 }
 0x110   :  { %v1210_v43 = vpop.f32.mrf.mxu0  ;;  %v1258_v46 = vpop.f32.mrf.mxu1  ;;  %v752_v26 = vadd.f32 %v751_v13, %v721_v8 }
 0x111   :  { %v1211_v45 = vadd.f32 %v1210_v43, %v1209_v17  ;;  %v1259_v50 = vadd.f32 %v1258_v46, %v1257_v41  ;;  %v722_v14 = vmul.f32 %v586_v55, %v586_v55  ;;  %v684_v28 = vadd.f32 %v683_v54, %v586_v55 }
 0x112   :  { %v1212_v48 = vpop.f32.mrf.mxu0  ;;  %v1260_v59 = vpop.f32.mrf.mxu1 }
 0x113   :  { %v587_v57 = vadd.f32 %v1211_v45, %v1524_v56  ;;  %v1647_v1 = vadd.f32 %v1259_v50, %v1524_v56  ;;  %v753_v32 = vadd.f32 %v752_v26, %v722_v14  ;;  %v732_v26 = vmul.f32 %v1571_v33, %v1571_v33 }
 0x114   :  { %v1213_v36 = vpop.f32.mrf.mxu0  ;;  %v1261_v6 = vpop.f32.mrf.mxu1 }
 0x115   :  { %v1093_v4 = vpack.c.bf16 %v587_v57, %v586_v55  ;;  %v1214_v5 = vadd.f32 %v1213_v36, %v1212_v48  ;;  %v1133_v53 = vpack.c.bf16 %v1647_v1, %v1642_v49  ;;  %v1262_v10 = vadd.f32 %v1261_v6, %v1260_v59 }
 0x116   :  { %v1215_v9 = vpop.f32.mrf.mxu0  ;;  %v1263_v12 = vpop.f32.mrf.mxu1  ;;  %v723_v29 = vmul.f32 %v587_v57, %v587_v57  ;;  %v685_v24 = vadd.f32 %v684_v28, %v587_v57 }
 0x117   :  { %1149 = vst [vmem:[%s1732_s3 + $0x28] sm:$0xff] %v1093_v4   ;;  %1157 = vst [vmem:[%s1732_s3 + $0x68] sm:$0xff] %v1133_v53   ;;  %v588_v20 = vadd.f32 %v1214_v5, %v1524_v56  ;;  %v1660_v23 = vadd.f32 %v1262_v10, %v1524_v56  ;;  %v728_v10 = vmul.f32 %v1527_v61, %v1527_v61 }
 0x118   :  { %v1216_v16 = vpop.f32.mrf.mxu0  ;;  %v1264_v25 = vpop.f32.mrf.mxu1  ;;  %v754_v44 = vadd.f32 %v753_v32, %v723_v29 }
 0x119   :  { %v1217_v22 = vadd.f32 %v1216_v16, %v1215_v9  ;;  %v1265_v0 = vadd.f32 %v1264_v25, %v1263_v12  ;;  %v724_v37 = vmul.f32 %v588_v20, %v588_v20  ;;  %v686_v45 = vadd.f32 %v685_v24, %v588_v20 }
 0x11a   :  { %v1218_v63 = vpop.f32.mrf.mxu0  ;;  %v1266_v31 = vpop.f32.mrf.mxu1  ;;  %v730_v16 = vmul.f32 %v1549_v15, %v1549_v15 }
 0x11b   :  { %v589_v30 = vadd.f32 %v1217_v22, %v1524_v56  ;;  %v1664_v34 = vadd.f32 %v1265_v0, %v1524_v56  ;;  %v755_v50 = vadd.f32 %v754_v44, %v724_v37 }
 0x11c   :  { %v1219_v17 = vpop.f32.mrf.mxu0  ;;  %v1267_v41 = vpop.f32.mrf.mxu1 }
 0x11d   :  { %v1098_v38 = vpack.c.bf16 %v589_v30, %v588_v20  ;;  %v1220_v40 = vadd.f32 %v1219_v17, %v1218_v63  ;;  %v1138_v18 = vpack.c.bf16 %v1664_v34, %v1660_v23  ;;  %v1268_v43 = vadd.f32 %v1267_v41, %v1266_v31 }
 0x11e   :  { %v1221_v42 = vpop.f32.mrf.mxu0  ;;  %v725_v46 = vmul.f32 %v589_v30, %v589_v30  ;;  %v1269_v35 = vpop.f32.mrf.mxu1  ;;  %v687_v52 = vadd.f32 %v686_v45, %v589_v30  ;;  %v731_v20 = vmul.f32 %v1558_v21, %v1558_v21  ;;  %v740_v45 = vmul.f32 %v1660_v23, %v1660_v23 }
 0x11f   :  { %1150 = vst [vmem:[%s1732_s3 + $0x30] sm:$0xff] %v1098_v38   ;;  %v590_v47 = vadd.f32 %v1220_v40, %v1524_v56  ;;  %1158 = vst [vmem:[%s1732_s3 + $0x70] sm:$0xff] %v1138_v18   ;;  %v606_v60 = vadd.f32 %v1268_v43, %v1524_v56  ;;  %v737_v38 = vmul.f32 %v1625_v27, %v1625_v27 }
 0x120   :  { %v1222_v48 = vpop.f32.mrf.mxu0  ;;  %v1270_v59 = vpop.f32.mrf.mxu1  ;;  %v756_v36 = vadd.f32 %v755_v50, %v725_v46  ;;  %v739_v43 = vmul.f32 %v1647_v1, %v1647_v1 }
 0x121   :  { %v726_v55 = vmul.f32 %v590_v47, %v590_v47  ;;  %v1223_v57 = vadd.f32 %v1222_v48, %v1221_v42  ;;  %v1271_v62 = vadd.f32 %v1270_v59, %v1269_v35  ;;  %v688_v2 = vadd.f32 %v687_v52, %v590_v47 }
 0x122   :  { %v738_v42 = vmul.f32 %v1642_v49, %v1642_v49  ;;  %v742_v48 = vmul.f32 %v606_v60, %v606_v60 }
 0x123   :  { %v591_v4 = vadd.f32 %v1223_v57, %v1524_v56  ;;  %v607_v5 = vadd.f32 %v1271_v62, %v1524_v56  ;;  %v757_v6 = vadd.f32 %v756_v36, %v726_v55  ;;  %v729_v56 = vmul.f32 %v1536_v3, %v1536_v3 }
 0x125   :  { %v689_v7 = vadd.f32 %v688_v2, %v591_v4  ;;  %v727_v8 = vmul.f32 %v591_v4, %v591_v4  ;;  %v1103_v9 = vpack.c.bf16 %v591_v4, %v590_v47  ;;  %v1143_v53 = vpack.c.bf16 %v607_v5, %v606_v60 }
 0x126   :  { %v741_v47 = vmul.f32 %v1664_v34, %v1664_v34  ;;  %v743_v55 = vmul.f32 %v607_v5, %v607_v5 }
 0x127   :  { %v690_v11 = vadd.f32 %v689_v7, %v1527_v61  ;;  %v758_v12 = vadd.f32 %v757_v6, %v727_v8  ;;  %1151 = vst [vmem:[%s1732_s3 + $0x38] sm:$0xff] %v1103_v9   ;;  %1159 = vst [vmem:[%s1732_s3 + $0x78] sm:$0xff] %v1143_v53  }
 0x129   :  { %v691_v13 = vadd.f32 %v690_v11, %v1536_v3  ;;  %v759_v14 = vadd.f32 %v758_v12, %v728_v10  ;;  %v733_v3 = vmul.f32 %v1578_v39, %v1578_v39 }
 0x12b   :  { %v692_v61 = vadd.f32 %v691_v13, %v1549_v15  ;;  %v760_v54 = vadd.f32 %v759_v14, %v729_v56  ;;  %v734_v15 = vmul.f32 %v1590_v51, %v1590_v51 }
 0x12d   :  { %v693_v22 = vadd.f32 %v692_v61, %v1558_v21  ;;  %v761_v25 = vadd.f32 %v760_v54, %v730_v16  ;;  %v735_v21 = vmul.f32 %v1597_v58, %v1597_v58 }
 0x12f   :  { %v762_v63 = vadd.f32 %v761_v25, %v731_v20  ;;  %v694_v0 = vadd.f32 %v693_v22, %v1571_v33  ;;  %v736_v33 = vmul.f32 %v1619_v19, %v1619_v19 }
 0x131   :  { %v695_v28 = vadd.f32 %v694_v0, %v1578_v39  ;;  %v763_v29 = vadd.f32 %v762_v63, %v732_v26 }
 0x133   :  { %v696_v30 = vadd.f32 %v695_v28, %v1590_v51  ;;  %v764_v31 = vadd.f32 %v763_v29, %v733_v3 }
 0x135   :  { %v697_v32 = vadd.f32 %v696_v30, %v1597_v58  ;;  %v765_v17 = vadd.f32 %v764_v31, %v734_v15 }
 0x137   :  { %v698_v24 = vadd.f32 %v697_v32, %v1619_v19  ;;  %v766_v37 = vadd.f32 %v765_v17, %v735_v21 }
 0x139   :  { %v699_v39 = vadd.f32 %v698_v24, %v1625_v27  ;;  %v767_v40 = vadd.f32 %v766_v37, %v736_v33 }
 0x13b   :  { %v768_v51 = vadd.f32 %v767_v40, %v737_v38  ;;  %v700_v41 = vadd.f32 %v699_v39, %v1642_v49 }
 0x13d   :  { %v769_v58 = vadd.f32 %v768_v51, %v738_v42  ;;  %v701_v18 = vadd.f32 %v700_v41, %v1647_v1 }
 0x13f   :  { %v770_v19 = vadd.f32 %v769_v58, %v739_v43  ;;  %v702_v44 = vadd.f32 %v701_v18, %v1660_v23 }
 0x141   :  { %v771_v27 = vadd.f32 %v770_v19, %v740_v45  ;;  %v703_v46 = vadd.f32 %v702_v44, %v1664_v34 }
 0x143   :  { %v772_v35 = vadd.f32 %v771_v27, %v741_v47  ;;  %v704_v49 = vadd.f32 %v703_v46, %v606_v60 }
 0x145   :  { %v773_v50 = vadd.f32 %v772_v35, %v742_v48  ;;  %v705_v52 = vadd.f32 %v704_v49, %v607_v5 }
 0x147   :  { %v706_v57 = vrot.slane %v705_v52, 4  ;;  %v774_v1 = vadd.f32 %v773_v50, %v743_v55 }
 0x149   :  { %v707_v59 = vadd.f32 %v706_v57, %v705_v52  ;;  %v775_v62 = vrot.slane %v774_v1, 4 }
 0x14b   :  { %v708_v36 = vrot.slane %v707_v59, 2  ;;  %v776_v2 = vadd.f32 %v775_v62, %v774_v1 }
 0x14d   :  { %v709_v4 = vadd.f32 %v708_v36, %v707_v59  ;;  %v777_v23 = vrot.slane %v776_v2, 2 }
 0x14f   :  { %v710_v6 = vrot.slane %v709_v4, 1  ;;  %v778_v7 = vadd.f32 %v777_v23, %v776_v2 }
 0x151   :  { %v779_v8 = vrot.slane %v778_v7, 1  ;;  %v711_v9 = vadd.f32 %v710_v6, %v709_v4 }
 0x153   :  { %v780_v34 = vadd.f32 %v779_v8, %v778_v7 }
 0x155   :  { %v782_v53 = vsel %vm781_vm0, %v711_v9, %v780_v34 }
 0x156   :  { %783 = vst [vmem:[%s1733_s4] sm:$0x3] %v782_v53 }

// kernel: _lambda_.8
= control target key start
LH: loop header
LB: loop body
LE: loop exit
PB: predicated region body
PF: predicated region fallthrough
CT: control target
= control target key end

     0   :  { %vm1262_vm0 = vcmask 1040384   ;;  %s2580_s1 = inlined_call_operand.vmem [shape: bf16[1,512,128], index: 1, kind: input, shape index: {}]   ;;  %s2581_s0 = inlined_call_operand.vmem [shape: bf16[256,512], index: 0, kind: input, shape index: {}]   ;;  %s2582_s2 = inlined_call_operand.vmem [shape: f32[1,128], index: 2, kind: input, shape index: {}]   ;;  %s2583_s3 = inlined_call_operand.vmem [shape: bf16[256,128], index: 3, kind: output, shape index: {0}]   ;;  %s2584_s4 = inlined_call_operand.vmem [shape: f32[1,2,128], index: 4, kind: output, shape index: {1}]  }
   0x1   :  { %v1913_v0 = vld [vmem:[%s2580_s1 + $0x78] sm:$0xff]   ;;  %v1917_v4 = vld [vmem:[%s2580_s1 + $0x70] sm:$0xff]   ;;  %v1921_v8 = vld [vmem:[%s2580_s1 + $0x68] sm:$0xff]  }
   0x2   :  { %v1914_v1 = vld [vmem:[%s2580_s1 + $0xf8] sm:$0xff]   ;;  %1689 = vmatprep.subr.bf16.mxu0 %v1913_v0  ;;  %v1918_v5 = vld [vmem:[%s2580_s1 + $0xf0] sm:$0xff]   ;;  %v1922_v9 = vld [vmem:[%s2580_s1 + $0xe8] sm:$0xff]  }
   0x3   :  { %v1915_v2 = vld [vmem:[%s2580_s1 + $0x38] sm:$0xff]   ;;  %1801 = vmatprep.subr.bf16.mxu1 %v1914_v1  ;;  %v1919_v6 = vld [vmem:[%s2580_s1 + $0x30] sm:$0xff]   ;;  %v1923_v10 = vld [vmem:[%s2580_s1 + $0x28] sm:$0xff]  }
   0x4   :  { %v1916_v3 = vld [vmem:[%s2580_s1 + $0xb8] sm:$0xff]   ;;  %1690 = vmatpush3.bf16.msra.mxu0 %v1915_v2  ;;  %v1920_v7 = vld [vmem:[%s2580_s1 + $0xb0] sm:$0xff]   ;;  %v1924_v11 = vld [vmem:[%s2580_s1 + $0xa8] sm:$0xff]  }
   0x5   :  { %1802 = vmatpush3.bf16.msra.mxu1 %v1916_v3  ;;  %1691 = vmatprep.subr.bf16.mxu0 %v1917_v4  ;;  %v1925_v12 = vld [vmem:[%s2580_s1 + $0x60] sm:$0xff]   ;;  %v1929_v16 = vld [vmem:[%s2580_s1 + $0x58] sm:$0xff]   ;;  %v1933_v20 = vld [vmem:[%s2580_s1 + $0x50] sm:$0xff]  }
   0x6   :  { %1803 = vmatprep.subr.bf16.mxu1 %v1918_v5  ;;  %v1926_v13 = vld [vmem:[%s2580_s1 + $0xe0] sm:$0xff]   ;;  %v1930_v17 = vld [vmem:[%s2580_s1 + $0xd8] sm:$0xff]   ;;  %v1934_v21 = vld [vmem:[%s2580_s1 + $0xd0] sm:$0xff]  }
   0x7   :  { %v1927_v14 = vld [vmem:[%s2580_s1 + $0x20] sm:$0xff]   ;;  %v1931_v18 = vld [vmem:[%s2580_s1 + $0x18] sm:$0xff]   ;;  %v1935_v22 = vld [vmem:[%s2580_s1 + $0x10] sm:$0xff]  }
   0x8   :  { %1692 = vmatpush3.bf16.msra.mxu0 %v1919_v6  ;;  %v1928_v15 = vld [vmem:[%s2580_s1 + $0xa0] sm:$0xff]   ;;  %v1932_v19 = vld [vmem:[%s2580_s1 + $0x98] sm:$0xff]   ;;  %v1936_v23 = vld [vmem:[%s2580_s1 + $0x90] sm:$0xff]  }
   0x9   :  { %1804 = vmatpush3.bf16.msra.mxu1 %v1920_v7  ;;  %1693 = vmatprep.subr.bf16.mxu0 %v1921_v8  ;;  %v1937_v24 = vld [vmem:[%s2580_s1 + $0x48] sm:$0xff]   ;;  %v1941_v28 = vld [vmem:[%s2580_s1 + $0x40] sm:$0xff]  }
   0xa   :  { %1805 = vmatprep.subr.bf16.mxu1 %v1922_v9  ;;  %v1938_v25 = vld [vmem:[%s2580_s1 + $0xc8] sm:$0xff]   ;;  %v1942_v29 = vld [vmem:[%s2580_s1 + $0xc0] sm:$0xff]  }
   0xb   :  { %v1939_v26 = vld [vmem:[%s2580_s1 + $0x8] sm:$0xff]   ;;  %v1943_v30 = vld [vmem:[%s2580_s1] sm:$0xff]  }
   0xc   :  { %1694 = vmatpush3.bf16.msra.mxu0 %v1923_v10  ;;  %v1940_v27 = vld [vmem:[%s2580_s1 + $0x88] sm:$0xff]   ;;  %v1944_v31 = vld [vmem:[%s2580_s1 + $0x80] sm:$0xff]  }
   0xd   :  { %1806 = vmatpush3.bf16.msra.mxu1 %v1924_v11  ;;  %1695 = vmatprep.subr.bf16.mxu0 %v1925_v12  ;;  %v1945_v32 = vld [vmem:[%s2581_s0] ss:$16 sps:$4 sm:$0xff]   ;;  %v1947_v33 = vld [vmem:[%s2581_s0 + $0x4] ss:$16 sps:$4 sm:$0xff]   ;;  %v1948_v34 = vld [vmem:[%s2581_s0 + $0x8] ss:$16 sps:$4 sm:$0xff]  }
   0xe   :  { %1807 = vmatprep.subr.bf16.mxu1 %v1926_v13  ;;  %v1950_v35 = vld [vmem:[%s2581_s0 + $0xc] ss:$16 sps:$4 sm:$0xff]   ;;  %767 = vmatprep.mubr.bf16.mxu0 %v1947_v33  ;;  %v1951_v36 = vld [vmem:[%s2581_s0 + $0x24] ss:$16 sps:$4 sm:$0xff]   ;;  %v1955_v38 = vld [vmem:[%s2581_s0 + $0x20] ss:$16 sps:$4 sm:$0xff]  }
   0xf   :  { %928 = vmatprep.mubr.bf16.mxu1 %v1950_v35  ;;  %v1953_v37 = vld [vmem:[%s2581_s0 + $0x2c] ss:$16 sps:$4 sm:$0xff]   ;;  %v1956_v39 = vld [vmem:[%s2581_s0 + $0x28] ss:$16 sps:$4 sm:$0xff]   ;;  %v1957_v40 = vld [vmem:[%s2581_s0 + $0x44] ss:$16 sps:$4 sm:$0xff]  }
  0x10   :  { %1696 = vmatpush3.bf16.msra.mxu0 %v1927_v14  ;;  %v1959_v41 = vld [vmem:[%s2581_s0 + $0x4c] ss:$16 sps:$4 sm:$0xff]   ;;  %v1961_v42 = vld [vmem:[%s2581_s0 + $0x40] ss:$16 sps:$4 sm:$0xff]   ;;  %v1962_v43 = vld [vmem:[%s2581_s0 + $0x48] ss:$16 sps:$4 sm:$0xff]  }
  0x11   :  { %1808 = vmatpush3.bf16.msra.mxu1 %v1928_v15  ;;  %1697 = vmatprep.subr.bf16.mxu0 %v1929_v16  ;;  %v1963_v44 = vld [vmem:[%s2581_s0 + $0x64] ss:$16 sps:$4 sm:$0xff]   ;;  %v1965_v45 = vld [vmem:[%s2581_s0 + $0x6c] ss:$16 sps:$4 sm:$0xff]   ;;  %v1967_v46 = vld [vmem:[%s2581_s0 + $0x60] ss:$16 sps:$4 sm:$0xff]  }
  0x12   :  { %1809 = vmatprep.subr.bf16.mxu1 %v1930_v17  ;;  %v1968_v47 = vld [vmem:[%s2581_s0 + $0x68] ss:$16 sps:$4 sm:$0xff]   ;;  %v1969_v48 = vld [vmem:[%s2581_s0 + $0x84] ss:$16 sps:$4 sm:$0xff]   ;;  %v1971_v49 = vld [vmem:[%s2581_s0 + $0x8c] ss:$16 sps:$4 sm:$0xff]  }
  0x13   :  { %v1973_v50 = vld [vmem:[%s2581_s0 + $0x80] ss:$16 sps:$4 sm:$0xff]   ;;  %v1974_v51 = vld [vmem:[%s2581_s0 + $0x88] ss:$16 sps:$4 sm:$0xff]   ;;  %v1975_v52 = vld [vmem:[%s2581_s0 + $0xa4] ss:$16 sps:$4 sm:$0xff]  }
  0x14   :  { %1698 = vmatpush3.bf16.msra.mxu0 %v1931_v18  ;;  %v1977_v53 = vld [vmem:[%s2581_s0 + $0xac] ss:$16 sps:$4 sm:$0xff]   ;;  %v1979_v54 = vld [vmem:[%s2581_s0 + $0xa0] ss:$16 sps:$4 sm:$0xff]   ;;  %v1980_v55 = vld [vmem:[%s2581_s0 + $0xa8] ss:$16 sps:$4 sm:$0xff]  }
  0x15   :  { %1810 = vmatpush3.bf16.msra.mxu1 %v1932_v19  ;;  %1699 = vmatprep.subr.bf16.mxu0 %v1933_v20  ;;  %v1981_v56 = vld [vmem:[%s2581_s0 + $0xc4] ss:$16 sps:$4 sm:$0xff]   ;;  %v1983_v57 = vld [vmem:[%s2581_s0 + $0xcc] ss:$16 sps:$4 sm:$0xff]   ;;  %v1985_v58 = vld [vmem:[%s2581_s0 + $0xc0] ss:$16 sps:$4 sm:$0xff]  }
  0x16   :  { %1811 = vmatprep.subr.bf16.mxu1 %v1934_v21  ;;  %v1986_v59 = vld [vmem:[%s2581_s0 + $0xc8] ss:$16 sps:$4 sm:$0xff]   ;;  %v1987_v60 = vld [vmem:[%s2581_s0 + $0xe4] ss:$16 sps:$4 sm:$0xff]   ;;  %v1989_v61 = vld [vmem:[%s2581_s0 + $0xec] ss:$16 sps:$4 sm:$0xff]  }
  0x17   :  { %v1991_v62 = vld [vmem:[%s2581_s0 + $0xe0] ss:$16 sps:$4 sm:$0xff]   ;;  %v1992_v63 = vld [vmem:[%s2581_s0 + $0xe8] ss:$16 sps:$4 sm:$0xff]   ;;  %v1993_v0 = vld [vmem:[%s2581_s0 + $0x104] ss:$16 sps:$4 sm:$0xff]  }
  0x18   :  { %1700 = vmatpush3.bf16.msra.mxu0 %v1935_v22  ;;  %v1995_v1 = vld [vmem:[%s2581_s0 + $0x10c] ss:$16 sps:$4 sm:$0xff]   ;;  %v1997_v2 = vld [vmem:[%s2581_s0 + $0x100] ss:$16 sps:$4 sm:$0xff]   ;;  %v1998_v3 = vld [vmem:[%s2581_s0 + $0x108] ss:$16 sps:$4 sm:$0xff]  }
  0x19   :  { %1812 = vmatpush3.bf16.msra.mxu1 %v1936_v23  ;;  %1701 = vmatprep.subr.bf16.mxu0 %v1937_v24  ;;  %v1999_v4 = vld [vmem:[%s2581_s0 + $0x124] ss:$16 sps:$4 sm:$0xff]   ;;  %v2001_v5 = vld [vmem:[%s2581_s0 + $0x12c] ss:$16 sps:$4 sm:$0xff]   ;;  %v2003_v6 = vld [vmem:[%s2581_s0 + $0x120] ss:$16 sps:$4 sm:$0xff]  }
  0x1a   :  { %1813 = vmatprep.subr.bf16.mxu1 %v1938_v25  ;;  %v2004_v7 = vld [vmem:[%s2581_s0 + $0x128] ss:$16 sps:$4 sm:$0xff]   ;;  %v2005_v8 = vld [vmem:[%s2581_s0 + $0x144] ss:$16 sps:$4 sm:$0xff]   ;;  %v2007_v9 = vld [vmem:[%s2581_s0 + $0x14c] ss:$16 sps:$4 sm:$0xff]  }
  0x1b   :  { %v2009_v10 = vld [vmem:[%s2581_s0 + $0x140] ss:$16 sps:$4 sm:$0xff]   ;;  %v2010_v11 = vld [vmem:[%s2581_s0 + $0x148] ss:$16 sps:$4 sm:$0xff]   ;;  %v2011_v12 = vld [vmem:[%s2581_s0 + $0x164] ss:$16 sps:$4 sm:$0xff]  }
  0x1c   :  { %1702 = vmatpush3.bf16.msra.mxu0 %v1939_v26  ;;  %v2013_v13 = vld [vmem:[%s2581_s0 + $0x16c] ss:$16 sps:$4 sm:$0xff]   ;;  %v2015_v14 = vld [vmem:[%s2581_s0 + $0x160] ss:$16 sps:$4 sm:$0xff]   ;;  %v2016_v15 = vld [vmem:[%s2581_s0 + $0x168] ss:$16 sps:$4 sm:$0xff]  }
  0x1d   :  { %1814 = vmatpush3.bf16.msra.mxu1 %v1940_v27  ;;  %1703 = vmatprep.subr.bf16.mxu0 %v1941_v28  ;;  %v2017_v16 = vld [vmem:[%s2581_s0 + $0x184] ss:$16 sps:$4 sm:$0xff]   ;;  %v2019_v17 = vld [vmem:[%s2581_s0 + $0x18c] ss:$16 sps:$4 sm:$0xff]   ;;  %v2021_v18 = vld [vmem:[%s2581_s0 + $0x180] ss:$16 sps:$4 sm:$0xff]  }
  0x1e   :  { %1815 = vmatprep.subr.bf16.mxu1 %v1942_v29  ;;  %v2022_v19 = vld [vmem:[%s2581_s0 + $0x188] ss:$16 sps:$4 sm:$0xff]   ;;  %v2023_v20 = vld [vmem:[%s2581_s0 + $0x1a4] ss:$16 sps:$4 sm:$0xff]   ;;  %v2025_v21 = vld [vmem:[%s2581_s0 + $0x1ac] ss:$16 sps:$4 sm:$0xff]  }
  0x1f   :  { %v2027_v22 = vld [vmem:[%s2581_s0 + $0x1a0] ss:$16 sps:$4 sm:$0xff]   ;;  %v2028_v23 = vld [vmem:[%s2581_s0 + $0x1a8] ss:$16 sps:$4 sm:$0xff]   ;;  %v2029_v24 = vld [vmem:[%s2581_s0 + $0x1c4] ss:$16 sps:$4 sm:$0xff]  }
  0x20   :  { %1704 = vmatpush3.bf16.msra.mxu0 %v1943_v30  ;;  %v2031_v25 = vld [vmem:[%s2581_s0 + $0x1cc] ss:$16 sps:$4 sm:$0xff]   ;;  %v2033_v26 = vld [vmem:[%s2581_s0 + $0x1c0] ss:$16 sps:$4 sm:$0xff]   ;;  %v2034_v27 = vld [vmem:[%s2581_s0 + $0x1c8] ss:$16 sps:$4 sm:$0xff]  }
  0x21   :  { %1816 = vmatpush3.bf16.msra.mxu1 %v1944_v31  ;;  %v2035_v28 = vld [vmem:[%s2581_s0 + $0x1e4] ss:$16 sps:$4 sm:$0xff]   ;;  %v2037_v29 = vld [vmem:[%s2581_s0 + $0x1ec] ss:$16 sps:$4 sm:$0xff]   ;;  %v2039_v30 = vld [vmem:[%s2581_s0 + $0x1e0] ss:$16 sps:$4 sm:$0xff]  }
  0x22   :  { %v2040_v31 = vld [vmem:[%s2581_s0 + $0x1e8] ss:$16 sps:$4 sm:$0xff]  }
  0x23   :  { %768 = vmatmul.mubr.bf16.vlgmr.msra.gmra.mxu0 %v1945_v32 }
  0x24   :  { %929 = vmatmul.mubr.bf16.vlgmr.msra.gmra.mxu1 %v1948_v34  ;;  %775 = vmatprep.mubr.bf16.mxu0 %v1951_v36 }
  0x25   :  { %936 = vmatprep.mubr.bf16.mxu1 %v1953_v37 }
  0x2b   :  { %776 = vmatmul.mubr.bf16.gmra.mxu0 %v1955_v38 }
  0x2c   :  { %937 = vmatmul.mubr.bf16.gmra.mxu1 %v1956_v39  ;;  %783 = vmatprep.mubr.bf16.mxu0 %v1957_v40 }
  0x2d   :  { %944 = vmatprep.mubr.bf16.mxu1 %v1959_v41 }
  0x33   :  { %784 = vmatmul.mubr.bf16.gmra.mxu0 %v1961_v42 }
  0x34   :  { %945 = vmatmul.mubr.bf16.gmra.mxu1 %v1962_v43  ;;  %791 = vmatprep.mubr.bf16.mxu0 %v1963_v44 }
  0x35   :  { %952 = vmatprep.mubr.bf16.mxu1 %v1965_v45 }
  0x3b   :  { %792 = vmatmul.mubr.bf16.gmra.mxu0 %v1967_v46  ;;  %v2357_v46 = vld [vmem:[%s2582_s2] ss:$0 sm:$0xff] }
  0x3c   :  { %953 = vmatmul.mubr.bf16.gmra.mxu1 %v1968_v47  ;;  %799 = vmatprep.mubr.bf16.mxu0 %v1969_v48 }
  0x3d   :  { %960 = vmatprep.mubr.bf16.mxu1 %v1971_v49 }
  0x43   :  { %800 = vmatmul.mubr.bf16.gmra.mxu0 %v1973_v50 }
  0x44   :  { %961 = vmatmul.mubr.bf16.gmra.mxu1 %v1974_v51  ;;  %807 = vmatprep.mubr.bf16.mxu0 %v1975_v52 }
  0x45   :  { %968 = vmatprep.mubr.bf16.mxu1 %v1977_v53 }
  0x4b   :  { %808 = vmatmul.mubr.bf16.gmra.mxu0 %v1979_v54 }
  0x4c   :  { %969 = vmatmul.mubr.bf16.gmra.mxu1 %v1980_v55  ;;  %815 = vmatprep.mubr.bf16.mxu0 %v1981_v56 }
  0x4d   :  { %976 = vmatprep.mubr.bf16.mxu1 %v1983_v57 }
  0x53   :  { %816 = vmatmul.mubr.bf16.gmra.mxu0 %v1985_v58 }
  0x54   :  { %977 = vmatmul.mubr.bf16.gmra.mxu1 %v1986_v59  ;;  %823 = vmatprep.mubr.bf16.mxu0 %v1987_v60 }
  0x55   :  { %984 = vmatprep.mubr.bf16.mxu1 %v1989_v61 }
  0x5b   :  { %824 = vmatmul.mubr.bf16.gmra.mxu0 %v1991_v62 }
  0x5c   :  { %985 = vmatmul.mubr.bf16.gmra.mxu1 %v1992_v63  ;;  %831 = vmatprep.mubr.bf16.mxu0 %v1993_v0 }
  0x5d   :  { %992 = vmatprep.mubr.bf16.mxu1 %v1995_v1 }
  0x63   :  { %832 = vmatmul.mubr.bf16.gmra.mxu0 %v1997_v2 }
  0x64   :  { %993 = vmatmul.mubr.bf16.gmra.mxu1 %v1998_v3  ;;  %839 = vmatprep.mubr.bf16.mxu0 %v1999_v4 }
  0x65   :  { %1000 = vmatprep.mubr.bf16.mxu1 %v2001_v5 }
  0x6b   :  { %840 = vmatmul.mubr.bf16.gmra.mxu0 %v2003_v6 }
  0x6c   :  { %1001 = vmatmul.mubr.bf16.gmra.mxu1 %v2004_v7  ;;  %847 = vmatprep.mubr.bf16.mxu0 %v2005_v8 }
  0x6d   :  { %1008 = vmatprep.mubr.bf16.mxu1 %v2007_v9 }
  0x73   :  { %848 = vmatmul.mubr.bf16.gmra.mxu0 %v2009_v10 }
  0x74   :  { %1009 = vmatmul.mubr.bf16.gmra.mxu1 %v2010_v11  ;;  %855 = vmatprep.mubr.bf16.mxu0 %v2011_v12 }
  0x75   :  { %1016 = vmatprep.mubr.bf16.mxu1 %v2013_v13 }
  0x7b   :  { %856 = vmatmul.mubr.bf16.gmra.mxu0 %v2015_v14 }
  0x7c   :  { %1017 = vmatmul.mubr.bf16.gmra.mxu1 %v2016_v15  ;;  %863 = vmatprep.mubr.bf16.mxu0 %v2017_v16 }
  0x7d   :  { %1024 = vmatprep.mubr.bf16.mxu1 %v2019_v17 }
  0x83   :  { %864 = vmatmul.mubr.bf16.gmra.mxu0 %v2021_v18 }
  0x84   :  { %1025 = vmatmul.mubr.bf16.gmra.mxu1 %v2022_v19  ;;  %871 = vmatprep.mubr.bf16.mxu0 %v2023_v20 }
  0x85   :  { %1032 = vmatprep.mubr.bf16.mxu1 %v2025_v21 }
  0x8b   :  { %872 = vmatmul.mubr.bf16.gmra.mxu0 %v2027_v22 }
  0x8c   :  { %1033 = vmatmul.mubr.bf16.gmra.mxu1 %v2028_v23  ;;  %879 = vmatprep.mubr.bf16.mxu0 %v2029_v24 }
  0x8d   :  { %1040 = vmatprep.mubr.bf16.mxu1 %v2031_v25 }
  0x93   :  { %880 = vmatmul.mubr.bf16.gmra.mxu0 %v2033_v26 }
  0x94   :  { %1041 = vmatmul.mubr.bf16.gmra.mxu1 %v2034_v27  ;;  %887 = vmatprep.mubr.bf16.mxu0 %v2035_v28 }
  0x95   :  { %1048 = vmatprep.mubr.bf16.mxu1 %v2037_v29 }
  0x9b   :  { %888 = vmatmul.mubr.bf16.gmra.mxu0 %v2039_v30 }
  0x9c   :  { %1049 = vmatmul.mubr.bf16.gmra.mxu1 %v2040_v31 }
  0xe3   :  { %v1705_v32 = vpop.f32.mrf.mxu0 }
  0xe4   :  { %v1817_v33 = vpop.f32.mrf.mxu1 }
  0xe5   :  { %v1706_v34 = vpop.f32.mrf.mxu0 }
  0xe6   :  { %v1818_v35 = vpop.f32.mrf.mxu1  ;;  %v1707_v36 = vadd.f32 %v1706_v34, %v1705_v32 }
  0xe7   :  { %v1819_v37 = vadd.f32 %v1818_v35, %v1817_v33  ;;  %v1708_v38 = vpop.f32.mrf.mxu0 }
  0xe8   :  { %v1820_v39 = vpop.f32.mrf.mxu1 }
  0xe9   :  { %v1709_v40 = vpop.f32.mrf.mxu0  ;;  %v931_v43 = vadd.f32 %v1819_v37, %v1707_v36 }
  0xea   :  { %v1710_v41 = vadd.f32 %v1709_v40, %v1708_v38  ;;  %v1821_v42 = vpop.f32.mrf.mxu1 }
  0xeb   :  { %v1822_v44 = vadd.f32 %v1821_v42, %v1820_v39  ;;  %v1711_v45 = vpop.f32.mrf.mxu0  ;;  %v2360_v51 = vadd.f32 %v2357_v46, %v931_v43 }
  0xec   :  { %v1823_v47 = vpop.f32.mrf.mxu1 }
  0xed   :  { %v934_v48 = vadd.f32 %v1822_v44, %v1710_v41  ;;  %v1712_v49 = vpop.f32.mrf.mxu0 }
  0xee   :  { %v1824_v50 = vpop.f32.mrf.mxu1  ;;  %v1713_v53 = vadd.f32 %v1712_v49, %v1711_v45 }
  0xef   :  { %v2363_v52 = vadd.f32 %v2357_v46, %v934_v48  ;;  %v1825_v54 = vadd.f32 %v1824_v50, %v1823_v47  ;;  %v1714_v55 = vpop.f32.mrf.mxu0 }
  0xf0   :  { %v1826_v56 = vpop.f32.mrf.mxu1 }
  0xf1   :  { %v1597_v57 = vpack.c.bf16 %v2363_v52, %v2360_v51  ;;  %v1715_v58 = vpop.f32.mrf.mxu0  ;;  %v939_v61 = vadd.f32 %v1825_v54, %v1713_v53 }
  0xf2   :  { %v1716_v59 = vadd.f32 %v1715_v58, %v1714_v55  ;;  %v1827_v60 = vpop.f32.mrf.mxu1 }
  0xf3   :  { %1598 = vst [vmem:[%s2583_s3] sm:$0xff] %v1597_v57   ;;  %v1828_v62 = vadd.f32 %v1827_v60, %v1826_v56  ;;  %v1717_v63 = vpop.f32.mrf.mxu0  ;;  %v2371_v4 = vadd.f32 %v2357_v46, %v939_v61 }
  0xf4   :  { %v1829_v0 = vpop.f32.mrf.mxu1 }
  0xf5   :  { %v942_v1 = vadd.f32 %v1828_v62, %v1716_v59  ;;  %v1718_v2 = vpop.f32.mrf.mxu0 }
  0xf6   :  { %v1830_v3 = vpop.f32.mrf.mxu1  ;;  %v1719_v6 = vadd.f32 %v1718_v2, %v1717_v63 }
  0xf7   :  { %v2374_v5 = vadd.f32 %v2357_v46, %v942_v1  ;;  %v1831_v7 = vadd.f32 %v1830_v3, %v1829_v0  ;;  %v1720_v8 = vpop.f32.mrf.mxu0 }
  0xf8   :  { %v1832_v9 = vpop.f32.mrf.mxu1 }
  0xf9   :  { %v1602_v10 = vpack.c.bf16 %v2374_v5, %v2371_v4  ;;  %v1721_v11 = vpop.f32.mrf.mxu0  ;;  %v947_v14 = vadd.f32 %v1831_v7, %v1719_v6 }
  0xfa   :  { %v1722_v12 = vadd.f32 %v1721_v11, %v1720_v8  ;;  %v1833_v13 = vpop.f32.mrf.mxu1 }
  0xfb   :  { %1674 = vst [vmem:[%s2583_s3 + $0x8] sm:$0xff] %v1602_v10   ;;  %v1834_v15 = vadd.f32 %v1833_v13, %v1832_v9  ;;  %v1723_v16 = vpop.f32.mrf.mxu0  ;;  %v2382_v21 = vadd.f32 %v2357_v46, %v947_v14 }
  0xfc   :  { %v1835_v17 = vpop.f32.mrf.mxu1 }
  0xfd   :  { %v950_v18 = vadd.f32 %v1834_v15, %v1722_v12  ;;  %v1724_v19 = vpop.f32.mrf.mxu0 }
  0xfe   :  { %v1836_v20 = vpop.f32.mrf.mxu1  ;;  %v1725_v23 = vadd.f32 %v1724_v19, %v1723_v16 }
  0xff   :  { %v2385_v22 = vadd.f32 %v2357_v46, %v950_v18  ;;  %v1837_v24 = vadd.f32 %v1836_v20, %v1835_v17  ;;  %v1726_v25 = vpop.f32.mrf.mxu0 }
 0x100   :  { %v1838_v26 = vpop.f32.mrf.mxu1 }
 0x101   :  { %v1607_v27 = vpack.c.bf16 %v2385_v22, %v2382_v21  ;;  %v1727_v28 = vpop.f32.mrf.mxu0  ;;  %v955_v31 = vadd.f32 %v1837_v24, %v1725_v23 }
 0x102   :  { %v1728_v29 = vadd.f32 %v1727_v28, %v1726_v25  ;;  %v1839_v30 = vpop.f32.mrf.mxu1 }
 0x103   :  { %1675 = vst [vmem:[%s2583_s3 + $0x10] sm:$0xff] %v1607_v27   ;;  %v1840_v32 = vadd.f32 %v1839_v30, %v1838_v26  ;;  %v1729_v33 = vpop.f32.mrf.mxu0  ;;  %v2393_v38 = vadd.f32 %v2357_v46, %v955_v31 }
 0x104   :  { %v1841_v34 = vpop.f32.mrf.mxu1 }
 0x105   :  { %v958_v35 = vadd.f32 %v1840_v32, %v1728_v29  ;;  %v1730_v36 = vpop.f32.mrf.mxu0 }
 0x106   :  { %v1842_v37 = vpop.f32.mrf.mxu1  ;;  %v1731_v40 = vadd.f32 %v1730_v36, %v1729_v33 }
 0x107   :  { %v2396_v39 = vadd.f32 %v2357_v46, %v958_v35  ;;  %v1843_v41 = vadd.f32 %v1842_v37, %v1841_v34  ;;  %v1732_v42 = vpop.f32.mrf.mxu0 }
 0x108   :  { %v1844_v43 = vpop.f32.mrf.mxu1 }
 0x109   :  { %v1612_v44 = vpack.c.bf16 %v2396_v39, %v2393_v38  ;;  %v1733_v45 = vpop.f32.mrf.mxu0  ;;  %v963_v49 = vadd.f32 %v1843_v41, %v1731_v40 }
 0x10a   :  { %v1734_v47 = vadd.f32 %v1733_v45, %v1732_v42  ;;  %v1845_v48 = vpop.f32.mrf.mxu1 }
 0x10b   :  { %1676 = vst [vmem:[%s2583_s3 + $0x18] sm:$0xff] %v1612_v44   ;;  %v1846_v50 = vadd.f32 %v1845_v48, %v1844_v43  ;;  %v1735_v53 = vpop.f32.mrf.mxu0  ;;  %v2404_v58 = vadd.f32 %v2357_v46, %v963_v49 }
 0x10c   :  { %v1847_v54 = vpop.f32.mrf.mxu1 }
 0x10d   :  { %v966_v55 = vadd.f32 %v1846_v50, %v1734_v47  ;;  %v1736_v56 = vpop.f32.mrf.mxu0 }
 0x10e   :  { %v1848_v57 = vpop.f32.mrf.mxu1  ;;  %v1737_v60 = vadd.f32 %v1736_v56, %v1735_v53 }
 0x10f   :  { %v2407_v59 = vadd.f32 %v2357_v46, %v966_v55  ;;  %v1849_v61 = vadd.f32 %v1848_v57, %v1847_v54  ;;  %v1738_v62 = vpop.f32.mrf.mxu0 }
 0x110   :  { %v1850_v63 = vpop.f32.mrf.mxu1 }
 0x111   :  { %v1617_v0 = vpack.c.bf16 %v2407_v59, %v2404_v58  ;;  %v1739_v1 = vpop.f32.mrf.mxu0  ;;  %v971_v6 = vadd.f32 %v1849_v61, %v1737_v60 }
 0x112   :  { %v1740_v2 = vadd.f32 %v1739_v1, %v1738_v62  ;;  %v1851_v3 = vpop.f32.mrf.mxu1 }
 0x113   :  { %1677 = vst [vmem:[%s2583_s3 + $0x20] sm:$0xff] %v1617_v0   ;;  %v1852_v7 = vadd.f32 %v1851_v3, %v1850_v63  ;;  %v1741_v8 = vpop.f32.mrf.mxu0  ;;  %v2415_v13 = vadd.f32 %v2357_v46, %v971_v6  ;;  %v1194_v0 = vmul.f32 %v2363_v52, %v2363_v52 }
 0x114   :  { %v1853_v9 = vpop.f32.mrf.mxu1 }
 0x115   :  { %v974_v10 = vadd.f32 %v1852_v7, %v1740_v2  ;;  %v1742_v11 = vpop.f32.mrf.mxu0 }
 0x116   :  { %v1854_v12 = vpop.f32.mrf.mxu1  ;;  %v1743_v15 = vadd.f32 %v1742_v11, %v1741_v8  ;;  %v1193_v8 = vmul.f32 %v2360_v51, %v2360_v51 }
 0x117   :  { %v2418_v14 = vadd.f32 %v2357_v46, %v974_v10  ;;  %v1855_v16 = vadd.f32 %v1854_v12, %v1853_v9  ;;  %v1744_v17 = vpop.f32.mrf.mxu0  ;;  %v1156_v9 = vadd.f32 %v2363_v52, %v2360_v51  ;;  %v1195_v10 = vmul.f32 %v2371_v4, %v2371_v4 }
 0x118   :  { %v1856_v18 = vpop.f32.mrf.mxu1 }
 0x119   :  { %v1622_v19 = vpack.c.bf16 %v2418_v14, %v2415_v13  ;;  %v1745_v20 = vpop.f32.mrf.mxu0  ;;  %v979_v25 = vadd.f32 %v1855_v16, %v1743_v15  ;;  %v1225_v16 = vadd.f32 %v1194_v0, %v1193_v8 }
 0x11a   :  { %v1746_v23 = vadd.f32 %v1745_v20, %v1744_v17  ;;  %v1857_v24 = vpop.f32.mrf.mxu1  ;;  %v1157_v17 = vadd.f32 %v1156_v9, %v2371_v4 }
 0x11b   :  { %1678 = vst [vmem:[%s2583_s3 + $0x28] sm:$0xff] %v1622_v19   ;;  %v1858_v26 = vadd.f32 %v1857_v24, %v1856_v18  ;;  %v1747_v27 = vpop.f32.mrf.mxu0  ;;  %v2426_v32 = vadd.f32 %v2357_v46, %v979_v25  ;;  %v1196_v18 = vmul.f32 %v2374_v5, %v2374_v5  ;;  %v1226_v25 = vadd.f32 %v1225_v16, %v1195_v10 }
 0x11c   :  { %v1859_v28 = vpop.f32.mrf.mxu1 }
 0x11d   :  { %v982_v29 = vadd.f32 %v1858_v26, %v1746_v23  ;;  %v1748_v30 = vpop.f32.mrf.mxu0  ;;  %v1158_v26 = vadd.f32 %v1157_v17, %v2374_v5 }
 0x11e   :  { %v1860_v31 = vpop.f32.mrf.mxu1  ;;  %v1749_v34 = vadd.f32 %v1748_v30, %v1747_v27  ;;  %v1197_v27 = vmul.f32 %v2382_v21, %v2382_v21  ;;  %v1227_v30 = vadd.f32 %v1226_v25, %v1196_v18 }
 0x11f   :  { %v2429_v33 = vadd.f32 %v2357_v46, %v982_v29  ;;  %v1861_v35 = vadd.f32 %v1860_v31, %v1859_v28  ;;  %v1750_v36 = vpop.f32.mrf.mxu0  ;;  %v1159_v31 = vadd.f32 %v1158_v26, %v2382_v21 }
 0x120   :  { %v1862_v37 = vpop.f32.mrf.mxu1 }
 0x121   :  { %v1627_v40 = vpack.c.bf16 %v2429_v33, %v2426_v32  ;;  %v1751_v41 = vpop.f32.mrf.mxu0  ;;  %v987_v44 = vadd.f32 %v1861_v35, %v1749_v34  ;;  %v1198_v34 = vmul.f32 %v2385_v22, %v2385_v22 }
 0x122   :  { %v1752_v42 = vadd.f32 %v1751_v41, %v1750_v36  ;;  %v1863_v43 = vpop.f32.mrf.mxu1  ;;  %v1228_v41 = vadd.f32 %v1227_v30, %v1197_v27 }
 0x123   :  { %1679 = vst [vmem:[%s2583_s3 + $0x30] sm:$0xff] %v1627_v40   ;;  %v1864_v45 = vadd.f32 %v1863_v43, %v1862_v37  ;;  %v1753_v47 = vpop.f32.mrf.mxu0  ;;  %v2437_v54 = vadd.f32 %v2357_v46, %v987_v44  ;;  %v1199_v43 = vmul.f32 %v2393_v38, %v2393_v38 }
 0x124   :  { %v1865_v48 = vpop.f32.mrf.mxu1 }
 0x125   :  { %v990_v49 = vadd.f32 %v1864_v45, %v1752_v42  ;;  %v1754_v50 = vpop.f32.mrf.mxu0  ;;  %v1160_v42 = vadd.f32 %v1159_v31, %v2385_v22 }
 0x126   :  { %v1866_v53 = vpop.f32.mrf.mxu1  ;;  %v1755_v56 = vadd.f32 %v1754_v50, %v1753_v47  ;;  %v1229_v47 = vadd.f32 %v1228_v41, %v1198_v34 }
 0x127   :  { %v2440_v55 = vadd.f32 %v2357_v46, %v990_v49  ;;  %v1867_v57 = vadd.f32 %v1866_v53, %v1865_v48  ;;  %v1756_v60 = vpop.f32.mrf.mxu0  ;;  %v1161_v48 = vadd.f32 %v1160_v42, %v2393_v38  ;;  %v1200_v49 = vmul.f32 %v2396_v39, %v2396_v39 }
 0x128   :  { %v1868_v61 = vpop.f32.mrf.mxu1 }
 0x129   :  { %v1632_v62 = vpack.c.bf16 %v2440_v55, %v2437_v54  ;;  %v1757_v63 = vpop.f32.mrf.mxu0  ;;  %v995_v3 = vadd.f32 %v1867_v57, %v1755_v56 }
 0x12a   :  { %v1758_v1 = vadd.f32 %v1757_v63, %v1756_v60  ;;  %v1869_v2 = vpop.f32.mrf.mxu1  ;;  %v1201_v63 = vmul.f32 %v2404_v58, %v2404_v58 }
 0x12b   :  { %1680 = vst [vmem:[%s2583_s3 + $0x38] sm:$0xff] %v1632_v62   ;;  %v1870_v6 = vadd.f32 %v1869_v2, %v1868_v61  ;;  %v1759_v7 = vpop.f32.mrf.mxu0  ;;  %v2459_v20 = vadd.f32 %v2357_v46, %v995_v3  ;;  %v1230_v61 = vadd.f32 %v1229_v47, %v1199_v43  ;;  %v1162_v62 = vadd.f32 %v1161_v48, %v2396_v39 }
 0x12c   :  { %v1871_v11 = vpop.f32.mrf.mxu1 }
 0x12d   :  { %v998_v12 = vadd.f32 %v1870_v6, %v1758_v1  ;;  %v1760_v15 = vpop.f32.mrf.mxu0  ;;  %v1231_v2 = vadd.f32 %v1230_v61, %v1200_v49  ;;  %v1163_v3 = vadd.f32 %v1162_v62, %v2404_v58  ;;  %v1202_v6 = vmul.f32 %v2407_v59, %v2407_v59 }
 0x12e   :  { %v1872_v19 = vpop.f32.mrf.mxu1  ;;  %v1761_v51 = vadd.f32 %v1760_v15, %v1759_v7  ;;  %v1203_v15 = vmul.f32 %v2415_v13, %v2415_v13  ;;  %v1208_v49 = vmul.f32 %v2440_v55, %v2440_v55 }
 0x12f   :  { %v2462_v23 = vadd.f32 %v2357_v46, %v998_v12  ;;  %v1873_v52 = vadd.f32 %v1872_v19, %v1871_v11  ;;  %v1762_v24 = vpop.f32.mrf.mxu0  ;;  %v1232_v11 = vadd.f32 %v1231_v2, %v1201_v63  ;;  %v1164_v12 = vadd.f32 %v1163_v3, %v2407_v59 }
 0x130   :  { %v1874_v4 = vpop.f32.mrf.mxu1 }
 0x131   :  { %v1637_v28 = vpack.c.bf16 %v2462_v23, %v2459_v20  ;;  %v1763_v29 = vpop.f32.mrf.mxu0  ;;  %v1003_v5 = vadd.f32 %v1873_v52, %v1761_v51  ;;  %v1233_v18 = vadd.f32 %v1232_v11, %v1202_v6  ;;  %v1165_v19 = vadd.f32 %v1164_v12, %v2415_v13 }
 0x132   :  { %v1764_v35 = vadd.f32 %v1763_v29, %v1762_v24  ;;  %v1875_v36 = vpop.f32.mrf.mxu1  ;;  %v1204_v51 = vmul.f32 %v2418_v14, %v2418_v14  ;;  %v1205_v29 = vmul.f32 %v2426_v32, %v2426_v32  ;;  %v1210_v6 = vmul.f32 %v2462_v23, %v2462_v23 }
 0x133   :  { %1681 = vst [vmem:[%s2583_s3 + $0x40] sm:$0xff] %v1637_v28   ;;  %v1876_v37 = vadd.f32 %v1875_v36, %v1874_v4  ;;  %v1765_v40 = vpop.f32.mrf.mxu0  ;;  %v2482_v53 = vadd.f32 %v2357_v46, %v1003_v5  ;;  %v1234_v4 = vadd.f32 %v1233_v18, %v1203_v15  ;;  %v1166_v28 = vadd.f32 %v1165_v19, %v2418_v14 }
 0x134   :  { %v1877_v44 = vpop.f32.mrf.mxu1  ;;  %v1206_v36 = vmul.f32 %v2429_v33, %v2429_v33 }
 0x135   :  { %v1006_v21 = vadd.f32 %v1876_v37, %v1764_v35  ;;  %v1766_v45 = vpop.f32.mrf.mxu0  ;;  %v1235_v34 = vadd.f32 %v1234_v4, %v1204_v51  ;;  %v1167_v35 = vadd.f32 %v1166_v28, %v2426_v32  ;;  %v1211_v12 = vmul.f32 %v2482_v53, %v2482_v53 }
 0x136   :  { %v1878_v50 = vpop.f32.mrf.mxu1  ;;  %v1767_v22 = vadd.f32 %v1766_v45, %v1765_v40 }
 0x137   :  { %v2485_v56 = vadd.f32 %v2357_v46, %v1006_v21  ;;  %v1879_v57 = vadd.f32 %v1878_v50, %v1877_v44  ;;  %v1768_v60 = vpop.f32.mrf.mxu0  ;;  %v1236_v42 = vadd.f32 %v1235_v34, %v1205_v29  ;;  %v1168_v43 = vadd.f32 %v1167_v35, %v2429_v33 }
 0x138   :  { %v1880_v38 = vpop.f32.mrf.mxu1  ;;  %v1207_v44 = vmul.f32 %v2437_v54, %v2437_v54 }
 0x139   :  { %v1642_v0 = vpack.c.bf16 %v2485_v56, %v2482_v53  ;;  %v1769_v1 = vpop.f32.mrf.mxu0  ;;  %v1011_v39 = vadd.f32 %v1879_v57, %v1767_v22  ;;  %v1237_v47 = vadd.f32 %v1236_v42, %v1206_v36  ;;  %v1169_v48 = vadd.f32 %v1168_v43, %v2437_v54 }
 0x13a   :  { %v1770_v7 = vadd.f32 %v1769_v1, %v1768_v60  ;;  %v1881_v8 = vpop.f32.mrf.mxu1  ;;  %v1212_v18 = vmul.f32 %v2485_v56, %v2485_v56 }
 0x13b   :  { %1682 = vst [vmem:[%s2583_s3 + $0x48] sm:$0xff] %v1642_v0   ;;  %v1882_v9 = vadd.f32 %v1881_v8, %v1880_v38  ;;  %v1771_v10 = vpop.f32.mrf.mxu0  ;;  %v2505_v24 = vadd.f32 %v2357_v46, %v1011_v39  ;;  %v1238_v62 = vadd.f32 %v1237_v47, %v1207_v44  ;;  %v1170_v63 = vadd.f32 %v1169_v48, %v2440_v55 }
 0x13c   :  { %v1883_v16 = vpop.f32.mrf.mxu1  ;;  %v1209_v38 = vmul.f32 %v2459_v20, %v2459_v20 }
 0x13d   :  { %v1014_v58 = vadd.f32 %v1882_v9, %v1770_v7  ;;  %v1772_v17 = vpop.f32.mrf.mxu0  ;;  %v1239_v2 = vadd.f32 %v1238_v62, %v1208_v49  ;;  %v1171_v3 = vadd.f32 %v1170_v63, %v2459_v20  ;;  %v1213_v4 = vmul.f32 %v2505_v24, %v2505_v24 }
 0x13e   :  { %v1884_v52 = vpop.f32.mrf.mxu1  ;;  %v1773_v59 = vadd.f32 %v1772_v17, %v1771_v10 }
 0x13f   :  { %v2508_v25 = vadd.f32 %v2357_v46, %v1014_v58  ;;  %v1885_v26 = vadd.f32 %v1884_v52, %v1883_v16  ;;  %v1774_v27 = vpop.f32.mrf.mxu0  ;;  %v1240_v10 = vadd.f32 %v1239_v2, %v1209_v38  ;;  %v1172_v11 = vadd.f32 %v1171_v3, %v2462_v23 }
 0x140   :  { %v1886_v13 = vpop.f32.mrf.mxu1 }
 0x141   :  { %v1647_v30 = vpack.c.bf16 %v2508_v25, %v2505_v24  ;;  %v1775_v31 = vpop.f32.mrf.mxu0  ;;  %v1019_v14 = vadd.f32 %v1885_v26, %v1773_v59  ;;  %v1241_v58 = vadd.f32 %v1240_v10, %v1210_v6  ;;  %v1173_v17 = vadd.f32 %v1172_v11, %v2482_v53 }
 0x142   :  { %v1776_v5 = vadd.f32 %v1775_v31, %v1774_v27  ;;  %v1887_v37 = vpop.f32.mrf.mxu1  ;;  %v1214_v31 = vmul.f32 %v2508_v25, %v2508_v25 }
 0x143   :  { %1683 = vst [vmem:[%s2583_s3 + $0x50] sm:$0xff] %v1647_v30   ;;  %v1888_v40 = vadd.f32 %v1887_v37, %v1886_v13  ;;  %v1777_v41 = vpop.f32.mrf.mxu0  ;;  %v1079_v22 = vadd.f32 %v2357_v46, %v1019_v14  ;;  %v1242_v27 = vadd.f32 %v1241_v58, %v1211_v12  ;;  %v1174_v29 = vadd.f32 %v1173_v17, %v2485_v56 }
 0x144   :  { %v1889_v21 = vpop.f32.mrf.mxu1 }
 0x145   :  { %v1022_v32 = vadd.f32 %v1888_v40, %v1776_v5  ;;  %v1778_v45 = vpop.f32.mrf.mxu0  ;;  %v1243_v30 = vadd.f32 %v1242_v27, %v1212_v18  ;;  %v1175_v36 = vadd.f32 %v1174_v29, %v2505_v24 }
 0x146   :  { %v1890_v50 = vpop.f32.mrf.mxu1  ;;  %v1779_v60 = vadd.f32 %v1778_v45, %v1777_v41  ;;  %v1215_v41 = vmul.f32 %v1079_v22, %v1079_v22 }
 0x147   :  { %v2529_v57 = vadd.f32 %v2357_v46, %v1022_v32  ;;  %v1891_v33 = vadd.f32 %v1890_v50, %v1889_v21  ;;  %v1780_v61 = vpop.f32.mrf.mxu0  ;;  %v1244_v40 = vadd.f32 %v1243_v30, %v1213_v4  ;;  %v1176_v42 = vadd.f32 %v1175_v36, %v2508_v25 }
 0x148   :  { %v1892_v0 = vpop.f32.mrf.mxu1 }
 0x149   :  { %v1652_v54 = vpack.c.bf16 %v2529_v57, %v1079_v22  ;;  %v1781_v1 = vpop.f32.mrf.mxu0  ;;  %v1027_v55 = vadd.f32 %v1891_v33, %v1779_v60  ;;  %v1245_v21 = vadd.f32 %v1244_v40, %v1214_v31  ;;  %v1216_v32 = vmul.f32 %v2529_v57, %v2529_v57 }
 0x14a   :  { %v1782_v7 = vadd.f32 %v1781_v1, %v1780_v61  ;;  %v1893_v8 = vpop.f32.mrf.mxu1  ;;  %v1177_v47 = vadd.f32 %v1176_v42, %v1079_v22 }
 0x14b   :  { %1684 = vst [vmem:[%s2583_s3 + $0x58] sm:$0xff] %v1652_v54   ;;  %v1894_v39 = vadd.f32 %v1893_v8, %v1892_v0  ;;  %v1783_v9 = vpop.f32.mrf.mxu0  ;;  %v1081_v51 = vadd.f32 %v2357_v46, %v1027_v55  ;;  %v1246_v33 = vadd.f32 %v1245_v21, %v1215_v41 }
 0x14c   :  { %v1895_v15 = vpop.f32.mrf.mxu1  ;;  %v1178_v25 = vadd.f32 %v1177_v47, %v2529_v57 }
 0x14d   :  { %v1030_v20 = vadd.f32 %v1894_v39, %v1782_v7  ;;  %v1784_v16 = vpop.f32.mrf.mxu0  ;;  %v1217_v61 = vmul.f32 %v1081_v51, %v1081_v51  ;;  %v1247_v54 = vadd.f32 %v1246_v33, %v1216_v32 }
 0x14e   :  { %v1896_v19 = vpop.f32.mrf.mxu1  ;;  %v1785_v59 = vadd.f32 %v1784_v16, %v1783_v9  ;;  %v1179_v6 = vadd.f32 %v1178_v25, %v1081_v51 }
 0x14f   :  { %v1082_v52 = vadd.f32 %v2357_v46, %v1030_v20  ;;  %v1897_v26 = vadd.f32 %v1896_v19, %v1895_v15  ;;  %v1786_v23 = vpop.f32.mrf.mxu0  ;;  %v1248_v8 = vadd.f32 %v1247_v54, %v1217_v61 }
 0x150   :  { %v1898_v28 = vpop.f32.mrf.mxu1 }
 0x151   :  { %v1657_v13 = vpack.c.bf16 %v1082_v52, %v1081_v51  ;;  %v1787_v53 = vpop.f32.mrf.mxu0  ;;  %v1035_v5 = vadd.f32 %v1897_v26, %v1785_v59  ;;  %v1218_v1 = vmul.f32 %v1082_v52, %v1082_v52  ;;  %v1180_v9 = vadd.f32 %v1179_v6, %v1082_v52 }
 0x152   :  { %v1788_v34 = vadd.f32 %v1787_v53, %v1786_v23  ;;  %v1899_v35 = vpop.f32.mrf.mxu1 }
 0x153   :  { %1685 = vst [vmem:[%s2583_s3 + $0x60] sm:$0xff] %v1657_v13   ;;  %v1900_v37 = vadd.f32 %v1899_v35, %v1898_v28  ;;  %v1789_v14 = vpop.f32.mrf.mxu0  ;;  %v1083_v48 = vadd.f32 %v2357_v46, %v1035_v5  ;;  %v1249_v12 = vadd.f32 %v1248_v8, %v1218_v1 }
 0x154   :  { %v1901_v56 = vpop.f32.mrf.mxu1 }
 0x155   :  { %v1038_v43 = vadd.f32 %v1900_v37, %v1788_v34  ;;  %v1790_v44 = vpop.f32.mrf.mxu0  ;;  %v1219_v55 = vmul.f32 %v1083_v48, %v1083_v48  ;;  %v1181_v58 = vadd.f32 %v1180_v9, %v1083_v48 }
 0x156   :  { %v1791_v45 = vadd.f32 %v1790_v44, %v1789_v14  ;;  %v1902_v24 = vpop.f32.mrf.mxu1 }
 0x157   :  { %v1084_v49 = vadd.f32 %v2357_v46, %v1038_v43  ;;  %v1903_v50 = vadd.f32 %v1902_v24, %v1901_v56  ;;  %v1792_v60 = vpop.f32.mrf.mxu0  ;;  %v1250_v51 = vadd.f32 %v1249_v12, %v1219_v55 }
 0x158   :  { %v1904_v62 = vpop.f32.mrf.mxu1 }
 0x159   :  { %v1662_v63 = vpack.c.bf16 %v1084_v49, %v1083_v48  ;;  %v1043_v38 = vadd.f32 %v1903_v50, %v1791_v45  ;;  %v1793_v0 = vpop.f32.mrf.mxu0  ;;  %v1220_v15 = vmul.f32 %v1084_v49, %v1084_v49  ;;  %v1182_v26 = vadd.f32 %v1181_v58, %v1084_v49 }
 0x15a   :  { %v1794_v2 = vadd.f32 %v1793_v0, %v1792_v60  ;;  %v1905_v3 = vpop.f32.mrf.mxu1 }
 0x15b   :  { %1686 = vst [vmem:[%s2583_s3 + $0x68] sm:$0xff] %v1662_v63   ;;  %v1906_v22 = vadd.f32 %v1905_v3, %v1904_v62  ;;  %v1795_v7 = vpop.f32.mrf.mxu0  ;;  %v1085_v57 = vadd.f32 %v2357_v46, %v1043_v38  ;;  %v1251_v28 = vadd.f32 %v1250_v51, %v1220_v15 }
 0x15c   :  { %v1907_v39 = vpop.f32.mrf.mxu1 }
 0x15d   :  { %v1046_v10 = vadd.f32 %v1906_v22, %v1794_v2  ;;  %v1796_v11 = vpop.f32.mrf.mxu0  ;;  %v1221_v23 = vmul.f32 %v1085_v57, %v1085_v57  ;;  %v1183_v53 = vadd.f32 %v1182_v26, %v1085_v57 }
 0x15e   :  { %v1797_v20 = vadd.f32 %v1796_v11, %v1795_v7  ;;  %v1908_v16 = vpop.f32.mrf.mxu1 }
 0x15f   :  { %v1086_v17 = vadd.f32 %v2357_v46, %v1046_v10  ;;  %v1909_v18 = vadd.f32 %v1908_v16, %v1907_v39  ;;  %v1798_v19 = vpop.f32.mrf.mxu0  ;;  %v1252_v35 = vadd.f32 %v1251_v28, %v1221_v23 }
 0x160   :  { %v1910_v59 = vpop.f32.mrf.mxu1 }
 0x161   :  { %v1667_v27 = vpack.c.bf16 %v1086_v17, %v1085_v57  ;;  %v1051_v4 = vadd.f32 %v1909_v18, %v1797_v20  ;;  %v1799_v52 = vpop.f32.mrf.mxu0  ;;  %v1222_v30 = vmul.f32 %v1086_v17, %v1086_v17  ;;  %v1184_v36 = vadd.f32 %v1183_v53, %v1086_v17 }
 0x162   :  { %v1800_v29 = vadd.f32 %v1799_v52, %v1798_v19  ;;  %v1911_v13 = vpop.f32.mrf.mxu1 }
 0x163   :  { %1687 = vst [vmem:[%s2583_s3 + $0x70] sm:$0xff] %v1667_v27   ;;  %v1087_v31 = vadd.f32 %v2357_v46, %v1051_v4  ;;  %v1912_v34 = vadd.f32 %v1911_v13, %v1910_v59  ;;  %v1253_v14 = vadd.f32 %v1252_v35, %v1222_v30 }
 0x165   :  { %v1223_v5 = vmul.f32 %v1087_v31, %v1087_v31  ;;  %v1054_v37 = vadd.f32 %v1912_v34, %v1800_v29  ;;  %v1185_v40 = vadd.f32 %v1184_v36, %v1087_v31 }
 0x167   :  { %v1088_v41 = vadd.f32 %v2357_v46, %v1054_v37  ;;  %v1254_v56 = vadd.f32 %v1253_v14, %v1223_v5 }
 0x169   :  { %v1186_v42 = vadd.f32 %v1185_v40, %v1088_v41  ;;  %v1224_v43 = vmul.f32 %v1088_v41, %v1088_v41  ;;  %v1672_v44 = vpack.c.bf16 %v1088_v41, %v1087_v31 }
 0x16b   :  { %v1187_v21 = vrot.slane %v1186_v42, 4  ;;  %v1255_v32 = vadd.f32 %v1254_v56, %v1224_v43  ;;  %1688 = vst [vmem:[%s2583_s3 + $0x78] sm:$0xff] %v1672_v44  }
 0x16d   :  { %v1188_v45 = vadd.f32 %v1187_v21, %v1186_v42  ;;  %v1256_v24 = vrot.slane %v1255_v32, 4 }
 0x16f   :  { %v1189_v47 = vrot.slane %v1188_v45, 2  ;;  %v1257_v48 = vadd.f32 %v1256_v24, %v1255_v32 }
 0x171   :  { %v1190_v49 = vadd.f32 %v1189_v47, %v1188_v45  ;;  %v1258_v50 = vrot.slane %v1257_v48, 2 }
 0x173   :  { %v1191_v60 = vrot.slane %v1190_v49, 1  ;;  %v1259_v33 = vadd.f32 %v1258_v50, %v1257_v48 }
 0x175   :  { %v1260_v61 = vrot.slane %v1259_v33, 1  ;;  %v1192_v46 = vadd.f32 %v1191_v60, %v1190_v49 }
 0x177   :  { %v1261_v62 = vadd.f32 %v1260_v61, %v1259_v33 }
 0x179   :  { %v1263_v25 = vsel %vm1262_vm0, %v1192_v46, %v1261_v62 }
 0x17a   :  { %1264 = vst [vmem:[%s2584_s4] sm:$0x3] %v1263_v25 }

// kernel: _lambda_.9
= control target key start
LH: loop header
LB: loop body
LE: loop exit
PB: predicated region body
PF: predicated region fallthrough
CT: control target
= control target key end

     0   :  { %s3682_s1 = inlined_call_operand.vmem [shape: bf16[1,1024,128], index: 1, kind: input, shape index: {}]   ;;  %s3683_s0 = inlined_call_operand.vmem [shape: bf16[256,1024], index: 0, kind: input, shape index: {}]   ;;  %s3684_s2 = inlined_call_operand.vmem [shape: f32[1,128], index: 2, kind: input, shape index: {}]   ;;  %s3685_s3 = inlined_call_operand.vmem [shape: f32[256,128], index: 3, kind: output, shape index: {}]  }
   0x1   :  { %v2793_v0 = vld [vmem:[%s3682_s1 + $0x78] sm:$0xff]   ;;  %v2797_v4 = vld [vmem:[%s3682_s1 + $0x70] sm:$0xff]   ;;  %v2801_v8 = vld [vmem:[%s3682_s1 + $0x68] sm:$0xff]  }
   0x2   :  { %v2794_v1 = vld [vmem:[%s3682_s1 + $0xf8] sm:$0xff]   ;;  %2345 = vmatprep.subr.bf16.mxu0 %v2793_v0  ;;  %v2798_v5 = vld [vmem:[%s3682_s1 + $0xf0] sm:$0xff]   ;;  %v2802_v9 = vld [vmem:[%s3682_s1 + $0xe8] sm:$0xff]  }
   0x3   :  { %v2795_v2 = vld [vmem:[%s3682_s1 + $0x38] sm:$0xff]   ;;  %2457 = vmatprep.subr.bf16.mxu1 %v2794_v1  ;;  %v2799_v6 = vld [vmem:[%s3682_s1 + $0x30] sm:$0xff]   ;;  %v2803_v10 = vld [vmem:[%s3682_s1 + $0x28] sm:$0xff]  }
   0x4   :  { %v2796_v3 = vld [vmem:[%s3682_s1 + $0xb8] sm:$0xff]   ;;  %2346 = vmatpush3.bf16.msra.mxu0 %v2795_v2  ;;  %v2800_v7 = vld [vmem:[%s3682_s1 + $0xb0] sm:$0xff]   ;;  %v2804_v11 = vld [vmem:[%s3682_s1 + $0xa8] sm:$0xff]  }
   0x5   :  { %2458 = vmatpush3.bf16.msra.mxu1 %v2796_v3  ;;  %2347 = vmatprep.subr.bf16.mxu0 %v2797_v4  ;;  %v2805_v12 = vld [vmem:[%s3682_s1 + $0x60] sm:$0xff]   ;;  %v2809_v16 = vld [vmem:[%s3682_s1 + $0x58] sm:$0xff]   ;;  %v2813_v20 = vld [vmem:[%s3682_s1 + $0x50] sm:$0xff]  }
   0x6   :  { %2459 = vmatprep.subr.bf16.mxu1 %v2798_v5  ;;  %v2806_v13 = vld [vmem:[%s3682_s1 + $0xe0] sm:$0xff]   ;;  %v2810_v17 = vld [vmem:[%s3682_s1 + $0xd8] sm:$0xff]   ;;  %v2814_v21 = vld [vmem:[%s3682_s1 + $0xd0] sm:$0xff]  }
   0x7   :  { %v2807_v14 = vld [vmem:[%s3682_s1 + $0x20] sm:$0xff]   ;;  %v2811_v18 = vld [vmem:[%s3682_s1 + $0x18] sm:$0xff]   ;;  %v2815_v22 = vld [vmem:[%s3682_s1 + $0x10] sm:$0xff]  }
   0x8   :  { %2348 = vmatpush3.bf16.msra.mxu0 %v2799_v6  ;;  %v2808_v15 = vld [vmem:[%s3682_s1 + $0xa0] sm:$0xff]   ;;  %v2812_v19 = vld [vmem:[%s3682_s1 + $0x98] sm:$0xff]   ;;  %v2816_v23 = vld [vmem:[%s3682_s1 + $0x90] sm:$0xff]  }
   0x9   :  { %2460 = vmatpush3.bf16.msra.mxu1 %v2800_v7  ;;  %2349 = vmatprep.subr.bf16.mxu0 %v2801_v8  ;;  %v2817_v24 = vld [vmem:[%s3682_s1 + $0x48] sm:$0xff]   ;;  %v2821_v28 = vld [vmem:[%s3682_s1 + $0x40] sm:$0xff]   ;;  %v2825_v40 = vld [vmem:[%s3682_s1 + $0x178] sm:$0xff]  }
   0xa   :  { %2461 = vmatprep.subr.bf16.mxu1 %v2802_v9  ;;  %v2818_v25 = vld [vmem:[%s3682_s1 + $0xc8] sm:$0xff]   ;;  %v2822_v29 = vld [vmem:[%s3682_s1 + $0xc0] sm:$0xff]   ;;  %v2826_v41 = vld [vmem:[%s3682_s1 + $0x138] sm:$0xff]  }
   0xb   :  { %v2819_v26 = vld [vmem:[%s3682_s1 + $0x8] sm:$0xff]   ;;  %v2823_v30 = vld [vmem:[%s3682_s1] sm:$0xff]   ;;  %v2827_v42 = vld [vmem:[%s3682_s1 + $0x1f8] sm:$0xff]  }
   0xc   :  { %2350 = vmatpush3.bf16.msra.mxu0 %v2803_v10  ;;  %v2820_v27 = vld [vmem:[%s3682_s1 + $0x88] sm:$0xff]   ;;  %v2824_v31 = vld [vmem:[%s3682_s1 + $0x80] sm:$0xff]   ;;  %v2828_v43 = vld [vmem:[%s3682_s1 + $0x1b8] sm:$0xff]  }
   0xd   :  { %2462 = vmatpush3.bf16.msra.mxu1 %v2804_v11  ;;  %2351 = vmatprep.subr.bf16.mxu0 %v2805_v12  ;;  %v90_v32 = vld [vmem:[%s3683_s0] sm:$0xff]  ;;  %v91_v34 = vld [vmem:[%s3683_s0 + $0x8] sm:$0xff]  ;;  %v2829_v55 = vld [vmem:[%s3682_s1 + $0x170] sm:$0xff]  }
   0xe   :  { %2463 = vmatprep.subr.bf16.mxu1 %v2806_v13  ;;  %v94_v33 = vld [vmem:[%s3683_s0 + $0x20] sm:$0xff]  ;;  %v95_v37 = vld [vmem:[%s3683_s0 + $0x28] sm:$0xff]  ;;  %v2830_v58 = vld [vmem:[%s3682_s1 + $0x130] sm:$0xff]  }
   0xf   :  { %v2153_v35 = vcombine.low %v90_v32, %v94_v33  ;;  %v2154_v36 = vcombine.high %v90_v32, %v94_v33  ;;  %v2155_v38 = vcombine.low %v91_v34, %v95_v37  ;;  %v2156_v39 = vcombine.high %v91_v34, %v95_v37  ;;  %v98_v44 = vld [vmem:[%s3683_s0 + $0x40] sm:$0xff]  ;;  %v99_v47 = vld [vmem:[%s3683_s0 + $0x48] sm:$0xff]  ;;  %v2831_v60 = vld [vmem:[%s3682_s1 + $0x1f0] sm:$0xff]  }
  0x10   :  { %2352 = vmatpush3.bf16.msra.mxu0 %v2807_v14  ;;  %v102_v45 = vld [vmem:[%s3683_s0 + $0x60] sm:$0xff]  ;;  %v103_v48 = vld [vmem:[%s3683_s0 + $0x68] sm:$0xff]  ;;  %v2832_v61 = vld [vmem:[%s3682_s1 + $0x1b0] sm:$0xff]  }
  0x11   :  { %2464 = vmatpush3.bf16.msra.mxu1 %v2808_v15  ;;  %2353 = vmatprep.subr.bf16.mxu0 %v2809_v16  ;;  %v2162_v46 = vcombine.high %v98_v44, %v102_v45  ;;  %v106_v49 = vld [vmem:[%s3683_s0 + $0x80] sm:$0xff]  ;;  %v2164_v50 = vcombine.high %v99_v47, %v103_v48  ;;  %v107_v52 = vld [vmem:[%s3683_s0 + $0x88] sm:$0xff]  ;;  %v2161_v54 = vcombine.low %v98_v44, %v102_v45  ;;  %v2845_v34 = vld [vmem:[%s3682_s1 + $0x150] sm:$0xff]  }
  0x12   :  { %2465 = vmatprep.subr.bf16.mxu1 %v2810_v17  ;;  %1405 = vmatprep.mubr.bf16.mxu0 %v2154_v36  ;;  %v110_v51 = vld [vmem:[%s3683_s0 + $0xa0] sm:$0xff]  ;;  %v111_v53 = vld [vmem:[%s3683_s0 + $0xa8] sm:$0xff]  ;;  %v2163_v56 = vcombine.low %v99_v47, %v103_v48  ;;  %v2846_v36 = vld [vmem:[%s3682_s1 + $0x110] sm:$0xff]  }
  0x13   :  { %1566 = vmatprep.mubr.bf16.mxu1 %v2156_v39  ;;  %v2170_v57 = vcombine.high %v106_v49, %v110_v51  ;;  %v2172_v59 = vcombine.high %v107_v52, %v111_v53  ;;  %v114_v62 = vld [vmem:[%s3683_s0 + $0xc0] sm:$0xff]  ;;  %v115_v0 = vld [vmem:[%s3683_s0 + $0xc8] sm:$0xff]  ;;  %v2169_v3 = vcombine.low %v106_v49, %v110_v51  ;;  %v2171_v5 = vcombine.low %v107_v52, %v111_v53  ;;  %v2847_v37 = vld [vmem:[%s3682_s1 + $0x1d0] sm:$0xff]  }
  0x14   :  { %2354 = vmatpush3.bf16.msra.mxu0 %v2811_v18  ;;  %v118_v63 = vld [vmem:[%s3683_s0 + $0xe0] sm:$0xff]  ;;  %v119_v1 = vld [vmem:[%s3683_s0 + $0xe8] sm:$0xff]  ;;  %v2848_v39 = vld [vmem:[%s3682_s1 + $0x190] sm:$0xff]  }
  0x15   :  { %2466 = vmatpush3.bf16.msra.mxu1 %v2812_v19  ;;  %2355 = vmatprep.subr.bf16.mxu0 %v2813_v20  ;;  %v2833_v2 = vld [vmem:[%s3682_s1 + $0x168] sm:$0xff]   ;;  %v2178_v6 = vcombine.high %v114_v62, %v118_v63  ;;  %v2180_v8 = vcombine.high %v115_v0, %v119_v1  ;;  %v122_v10 = vld [vmem:[%s3683_s0 + $0x100] sm:$0xff]  ;;  %v2177_v16 = vcombine.low %v114_v62, %v118_v63 }
  0x16   :  { %2467 = vmatprep.subr.bf16.mxu1 %v2814_v21  ;;  %v2834_v4 = vld [vmem:[%s3682_s1 + $0x128] sm:$0xff]   ;;  %v126_v11 = vld [vmem:[%s3683_s0 + $0x120] sm:$0xff]  ;;  %v2179_v18 = vcombine.low %v115_v0, %v119_v1 }
  0x17   :  { %v2835_v7 = vld [vmem:[%s3682_s1 + $0x1e8] sm:$0xff]   ;;  %v2837_v14 = vld [vmem:[%s3682_s1 + $0x160] sm:$0xff]   ;;  %v2186_v19 = vcombine.high %v122_v10, %v126_v11 }
  0x18   :  { %2356 = vmatpush3.bf16.msra.mxu0 %v2815_v22  ;;  %v2836_v9 = vld [vmem:[%s3682_s1 + $0x1a8] sm:$0xff]   ;;  %v2838_v15 = vld [vmem:[%s3682_s1 + $0x120] sm:$0xff]  }
  0x19   :  { %2468 = vmatpush3.bf16.msra.mxu1 %v2816_v23  ;;  %2357 = vmatprep.subr.bf16.mxu0 %v2817_v24  ;;  %v123_v12 = vld [vmem:[%s3683_s0 + $0x108] sm:$0xff]  ;;  %v2839_v17 = vld [vmem:[%s3682_s1 + $0x1e0] sm:$0xff]   ;;  %v2841_v24 = vld [vmem:[%s3682_s1 + $0x158] sm:$0xff]  }
  0x1a   :  { %2469 = vmatprep.subr.bf16.mxu1 %v2818_v25  ;;  %v127_v13 = vld [vmem:[%s3683_s0 + $0x128] sm:$0xff]  ;;  %v2840_v20 = vld [vmem:[%s3682_s1 + $0x1a0] sm:$0xff]  }
  0x1b   :  { %v2188_v21 = vcombine.high %v123_v12, %v127_v13  ;;  %v130_v22 = vld [vmem:[%s3683_s0 + $0x140] sm:$0xff]  ;;  %v131_v25 = vld [vmem:[%s3683_s0 + $0x148] sm:$0xff] }
  0x1c   :  { %2358 = vmatpush3.bf16.msra.mxu0 %v2819_v26  ;;  %v134_v23 = vld [vmem:[%s3683_s0 + $0x160] sm:$0xff]  ;;  %v135_v26 = vld [vmem:[%s3683_s0 + $0x168] sm:$0xff] }
  0x1d   :  { %2470 = vmatpush3.bf16.msra.mxu1 %v2820_v27  ;;  %2359 = vmatprep.subr.bf16.mxu0 %v2821_v28  ;;  %v2842_v27 = vld [vmem:[%s3682_s1 + $0x118] sm:$0xff]   ;;  %v2194_v32 = vcombine.high %v130_v22, %v134_v23  ;;  %v2196_v33 = vcombine.high %v131_v25, %v135_v26  ;;  %v2850_v47 = vld [vmem:[%s3682_s1 + $0x108] sm:$0xff]   ;;  %v150_v51 = vld [vmem:[%s3683_s0 + $0x1e0] sm:$0xff] }
  0x1e   :  { %2471 = vmatprep.subr.bf16.mxu1 %v2822_v29  ;;  %v2843_v28 = vld [vmem:[%s3682_s1 + $0x1d8] sm:$0xff]   ;;  %v2851_v48 = vld [vmem:[%s3682_s1 + $0x1c8] sm:$0xff]   ;;  %v154_v62 = vld [vmem:[%s3683_s0 + $0x200] sm:$0xff] }
  0x1f   :  { %v2844_v29 = vld [vmem:[%s3682_s1 + $0x198] sm:$0xff]   ;;  %v2852_v49 = vld [vmem:[%s3682_s1 + $0x188] sm:$0xff]   ;;  %v158_v63 = vld [vmem:[%s3683_s0 + $0x220] sm:$0xff] }
  0x20   :  { %2360 = vmatpush3.bf16.msra.mxu0 %v2823_v30  ;;  %v2185_v30 = vcombine.low %v122_v10, %v126_v11  ;;  %v147_v52 = vld [vmem:[%s3683_s0 + $0x1c8] sm:$0xff]  ;;  %v2217_v10 = vcombine.low %v154_v62, %v158_v63 }
  0x21   :  { %2472 = vmatpush3.bf16.msra.mxu1 %v2824_v31  ;;  %2569 = vmatprep.subr.bf16.mxu0 %v2825_v40  ;;  %v2187_v31 = vcombine.low %v123_v12, %v127_v13  ;;  %v139_v40 = vld [vmem:[%s3683_s0 + $0x188] sm:$0xff] }
  0x22   :  { %2681 = vmatprep.subr.bf16.mxu1 %v2827_v42  ;;  %v2193_v42 = vcombine.low %v130_v22, %v134_v23  ;;  %v151_v53 = vld [vmem:[%s3683_s0 + $0x1e8] sm:$0xff]  ;;  %v178_v22 = vld [vmem:[%s3683_s0 + $0x2c0] sm:$0xff] }
  0x23   :  { %1406 = vmatmul.mubr.bf16.vlgmr.msra.gmra.mxu0 %v2153_v35  ;;  %v138_v35 = vld [vmem:[%s3683_s0 + $0x180] sm:$0xff]  ;;  %v155_v0 = vld [vmem:[%s3683_s0 + $0x208] sm:$0xff] }
  0x24   :  { %1567 = vmatmul.mubr.bf16.vlgmr.msra.gmra.mxu1 %v2155_v38  ;;  %2570 = vmatpush3.bf16.msra.mxu0 %v2826_v41  ;;  %v142_v38 = vld [vmem:[%s3683_s0 + $0x1a0] sm:$0xff]  ;;  %v143_v41 = vld [vmem:[%s3683_s0 + $0x1a8] sm:$0xff] }
  0x25   :  { %2682 = vmatpush3.bf16.msra.mxu1 %v2828_v43  ;;  %1413 = vmatprep.mubr.bf16.mxu0 %v2162_v46  ;;  %v2195_v43 = vcombine.low %v131_v25, %v135_v26  ;;  %v2202_v44 = vcombine.high %v138_v35, %v142_v38  ;;  %v2204_v45 = vcombine.high %v139_v40, %v143_v41  ;;  %v2849_v46 = vld [vmem:[%s3682_s1 + $0x148] sm:$0xff]   ;;  %v182_v23 = vld [vmem:[%s3683_s0 + $0x2e0] sm:$0xff] }
  0x26   :  { %1574 = vmatprep.mubr.bf16.mxu1 %v2164_v50  ;;  %2571 = vmatprep.subr.bf16.mxu0 %v2829_v55  ;;  %v146_v50 = vld [vmem:[%s3683_s0 + $0x1c0] sm:$0xff]  ;;  %v159_v1 = vld [vmem:[%s3683_s0 + $0x228] sm:$0xff] }
  0x27   :  { %2683 = vmatprep.subr.bf16.mxu1 %v2831_v60  ;;  %v2853_v55 = vld [vmem:[%s3682_s1 + $0x140] sm:$0xff]   ;;  %v2219_v11 = vcombine.low %v155_v0, %v159_v1  ;;  %v183_v25 = vld [vmem:[%s3683_s0 + $0x2e8] sm:$0xff] }
  0x28   :  { %2572 = vmatpush3.bf16.msra.mxu0 %v2830_v58  ;;  %v2854_v58 = vld [vmem:[%s3682_s1 + $0x100] sm:$0xff]  }
  0x29   :  { %2684 = vmatpush3.bf16.msra.mxu1 %v2832_v61  ;;  %2573 = vmatprep.subr.bf16.mxu0 %v2833_v2  ;;  %v2855_v60 = vld [vmem:[%s3682_s1 + $0x1c0] sm:$0xff]   ;;  %v2209_v2 = vcombine.low %v146_v50, %v150_v51 }
  0x2a   :  { %2685 = vmatprep.subr.bf16.mxu1 %v2835_v7  ;;  %v2856_v61 = vld [vmem:[%s3682_s1 + $0x180] sm:$0xff]  }
  0x2b   :  { %1414 = vmatmul.mubr.bf16.gmra.mxu0 %v2161_v54  ;;  %v2201_v54 = vcombine.low %v138_v35, %v142_v38  ;;  %v166_v7 = vld [vmem:[%s3683_s0 + $0x260] sm:$0xff] }
  0x2c   :  { %1575 = vmatmul.mubr.bf16.gmra.mxu1 %v2163_v56  ;;  %1421 = vmatprep.mubr.bf16.mxu0 %v2170_v57  ;;  %v2203_v56 = vcombine.low %v139_v40, %v143_v41  ;;  %v2210_v57 = vcombine.high %v146_v50, %v150_v51  ;;  %v194_v38 = vld [vmem:[%s3683_s0 + $0x340] sm:$0xff]  ;;  %v195_v40 = vld [vmem:[%s3683_s0 + $0x348] sm:$0xff] }
  0x2d   :  { %1582 = vmatprep.mubr.bf16.mxu1 %v2172_v59  ;;  %2574 = vmatpush3.bf16.msra.mxu0 %v2834_v4  ;;  %v2212_v59 = vcombine.high %v147_v52, %v151_v53  ;;  %v2218_v4 = vcombine.high %v154_v62, %v158_v63  ;;  %v199_v41 = vld [vmem:[%s3683_s0 + $0x368] sm:$0xff]  ;;  %v92_v62 = vld [vmem:[%s3683_s0 + $0x10] sm:$0xff] }
  0x2e   :  { %2686 = vmatpush3.bf16.msra.mxu1 %v2836_v9  ;;  %2575 = vmatprep.subr.bf16.mxu0 %v2837_v14  ;;  %v167_v9 = vld [vmem:[%s3683_s0 + $0x268] sm:$0xff]  ;;  %v170_v14 = vld [vmem:[%s3683_s0 + $0x280] sm:$0xff]  ;;  %v2259_v51 = vcombine.low %v195_v40, %v199_v41  ;;  %v96_v63 = vld [vmem:[%s3683_s0 + $0x30] sm:$0xff] }
  0x2f   :  { %2687 = vmatprep.subr.bf16.mxu1 %v2839_v17  ;;  %v175_v17 = vld [vmem:[%s3683_s0 + $0x2a8] sm:$0xff] }
  0x31   :  { %2576 = vmatpush3.bf16.msra.mxu0 %v2838_v15  ;;  %v174_v15 = vld [vmem:[%s3683_s0 + $0x2a0] sm:$0xff] }
  0x32   :  { %2688 = vmatpush3.bf16.msra.mxu1 %v2840_v20  ;;  %2577 = vmatprep.subr.bf16.mxu0 %v2841_v24  ;;  %v2234_v20 = vcombine.high %v170_v14, %v174_v15  ;;  %v179_v24 = vld [vmem:[%s3683_s0 + $0x2c8] sm:$0xff]  ;;  %v2233_v26 = vcombine.low %v170_v14, %v174_v15  ;;  %v108_v14 = vld [vmem:[%s3683_s0 + $0x90] sm:$0xff] }
  0x33   :  { %1422 = vmatmul.mubr.bf16.gmra.mxu0 %v2169_v3  ;;  %2689 = vmatprep.subr.bf16.mxu1 %v2843_v28  ;;  %v2211_v3 = vcombine.low %v147_v52, %v151_v53  ;;  %v2242_v28 = vcombine.high %v178_v22, %v182_v23  ;;  %v2243_v35 = vcombine.low %v179_v24, %v183_v25  ;;  %v112_v15 = vld [vmem:[%s3683_s0 + $0xb0] sm:$0xff] }
  0x34   :  { %1583 = vmatmul.mubr.bf16.gmra.mxu1 %v2171_v5  ;;  %1429 = vmatprep.mubr.bf16.mxu0 %v2178_v6  ;;  %v2220_v5 = vcombine.high %v155_v0, %v159_v1  ;;  %v162_v6 = vld [vmem:[%s3683_s0 + $0x240] sm:$0xff]  ;;  %v93_v0 = vld [vmem:[%s3683_s0 + $0x18] sm:$0xff] }
  0x35   :  { %1590 = vmatprep.mubr.bf16.mxu1 %v2180_v8  ;;  %2578 = vmatpush3.bf16.msra.mxu0 %v2842_v27  ;;  %v163_v8 = vld [vmem:[%s3683_s0 + $0x248] sm:$0xff]  ;;  %v2226_v12 = vcombine.high %v162_v6, %v166_v7  ;;  %v97_v1 = vld [vmem:[%s3683_s0 + $0x38] sm:$0xff] }
  0x36   :  { %2690 = vmatpush3.bf16.msra.mxu1 %v2844_v29  ;;  %2579 = vmatprep.subr.bf16.mxu0 %v2845_v34  ;;  %v2228_v13 = vcombine.high %v163_v8, %v167_v9  ;;  %v2244_v29 = vcombine.high %v179_v24, %v183_v25  ;;  %v2241_v34 = vcombine.low %v178_v22, %v182_v23  ;;  %v116_v22 = vld [vmem:[%s3683_s0 + $0xd0] sm:$0xff]  ;;  %v117_v24 = vld [vmem:[%s3683_s0 + $0xd8] sm:$0xff] }
  0x37   :  { %2691 = vmatprep.subr.bf16.mxu1 %v2847_v37  ;;  %v120_v23 = vld [vmem:[%s3683_s0 + $0xf0] sm:$0xff]  ;;  %v121_v25 = vld [vmem:[%s3683_s0 + $0xf8] sm:$0xff] }
  0x39   :  { %2580 = vmatpush3.bf16.msra.mxu0 %v2846_v36 }
  0x3a   :  { %2692 = vmatpush3.bf16.msra.mxu1 %v2848_v39  ;;  %2581 = vmatprep.subr.bf16.mxu0 %v2849_v46  ;;  %v198_v39 = vld [vmem:[%s3683_s0 + $0x360] sm:$0xff] }
  0x3b   :  { %1430 = vmatmul.mubr.bf16.gmra.mxu0 %v2177_v16  ;;  %2693 = vmatprep.subr.bf16.mxu1 %v2851_v48  ;;  %v171_v16 = vld [vmem:[%s3683_s0 + $0x288] sm:$0xff]  ;;  %v202_v46 = vld [vmem:[%s3683_s0 + $0x380] sm:$0xff]  ;;  %v2257_v50 = vcombine.low %v194_v38, %v198_v39 }
  0x3c   :  { %1591 = vmatmul.mubr.bf16.gmra.mxu1 %v2179_v18  ;;  %1437 = vmatprep.mubr.bf16.mxu0 %v2186_v19  ;;  %v2225_v18 = vcombine.low %v162_v6, %v166_v7  ;;  %v2227_v19 = vcombine.low %v163_v8, %v167_v9  ;;  %v2235_v27 = vcombine.low %v171_v16, %v175_v17  ;;  %v203_v48 = vld [vmem:[%s3683_s0 + $0x388] sm:$0xff]  ;;  %v100_v6 = vld [vmem:[%s3683_s0 + $0x50] sm:$0xff]  ;;  %v101_v8 = vld [vmem:[%s3683_s0 + $0x58] sm:$0xff] }
  0x3d   :  { %1598 = vmatprep.mubr.bf16.mxu1 %v2188_v21  ;;  %2582 = vmatpush3.bf16.msra.mxu0 %v2850_v47  ;;  %v2236_v21 = vcombine.high %v171_v16, %v175_v17  ;;  %v206_v47 = vld [vmem:[%s3683_s0 + $0x3a0] sm:$0xff]  ;;  %v104_v7 = vld [vmem:[%s3683_s0 + $0x70] sm:$0xff]  ;;  %v105_v9 = vld [vmem:[%s3683_s0 + $0x78] sm:$0xff] }
  0x3e   :  { %2694 = vmatpush3.bf16.msra.mxu1 %v2852_v49  ;;  %2583 = vmatprep.subr.bf16.mxu0 %v2853_v55  ;;  %v207_v49 = vld [vmem:[%s3683_s0 + $0x3a8] sm:$0xff]  ;;  %v2266_v52 = vcombine.high %v202_v46, %v206_v47  ;;  %v214_v55 = vld [vmem:[%s3683_s0 + $0x3e0] sm:$0xff]  ;;  %v109_v16 = vld [vmem:[%s3683_s0 + $0x98] sm:$0xff] }
  0x3f   :  { %2695 = vmatprep.subr.bf16.mxu1 %v2855_v60  ;;  %v2268_v53 = vcombine.high %v203_v48, %v207_v49  ;;  %v113_v17 = vld [vmem:[%s3683_s0 + $0xb8] sm:$0xff] }
  0x41   :  { %2584 = vmatpush3.bf16.msra.mxu0 %v2854_v58  ;;  %v2265_v58 = vcombine.low %v202_v46, %v206_v47  ;;  %v140_v46 = vld [vmem:[%s3683_s0 + $0x190] sm:$0xff] }
  0x42   :  { %2696 = vmatpush3.bf16.msra.mxu1 %v2856_v61  ;;  %v144_v47 = vld [vmem:[%s3683_s0 + $0x1b0] sm:$0xff] }
  0x43   :  { %1438 = vmatmul.mubr.bf16.gmra.mxu0 %v2185_v30  ;;  %v186_v30 = vld [vmem:[%s3683_s0 + $0x300] sm:$0xff] }
  0x44   :  { %1599 = vmatmul.mubr.bf16.gmra.mxu1 %v2187_v31  ;;  %1445 = vmatprep.mubr.bf16.mxu0 %v2194_v32  ;;  %v190_v31 = vld [vmem:[%s3683_s0 + $0x320] sm:$0xff]  ;;  %v187_v32 = vld [vmem:[%s3683_s0 + $0x308] sm:$0xff] }
  0x45   :  { %1606 = vmatprep.mubr.bf16.mxu1 %v2196_v33  ;;  %v191_v33 = vld [vmem:[%s3683_s0 + $0x328] sm:$0xff]  ;;  %v2250_v36 = vcombine.high %v186_v30, %v190_v31 }
  0x46   :  { %v2252_v37 = vcombine.high %v187_v32, %v191_v33 }
  0x4b   :  { %1446 = vmatmul.mubr.bf16.gmra.mxu0 %v2193_v42  ;;  %v2249_v42 = vcombine.low %v186_v30, %v190_v31  ;;  %v124_v30 = vld [vmem:[%s3683_s0 + $0x110] sm:$0xff] }
  0x4c   :  { %1607 = vmatmul.mubr.bf16.gmra.mxu1 %v2195_v43  ;;  %1453 = vmatprep.mubr.bf16.mxu0 %v2202_v44  ;;  %v2251_v43 = vcombine.low %v187_v32, %v191_v33  ;;  %v2258_v44 = vcombine.high %v194_v38, %v198_v39  ;;  %v128_v31 = vld [vmem:[%s3683_s0 + $0x130] sm:$0xff]  ;;  %v125_v32 = vld [vmem:[%s3683_s0 + $0x118] sm:$0xff] }
  0x4d   :  { %1614 = vmatprep.mubr.bf16.mxu1 %v2204_v45  ;;  %v2260_v45 = vcombine.high %v195_v40, %v199_v41  ;;  %v129_v33 = vld [vmem:[%s3683_s0 + $0x138] sm:$0xff]  ;;  %v132_v38 = vld [vmem:[%s3683_s0 + $0x150] sm:$0xff] }
  0x4e   :  { %v136_v39 = vld [vmem:[%s3683_s0 + $0x170] sm:$0xff]  ;;  %v133_v40 = vld [vmem:[%s3683_s0 + $0x158] sm:$0xff] }
  0x4f   :  { %v137_v41 = vld [vmem:[%s3683_s0 + $0x178] sm:$0xff] }
  0x53   :  { %1454 = vmatmul.mubr.bf16.gmra.mxu0 %v2201_v54  ;;  %v210_v54 = vld [vmem:[%s3683_s0 + $0x3c0] sm:$0xff] }
  0x54   :  { %1615 = vmatmul.mubr.bf16.gmra.mxu1 %v2203_v56  ;;  %1461 = vmatprep.mubr.bf16.mxu0 %v2210_v57  ;;  %v211_v56 = vld [vmem:[%s3683_s0 + $0x3c8] sm:$0xff]  ;;  %v2274_v60 = vcombine.high %v210_v54, %v214_v55 }
  0x55   :  { %1622 = vmatprep.mubr.bf16.mxu1 %v2212_v59  ;;  %v215_v57 = vld [vmem:[%s3683_s0 + $0x3e8] sm:$0xff]  ;;  %v2267_v59 = vcombine.low %v203_v48, %v207_v49  ;;  %v141_v48 = vld [vmem:[%s3683_s0 + $0x198] sm:$0xff] }
  0x56   :  { %v2276_v61 = vcombine.high %v211_v56, %v215_v57  ;;  %v145_v49 = vld [vmem:[%s3683_s0 + $0x1b8] sm:$0xff] }
  0x5b   :  { %1462 = vmatmul.mubr.bf16.gmra.mxu0 %v2209_v2  ;;  %v2273_v2 = vcombine.low %v210_v54, %v214_v55  ;;  %v148_v54 = vld [vmem:[%s3683_s0 + $0x1d0] sm:$0xff] }
  0x5c   :  { %1623 = vmatmul.mubr.bf16.gmra.mxu1 %v2211_v3  ;;  %1469 = vmatprep.mubr.bf16.mxu0 %v2218_v4  ;;  %v2275_v3 = vcombine.low %v211_v56, %v215_v57  ;;  %v2158_v4 = vcombine.high %v92_v62, %v96_v63  ;;  %v152_v55 = vld [vmem:[%s3683_s0 + $0x1f0] sm:$0xff]  ;;  %v149_v56 = vld [vmem:[%s3683_s0 + $0x1d8] sm:$0xff] }
  0x5d   :  { %1630 = vmatprep.mubr.bf16.mxu1 %v2220_v5  ;;  %v2160_v5 = vcombine.high %v93_v0, %v97_v1  ;;  %v153_v57 = vld [vmem:[%s3683_s0 + $0x1f8] sm:$0xff] }
  0x63   :  { %1470 = vmatmul.mubr.bf16.gmra.mxu0 %v2217_v10  ;;  %v2157_v10 = vcombine.low %v92_v62, %v96_v63  ;;  %v156_v62 = vld [vmem:[%s3683_s0 + $0x210] sm:$0xff] }
  0x64   :  { %1631 = vmatmul.mubr.bf16.gmra.mxu1 %v2219_v11  ;;  %1477 = vmatprep.mubr.bf16.mxu0 %v2226_v12  ;;  %v2159_v11 = vcombine.low %v93_v0, %v97_v1  ;;  %v2166_v12 = vcombine.high %v100_v6, %v104_v7  ;;  %v160_v63 = vld [vmem:[%s3683_s0 + $0x230] sm:$0xff]  ;;  %v157_v0 = vld [vmem:[%s3683_s0 + $0x218] sm:$0xff] }
  0x65   :  { %1638 = vmatprep.mubr.bf16.mxu1 %v2228_v13  ;;  %v2168_v13 = vcombine.high %v101_v8, %v105_v9  ;;  %v161_v1 = vld [vmem:[%s3683_s0 + $0x238] sm:$0xff] }
  0x6b   :  { %1478 = vmatmul.mubr.bf16.gmra.mxu0 %v2225_v18  ;;  %v2165_v18 = vcombine.low %v100_v6, %v104_v7  ;;  %v164_v6 = vld [vmem:[%s3683_s0 + $0x250] sm:$0xff] }
  0x6c   :  { %1639 = vmatmul.mubr.bf16.gmra.mxu1 %v2227_v19  ;;  %1485 = vmatprep.mubr.bf16.mxu0 %v2234_v20  ;;  %v2167_v19 = vcombine.low %v101_v8, %v105_v9  ;;  %v2174_v20 = vcombine.high %v108_v14, %v112_v15  ;;  %v168_v7 = vld [vmem:[%s3683_s0 + $0x270] sm:$0xff]  ;;  %v165_v8 = vld [vmem:[%s3683_s0 + $0x258] sm:$0xff] }
  0x6d   :  { %1646 = vmatprep.mubr.bf16.mxu1 %v2236_v21  ;;  %v2176_v21 = vcombine.high %v109_v16, %v113_v17  ;;  %v169_v9 = vld [vmem:[%s3683_s0 + $0x278] sm:$0xff] }
  0x73   :  { %1486 = vmatmul.mubr.bf16.gmra.mxu0 %v2233_v26  ;;  %v2173_v26 = vcombine.low %v108_v14, %v112_v15 }
  0x74   :  { %1647 = vmatmul.mubr.bf16.gmra.mxu1 %v2235_v27  ;;  %1493 = vmatprep.mubr.bf16.mxu0 %v2242_v28  ;;  %v2175_v27 = vcombine.low %v109_v16, %v113_v17  ;;  %v2182_v28 = vcombine.high %v116_v22, %v120_v23  ;;  %v172_v17 = vld [vmem:[%s3683_s0 + $0x290] sm:$0xff] }
  0x75   :  { %1654 = vmatprep.mubr.bf16.mxu1 %v2244_v29  ;;  %v2184_v29 = vcombine.high %v117_v24, %v121_v25 }
  0x7b   :  { %1494 = vmatmul.mubr.bf16.gmra.mxu0 %v2241_v34  ;;  %v2181_v34 = vcombine.low %v116_v22, %v120_v23  ;;  %v177_v22 = vld [vmem:[%s3683_s0 + $0x2b8] sm:$0xff] }
  0x7c   :  { %1655 = vmatmul.mubr.bf16.gmra.mxu1 %v2243_v35  ;;  %1501 = vmatprep.mubr.bf16.mxu0 %v2250_v36  ;;  %v2183_v35 = vcombine.low %v117_v24, %v121_v25  ;;  %v2190_v36 = vcombine.high %v124_v30, %v128_v31  ;;  %v2229_v25 = vcombine.low %v164_v6, %v168_v7 }
  0x7d   :  { %1662 = vmatprep.mubr.bf16.mxu1 %v2252_v37  ;;  %v2192_v37 = vcombine.high %v125_v32, %v129_v33 }
  0x83   :  { %1502 = vmatmul.mubr.bf16.gmra.mxu0 %v2249_v42  ;;  %v2189_v42 = vcombine.low %v124_v30, %v128_v31 }
  0x84   :  { %1663 = vmatmul.mubr.bf16.gmra.mxu1 %v2251_v43  ;;  %1509 = vmatprep.mubr.bf16.mxu0 %v2258_v44  ;;  %v2191_v43 = vcombine.low %v125_v32, %v129_v33  ;;  %v2198_v44 = vcombine.high %v132_v38, %v136_v39 }
  0x85   :  { %1670 = vmatprep.mubr.bf16.mxu1 %v2260_v45  ;;  %v2200_v45 = vcombine.high %v133_v40, %v137_v41 }
  0x8b   :  { %1510 = vmatmul.mubr.bf16.gmra.mxu0 %v2257_v50  ;;  %v2197_v50 = vcombine.low %v132_v38, %v136_v39  ;;  %v180_v39 = vld [vmem:[%s3683_s0 + $0x2d0] sm:$0xff] }
  0x8c   :  { %1671 = vmatmul.mubr.bf16.gmra.mxu1 %v2259_v51  ;;  %1517 = vmatprep.mubr.bf16.mxu0 %v2266_v52  ;;  %v2199_v51 = vcombine.low %v133_v40, %v137_v41  ;;  %v2206_v52 = vcombine.high %v140_v46, %v144_v47  ;;  %v184_v40 = vld [vmem:[%s3683_s0 + $0x2f0] sm:$0xff] }
  0x8d   :  { %1678 = vmatprep.mubr.bf16.mxu1 %v2268_v53  ;;  %v2208_v53 = vcombine.high %v141_v48, %v145_v49 }
  0x93   :  { %1518 = vmatmul.mubr.bf16.gmra.mxu0 %v2265_v58  ;;  %v2205_v58 = vcombine.low %v140_v46, %v144_v47 }
  0x94   :  { %1679 = vmatmul.mubr.bf16.gmra.mxu1 %v2267_v59  ;;  %1525 = vmatprep.mubr.bf16.mxu0 %v2274_v60  ;;  %v2207_v59 = vcombine.low %v141_v48, %v145_v49  ;;  %v2214_v60 = vcombine.high %v148_v54, %v152_v55 }
  0x95   :  { %1686 = vmatprep.mubr.bf16.mxu1 %v2276_v61  ;;  %v2216_v61 = vcombine.high %v149_v56, %v153_v57 }
  0x9b   :  { %1526 = vmatmul.mubr.bf16.gmra.mxu0 %v2273_v2  ;;  %v2213_v2 = vcombine.low %v148_v54, %v152_v55 }
  0x9c   :  { %1687 = vmatmul.mubr.bf16.gmra.mxu1 %v2275_v3  ;;  %1727 = vmatprep.mubr.bf16.mxu0 %v2158_v4  ;;  %v2215_v3 = vcombine.low %v149_v56, %v153_v57  ;;  %v2222_v4 = vcombine.high %v156_v62, %v160_v63 }
  0x9d   :  { %1888 = vmatprep.mubr.bf16.mxu1 %v2160_v5  ;;  %v2224_v5 = vcombine.high %v157_v0, %v161_v1 }
  0xa3   :  { %1728 = vmatmul.mubr.bf16.vlgmr.msra.gmra.mxu0 %v2157_v10  ;;  %v2221_v10 = vcombine.low %v156_v62, %v160_v63  ;;  %v192_v62 = vld [vmem:[%s3683_s0 + $0x330] sm:$0xff] }
  0xa4   :  { %1889 = vmatmul.mubr.bf16.vlgmr.msra.gmra.mxu1 %v2159_v11  ;;  %1735 = vmatprep.mubr.bf16.mxu0 %v2166_v12  ;;  %v2223_v11 = vcombine.low %v157_v0, %v161_v1  ;;  %v2230_v12 = vcombine.high %v164_v6, %v168_v7  ;;  %v189_v1 = vld [vmem:[%s3683_s0 + $0x318] sm:$0xff] }
  0xa5   :  { %1896 = vmatprep.mubr.bf16.mxu1 %v2168_v13  ;;  %v2232_v13 = vcombine.high %v165_v8, %v169_v9 }
  0xab   :  { %1736 = vmatmul.mubr.bf16.gmra.mxu0 %v2165_v18  ;;  %v176_v18 = vld [vmem:[%s3683_s0 + $0x2b0] sm:$0xff] }
  0xac   :  { %1897 = vmatmul.mubr.bf16.gmra.mxu1 %v2167_v19  ;;  %1743 = vmatprep.mubr.bf16.mxu0 %v2174_v20  ;;  %v2237_v47 = vcombine.low %v172_v17, %v176_v18 }
  0xad   :  { %1904 = vmatprep.mubr.bf16.mxu1 %v2176_v21  ;;  %v173_v21 = vld [vmem:[%s3683_s0 + $0x298] sm:$0xff] }
  0xae   :  { %v2240_v31 = vcombine.high %v173_v21, %v177_v22  ;;  %v2239_v49 = vcombine.low %v173_v21, %v177_v22 }
  0xb3   :  { %1744 = vmatmul.mubr.bf16.gmra.mxu0 %v2173_v26 }
  0xb4   :  { %1905 = vmatmul.mubr.bf16.gmra.mxu1 %v2175_v27  ;;  %1751 = vmatprep.mubr.bf16.mxu0 %v2182_v28  ;;  %v2231_v27 = vcombine.low %v165_v8, %v169_v9  ;;  %v2238_v28 = vcombine.high %v172_v17, %v176_v18 }
  0xb5   :  { %1912 = vmatprep.mubr.bf16.mxu1 %v2184_v29 }
  0xbb   :  { %1752 = vmatmul.mubr.bf16.gmra.mxu0 %v2181_v34 }
  0xbc   :  { %1913 = vmatmul.mubr.bf16.gmra.mxu1 %v2183_v35  ;;  %1759 = vmatprep.mubr.bf16.mxu0 %v2190_v36 }
  0xbd   :  { %1920 = vmatprep.mubr.bf16.mxu1 %v2192_v37 }
  0xc3   :  { %1760 = vmatmul.mubr.bf16.gmra.mxu0 %v2189_v42 }
  0xc4   :  { %1921 = vmatmul.mubr.bf16.gmra.mxu1 %v2191_v43  ;;  %1767 = vmatprep.mubr.bf16.mxu0 %v2198_v44  ;;  %v181_v43 = vld [vmem:[%s3683_s0 + $0x2d8] sm:$0xff] }
  0xc5   :  { %1928 = vmatprep.mubr.bf16.mxu1 %v2200_v45  ;;  %v185_v44 = vld [vmem:[%s3683_s0 + $0x2f8] sm:$0xff] }
  0xc6   :  { %v2247_v7 = vcombine.low %v181_v43, %v185_v44 }
  0xcb   :  { %1768 = vmatmul.mubr.bf16.gmra.mxu0 %v2197_v50  ;;  %v2246_v50 = vcombine.high %v180_v39, %v184_v40 }
  0xcc   :  { %1929 = vmatmul.mubr.bf16.gmra.mxu1 %v2199_v51  ;;  %1775 = vmatprep.mubr.bf16.mxu0 %v2206_v52 }
  0xcd   :  { %1936 = vmatprep.mubr.bf16.mxu1 %v2208_v53  ;;  %v2248_v53 = vcombine.high %v181_v43, %v185_v44  ;;  %v204_v43 = vld [vmem:[%s3683_s0 + $0x390] sm:$0xff] }
  0xce   :  { %v208_v44 = vld [vmem:[%s3683_s0 + $0x3b0] sm:$0xff] }
  0xd3   :  { %1776 = vmatmul.mubr.bf16.gmra.mxu0 %v2205_v58 }
  0xd4   :  { %1937 = vmatmul.mubr.bf16.gmra.mxu1 %v2207_v59  ;;  %1783 = vmatprep.mubr.bf16.mxu0 %v2214_v60 }
  0xd5   :  { %1944 = vmatprep.mubr.bf16.mxu1 %v2216_v61  ;;  %v188_v61 = vld [vmem:[%s3683_s0 + $0x310] sm:$0xff] }
  0xd6   :  { %v2254_v8 = vcombine.high %v188_v61, %v192_v62 }
  0xdb   :  { %1784 = vmatmul.mubr.bf16.gmra.mxu0 %v2213_v2  ;;  %v193_v2 = vld [vmem:[%s3683_s0 + $0x338] sm:$0xff] }
  0xdc   :  { %1945 = vmatmul.mubr.bf16.gmra.mxu1 %v2215_v3  ;;  %1791 = vmatprep.mubr.bf16.mxu0 %v2222_v4 }
  0xdd   :  { %1952 = vmatprep.mubr.bf16.mxu1 %v2224_v5  ;;  %v2245_v5 = vcombine.low %v180_v39, %v184_v40 }
  0xe3   :  { %v2361_v14 = vpop.f32.mrf.mxu0  ;;  %1792 = vmatmul.mubr.bf16.gmra.mxu0 %v2221_v10 }
  0xe4   :  { %v2473_v15 = vpop.f32.mrf.mxu1  ;;  %1953 = vmatmul.mubr.bf16.gmra.mxu1 %v2223_v11  ;;  %1799 = vmatprep.mubr.bf16.mxu0 %v2230_v12  ;;  %v2256_v11 = vcombine.high %v189_v1, %v193_v2 }
  0xe5   :  { %v2362_v16 = vpop.f32.mrf.mxu0  ;;  %1960 = vmatprep.mubr.bf16.mxu1 %v2232_v13 }
  0xe6   :  { %v2363_v19 = vadd.f32 %v2362_v16, %v2361_v14  ;;  %v2474_v20 = vpop.f32.mrf.mxu1 }
  0xe7   :  { %v2475_v23 = vadd.f32 %v2474_v20, %v2473_v15  ;;  %v2364_v24 = vpop.f32.mrf.mxu0  ;;  %v200_v20 = vld [vmem:[%s3683_s0 + $0x370] sm:$0xff] }
  0xe8   :  { %v2476_v26 = vpop.f32.mrf.mxu1 }
  0xe9   :  { %v3393_v29 = vadd.f32 %v2475_v23, %v2363_v19  ;;  %v2365_v30 = vpop.f32.mrf.mxu0  ;;  %v196_v19 = vld [vmem:[%s3683_s0 + $0x350] sm:$0xff]  ;;  %v197_v23 = vld [vmem:[%s3683_s0 + $0x358] sm:$0xff] }
  0xea   :  { %v2366_v32 = vadd.f32 %v2365_v30, %v2364_v24  ;;  %v2477_v33 = vpop.f32.mrf.mxu1  ;;  %v201_v24 = vld [vmem:[%s3683_s0 + $0x378] sm:$0xff]  ;;  %v2255_v30 = vcombine.low %v189_v1, %v193_v2 }
  0xeb   :  { %v2478_v34 = vadd.f32 %v2477_v33, %v2476_v26  ;;  %v2367_v35 = vpop.f32.mrf.mxu0  ;;  %1800 = vmatmul.mubr.bf16.gmra.mxu0 %v2229_v25 }
  0xec   :  { %v2479_v36 = vpop.f32.mrf.mxu1  ;;  %1961 = vmatmul.mubr.bf16.gmra.mxu1 %v2231_v27  ;;  %1807 = vmatprep.mubr.bf16.mxu0 %v2238_v28  ;;  %v2253_v27 = vcombine.low %v188_v61, %v192_v62 }
  0xed   :  { %v3395_v37 = vadd.f32 %v2478_v34, %v2366_v32  ;;  %v2368_v38 = vpop.f32.mrf.mxu0  ;;  %1968 = vmatprep.mubr.bf16.mxu1 %v2240_v31  ;;  %v2262_v31 = vcombine.high %v196_v19, %v200_v20  ;;  %v2264_v34 = vcombine.high %v197_v23, %v201_v24 }
  0xee   :  { %v2369_v41 = vadd.f32 %v2368_v38, %v2367_v35  ;;  %v2480_v42 = vpop.f32.mrf.mxu1 }
  0xef   :  { %v2481_v45 = vadd.f32 %v2480_v42, %v2479_v36  ;;  %v2370_v46 = vpop.f32.mrf.mxu0 }
  0xf0   :  { %v2482_v48 = vpop.f32.mrf.mxu1 }
  0xf1   :  { %v3409_v51 = vadd.f32 %v2481_v45, %v2369_v41  ;;  %v2371_v52 = vpop.f32.mrf.mxu0 }
  0xf2   :  { %v2372_v54 = vadd.f32 %v2371_v52, %v2370_v46  ;;  %v2483_v55 = vpop.f32.mrf.mxu1  ;;  %v2261_v52 = vcombine.low %v196_v19, %v200_v20 }
  0xf3   :  { %v2484_v56 = vadd.f32 %v2483_v55, %v2482_v48  ;;  %v2373_v57 = vpop.f32.mrf.mxu0  ;;  %1808 = vmatmul.mubr.bf16.gmra.mxu0 %v2237_v47  ;;  %v205_v47 = vld [vmem:[%s3683_s0 + $0x398] sm:$0xff]  ;;  %v2270_v55 = vcombine.high %v204_v43, %v208_v44 }
  0xf4   :  { %v2485_v58 = vpop.f32.mrf.mxu1  ;;  %1969 = vmatmul.mubr.bf16.gmra.mxu1 %v2239_v49  ;;  %1815 = vmatprep.mubr.bf16.mxu0 %v2246_v50  ;;  %v209_v48 = vld [vmem:[%s3683_s0 + $0x3b8] sm:$0xff] }
  0xf5   :  { %v3411_v59 = vadd.f32 %v2484_v56, %v2372_v54  ;;  %v2374_v60 = vpop.f32.mrf.mxu0  ;;  %1976 = vmatprep.mubr.bf16.mxu1 %v2248_v53  ;;  %v2263_v54 = vcombine.low %v197_v23, %v201_v24 }
  0xf6   :  { %v2375_v63 = vadd.f32 %v2374_v60, %v2373_v57  ;;  %v2486_v0 = vpop.f32.mrf.mxu1 }
  0xf7   :  { %v2487_v3 = vadd.f32 %v2486_v0, %v2485_v58  ;;  %v2376_v4 = vpop.f32.mrf.mxu0  ;;  %v2272_v58 = vcombine.high %v205_v47, %v209_v48 }
  0xf8   :  { %v2488_v6 = vpop.f32.mrf.mxu1 }
  0xf9   :  { %v3425_v9 = vadd.f32 %v2487_v3, %v2375_v63  ;;  %v2377_v10 = vpop.f32.mrf.mxu0  ;;  %v212_v3 = vld [vmem:[%s3683_s0 + $0x3d0] sm:$0xff] }
  0xfa   :  { %v2378_v12 = vadd.f32 %v2377_v10, %v2376_v4  ;;  %v2489_v13 = vpop.f32.mrf.mxu1  ;;  %v216_v4 = vld [vmem:[%s3683_s0 + $0x3f0] sm:$0xff] }
  0xfb   :  { %v2490_v14 = vadd.f32 %v2489_v13, %v2488_v6  ;;  %v2379_v15 = vpop.f32.mrf.mxu0  ;;  %1816 = vmatmul.mubr.bf16.gmra.mxu0 %v2245_v5 }
  0xfc   :  { %v2491_v16 = vpop.f32.mrf.mxu1  ;;  %1977 = vmatmul.mubr.bf16.gmra.mxu1 %v2247_v7  ;;  %1823 = vmatprep.mubr.bf16.mxu0 %v2254_v8  ;;  %v213_v7 = vld [vmem:[%s3683_s0 + $0x3d8] sm:$0xff] }
  0xfd   :  { %v3427_v17 = vadd.f32 %v2490_v14, %v2378_v12  ;;  %v2380_v18 = vpop.f32.mrf.mxu0  ;;  %1984 = vmatprep.mubr.bf16.mxu1 %v2256_v11  ;;  %v217_v8 = vld [vmem:[%s3683_s0 + $0x3f8] sm:$0xff]  ;;  %v2269_v12 = vcombine.low %v204_v43, %v208_v44  ;;  %v2271_v14 = vcombine.low %v205_v47, %v209_v48 }
  0xfe   :  { %v2381_v21 = vadd.f32 %v2380_v18, %v2379_v15  ;;  %v2492_v22 = vpop.f32.mrf.mxu1  ;;  %v2278_v15 = vcombine.high %v212_v3, %v216_v4  ;;  %v2280_v19 = vcombine.high %v213_v7, %v217_v8 }
  0xff   :  { %v2493_v25 = vadd.f32 %v2492_v22, %v2491_v16  ;;  %v2382_v26 = vpop.f32.mrf.mxu0 }
 0x100   :  { %v2494_v28 = vpop.f32.mrf.mxu1 }
 0x101   :  { %v3441_v32 = vadd.f32 %v2493_v25, %v2381_v21  ;;  %v2383_v33 = vpop.f32.mrf.mxu0 }
 0x102   :  { %v2384_v35 = vadd.f32 %v2383_v33, %v2382_v26  ;;  %v2495_v36 = vpop.f32.mrf.mxu1  ;;  %v2277_v33 = vcombine.low %v212_v3, %v216_v4 }
 0x103   :  { %v2496_v38 = vadd.f32 %v2495_v36, %v2494_v28  ;;  %v2385_v39 = vpop.f32.mrf.mxu0  ;;  %1824 = vmatmul.mubr.bf16.gmra.mxu0 %v2253_v27 }
 0x104   :  { %v2497_v40 = vpop.f32.mrf.mxu1  ;;  %1985 = vmatmul.mubr.bf16.gmra.mxu1 %v2255_v30  ;;  %1831 = vmatprep.mubr.bf16.mxu0 %v2262_v31 }
 0x105   :  { %v3443_v41 = vadd.f32 %v2496_v38, %v2384_v35  ;;  %v2386_v42 = vpop.f32.mrf.mxu0  ;;  %1992 = vmatprep.mubr.bf16.mxu1 %v2264_v34  ;;  %v2279_v35 = vcombine.low %v213_v7, %v217_v8 }
 0x106   :  { %v2387_v45 = vadd.f32 %v2386_v42, %v2385_v39  ;;  %v2498_v46 = vpop.f32.mrf.mxu1 }
 0x107   :  { %v2499_v49 = vadd.f32 %v2498_v46, %v2497_v40  ;;  %v2388_v50 = vpop.f32.mrf.mxu0 }
 0x108   :  { %v2500_v53 = vpop.f32.mrf.mxu1 }
 0x109   :  { %v3457_v56 = vadd.f32 %v2499_v49, %v2387_v45  ;;  %v2389_v57 = vpop.f32.mrf.mxu0 }
 0x10a   :  { %v2390_v60 = vadd.f32 %v2389_v57, %v2388_v50  ;;  %v2501_v61 = vpop.f32.mrf.mxu1 }
 0x10b   :  { %v2502_v62 = vadd.f32 %v2501_v61, %v2500_v53  ;;  %v2391_v63 = vpop.f32.mrf.mxu0  ;;  %1832 = vmatmul.mubr.bf16.gmra.mxu0 %v2261_v52 }
 0x10c   :  { %v2503_v0 = vpop.f32.mrf.mxu1  ;;  %1993 = vmatmul.mubr.bf16.gmra.mxu1 %v2263_v54  ;;  %1839 = vmatprep.mubr.bf16.mxu0 %v2270_v55 }
 0x10d   :  { %v3459_v1 = vadd.f32 %v2502_v62, %v2390_v60  ;;  %v2392_v2 = vpop.f32.mrf.mxu0  ;;  %2000 = vmatprep.mubr.bf16.mxu1 %v2272_v58 }
 0x10e   :  { %v2393_v5 = vadd.f32 %v2392_v2, %v2391_v63  ;;  %v2504_v6 = vpop.f32.mrf.mxu1 }
 0x10f   :  { %v2505_v10 = vadd.f32 %v2504_v6, %v2503_v0  ;;  %v2394_v11 = vpop.f32.mrf.mxu0 }
 0x110   :  { %v2506_v13 = vpop.f32.mrf.mxu1 }
 0x111   :  { %v3473_v16 = vadd.f32 %v2505_v10, %v2393_v5  ;;  %v2395_v18 = vpop.f32.mrf.mxu0 }
 0x112   :  { %v2396_v20 = vadd.f32 %v2395_v18, %v2394_v11  ;;  %v2507_v21 = vpop.f32.mrf.mxu1 }
 0x113   :  { %v2508_v22 = vadd.f32 %v2507_v21, %v2506_v13  ;;  %v2397_v23 = vpop.f32.mrf.mxu0  ;;  %1840 = vmatmul.mubr.bf16.gmra.mxu0 %v2269_v12 }
 0x114   :  { %v2509_v24 = vpop.f32.mrf.mxu1  ;;  %2001 = vmatmul.mubr.bf16.gmra.mxu1 %v2271_v14  ;;  %1847 = vmatprep.mubr.bf16.mxu0 %v2278_v15 }
 0x115   :  { %v3475_v25 = vadd.f32 %v2508_v22, %v2396_v20  ;;  %v2398_v26 = vpop.f32.mrf.mxu0  ;;  %2008 = vmatprep.mubr.bf16.mxu1 %v2280_v19 }
 0x116   :  { %v2399_v27 = vadd.f32 %v2398_v26, %v2397_v23  ;;  %v2510_v28 = vpop.f32.mrf.mxu1 }
 0x117   :  { %v2511_v30 = vadd.f32 %v2510_v28, %v2509_v24  ;;  %v2400_v31 = vpop.f32.mrf.mxu0 }
 0x118   :  { %v2512_v34 = vpop.f32.mrf.mxu1 }
 0x119   :  { %v3477_v36 = vadd.f32 %v2511_v30, %v2399_v27  ;;  %v2401_v38 = vpop.f32.mrf.mxu0 }
 0x11a   :  { %v2402_v39 = vadd.f32 %v2401_v38, %v2400_v31  ;;  %v2513_v40 = vpop.f32.mrf.mxu1 }
 0x11b   :  { %v2514_v42 = vadd.f32 %v2513_v40, %v2512_v34  ;;  %v2403_v43 = vpop.f32.mrf.mxu0  ;;  %1848 = vmatmul.mubr.bf16.gmra.mxu0 %v2277_v33 }
 0x11c   :  { %v2515_v44 = vpop.f32.mrf.mxu1  ;;  %2009 = vmatmul.mubr.bf16.gmra.mxu1 %v2279_v35 }
 0x11d   :  { %v3479_v45 = vadd.f32 %v2514_v42, %v2402_v39  ;;  %v2404_v46 = vpop.f32.mrf.mxu0 }
 0x11e   :  { %v2405_v47 = vadd.f32 %v2404_v46, %v2403_v43  ;;  %v2516_v48 = vpop.f32.mrf.mxu1 }
 0x11f   :  { %v2517_v49 = vadd.f32 %v2516_v48, %v2515_v44  ;;  %v2406_v50 = vpop.f32.mrf.mxu0 }
 0x120   :  { %v2518_v52 = vpop.f32.mrf.mxu1 }
 0x121   :  { %v3481_v53 = vadd.f32 %v2517_v49, %v2405_v47  ;;  %v2407_v54 = vpop.f32.mrf.mxu0 }
 0x122   :  { %v2408_v55 = vadd.f32 %v2407_v54, %v2406_v50  ;;  %v2519_v57 = vpop.f32.mrf.mxu1 }
 0x123   :  { %v2520_v58 = vadd.f32 %v2519_v57, %v2518_v52  ;;  %v2409_v60 = vpop.f32.mrf.mxu0 }
 0x124   :  { %v2521_v61 = vpop.f32.mrf.mxu1 }
 0x125   :  { %v3483_v62 = vadd.f32 %v2520_v58, %v2408_v55  ;;  %v2410_v63 = vpop.f32.mrf.mxu0 }
 0x126   :  { %v2411_v0 = vadd.f32 %v2410_v63, %v2409_v60  ;;  %v2522_v2 = vpop.f32.mrf.mxu1 }
 0x127   :  { %v2523_v3 = vadd.f32 %v2522_v2, %v2521_v61  ;;  %v2412_v4 = vpop.f32.mrf.mxu0 }
 0x128   :  { %v2524_v5 = vpop.f32.mrf.mxu1 }
 0x129   :  { %v3485_v6 = vadd.f32 %v2523_v3, %v2411_v0  ;;  %v2413_v7 = vpop.f32.mrf.mxu0 }
 0x12a   :  { %v2414_v8 = vadd.f32 %v2413_v7, %v2412_v4  ;;  %v2525_v10 = vpop.f32.mrf.mxu1 }
 0x12b   :  { %v2526_v11 = vadd.f32 %v2525_v10, %v2524_v5  ;;  %v2415_v12 = vpop.f32.mrf.mxu0 }
 0x12c   :  { %v2527_v13 = vpop.f32.mrf.mxu1 }
 0x12d   :  { %v3487_v14 = vadd.f32 %v2526_v11, %v2414_v8  ;;  %v2416_v15 = vpop.f32.mrf.mxu0 }
 0x12e   :  { %v2417_v18 = vadd.f32 %v2416_v15, %v2415_v12  ;;  %v2528_v19 = vpop.f32.mrf.mxu1 }
 0x12f   :  { %v2529_v20 = vadd.f32 %v2528_v19, %v2527_v13  ;;  %v2418_v21 = vpop.f32.mrf.mxu0 }
 0x130   :  { %v2530_v22 = vpop.f32.mrf.mxu1 }
 0x131   :  { %v3489_v23 = vadd.f32 %v2529_v20, %v2417_v18  ;;  %v2419_v24 = vpop.f32.mrf.mxu0 }
 0x132   :  { %v2420_v26 = vadd.f32 %v2419_v24, %v2418_v21  ;;  %v2531_v27 = vpop.f32.mrf.mxu1 }
 0x133   :  { %v2532_v28 = vadd.f32 %v2531_v27, %v2530_v22  ;;  %v2421_v30 = vpop.f32.mrf.mxu0 }
 0x134   :  { %v2533_v31 = vpop.f32.mrf.mxu1 }
 0x135   :  { %v3491_v33 = vadd.f32 %v2532_v28, %v2420_v26  ;;  %v2422_v34 = vpop.f32.mrf.mxu0 }
 0x136   :  { %v2423_v35 = vadd.f32 %v2422_v34, %v2421_v30  ;;  %v2534_v38 = vpop.f32.mrf.mxu1 }
 0x137   :  { %v2535_v39 = vadd.f32 %v2534_v38, %v2533_v31  ;;  %v2424_v40 = vpop.f32.mrf.mxu0 }
 0x138   :  { %v2536_v42 = vpop.f32.mrf.mxu1 }
 0x139   :  { %v3493_v43 = vadd.f32 %v2535_v39, %v2423_v35  ;;  %v2425_v44 = vpop.f32.mrf.mxu0 }
 0x13a   :  { %v2426_v46 = vadd.f32 %v2425_v44, %v2424_v40  ;;  %v2537_v47 = vpop.f32.mrf.mxu1 }
 0x13b   :  { %v2538_v48 = vadd.f32 %v2537_v47, %v2536_v42  ;;  %v2427_v49 = vpop.f32.mrf.mxu0 }
 0x13c   :  { %v2539_v50 = vpop.f32.mrf.mxu1 }
 0x13d   :  { %v3495_v52 = vadd.f32 %v2538_v48, %v2426_v46  ;;  %v2428_v54 = vpop.f32.mrf.mxu0 }
 0x13e   :  { %v2429_v55 = vadd.f32 %v2428_v54, %v2427_v49  ;;  %v2540_v57 = vpop.f32.mrf.mxu1 }
 0x13f   :  { %v2541_v58 = vadd.f32 %v2540_v57, %v2539_v50  ;;  %v2430_v60 = vpop.f32.mrf.mxu0 }
 0x140   :  { %v2542_v61 = vpop.f32.mrf.mxu1 }
 0x141   :  { %v3497_v63 = vadd.f32 %v2541_v58, %v2429_v55  ;;  %v2431_v0 = vpop.f32.mrf.mxu0 }
 0x142   :  { %v2432_v2 = vadd.f32 %v2431_v0, %v2430_v60  ;;  %v2543_v3 = vpop.f32.mrf.mxu1 }
 0x143   :  { %v2544_v4 = vadd.f32 %v2543_v3, %v2542_v61  ;;  %v2433_v5 = vpop.f32.mrf.mxu0 }
 0x144   :  { %v2545_v7 = vpop.f32.mrf.mxu1 }
 0x145   :  { %v3499_v8 = vadd.f32 %v2544_v4, %v2432_v2  ;;  %v2434_v10 = vpop.f32.mrf.mxu0 }
 0x146   :  { %v2435_v11 = vadd.f32 %v2434_v10, %v2433_v5  ;;  %v2546_v12 = vpop.f32.mrf.mxu1 }
 0x147   :  { %v2547_v13 = vadd.f32 %v2546_v12, %v2545_v7  ;;  %v2436_v15 = vpop.f32.mrf.mxu0 }
 0x148   :  { %v2548_v18 = vpop.f32.mrf.mxu1 }
 0x149   :  { %v3501_v19 = vadd.f32 %v2547_v13, %v2435_v11  ;;  %v2437_v20 = vpop.f32.mrf.mxu0 }
 0x14a   :  { %v2438_v21 = vadd.f32 %v2437_v20, %v2436_v15  ;;  %v2549_v22 = vpop.f32.mrf.mxu1 }
 0x14b   :  { %v2550_v24 = vadd.f32 %v2549_v22, %v2548_v18  ;;  %v2439_v26 = vpop.f32.mrf.mxu0 }
 0x14c   :  { %v2551_v27 = vpop.f32.mrf.mxu1 }
 0x14d   :  { %v3503_v28 = vadd.f32 %v2550_v24, %v2438_v21  ;;  %v2440_v30 = vpop.f32.mrf.mxu0 }
 0x14e   :  { %v2441_v31 = vadd.f32 %v2440_v30, %v2439_v26  ;;  %v2552_v34 = vpop.f32.mrf.mxu1 }
 0x14f   :  { %v2553_v35 = vadd.f32 %v2552_v34, %v2551_v27  ;;  %v2442_v38 = vpop.f32.mrf.mxu0 }
 0x150   :  { %v2554_v39 = vpop.f32.mrf.mxu1 }
 0x151   :  { %v3505_v40 = vadd.f32 %v2553_v35, %v2441_v31  ;;  %v2443_v42 = vpop.f32.mrf.mxu0 }
 0x152   :  { %v2444_v44 = vadd.f32 %v2443_v42, %v2442_v38  ;;  %v2555_v46 = vpop.f32.mrf.mxu1 }
 0x153   :  { %v2556_v47 = vadd.f32 %v2555_v46, %v2554_v39  ;;  %v2445_v48 = vpop.f32.mrf.mxu0 }
 0x154   :  { %v2557_v49 = vpop.f32.mrf.mxu1 }
 0x155   :  { %v3507_v50 = vadd.f32 %v2556_v47, %v2444_v44  ;;  %v2446_v54 = vpop.f32.mrf.mxu0 }
 0x156   :  { %v2447_v55 = vadd.f32 %v2446_v54, %v2445_v48  ;;  %v2558_v57 = vpop.f32.mrf.mxu1 }
 0x157   :  { %v2559_v58 = vadd.f32 %v2558_v57, %v2557_v49  ;;  %v2448_v60 = vpop.f32.mrf.mxu0  ;;  %v3521_v49 = vld [vmem:[%s3684_s2] ss:$0 sm:$0xff] }
 0x158   :  { %v2560_v61 = vpop.f32.mrf.mxu1 }
 0x159   :  { %v3509_v0 = vadd.f32 %v2559_v58, %v2447_v55  ;;  %v2449_v2 = vpop.f32.mrf.mxu0 }
 0x15a   :  { %v2450_v3 = vadd.f32 %v2449_v2, %v2448_v60  ;;  %v2561_v4 = vpop.f32.mrf.mxu1 }
 0x15b   :  { %v2562_v5 = vadd.f32 %v2561_v4, %v2560_v61  ;;  %v2451_v7 = vpop.f32.mrf.mxu0 }
 0x15c   :  { %v2563_v10 = vpop.f32.mrf.mxu1 }
 0x15d   :  { %v3511_v11 = vadd.f32 %v2562_v5, %v2450_v3  ;;  %v2452_v12 = vpop.f32.mrf.mxu0 }
 0x15e   :  { %v2453_v13 = vadd.f32 %v2452_v12, %v2451_v7  ;;  %v2564_v15 = vpop.f32.mrf.mxu1 }
 0x15f   :  { %v2565_v18 = vadd.f32 %v2564_v15, %v2563_v10  ;;  %v2454_v20 = vpop.f32.mrf.mxu0 }
 0x160   :  { %v2566_v21 = vpop.f32.mrf.mxu1 }
 0x161   :  { %v3513_v22 = vadd.f32 %v2565_v18, %v2453_v13  ;;  %v2455_v24 = vpop.f32.mrf.mxu0 }
 0x162   :  { %v2456_v26 = vadd.f32 %v2455_v24, %v2454_v20  ;;  %v2567_v27 = vpop.f32.mrf.mxu1 }
 0x163   :  { %v2568_v30 = vadd.f32 %v2567_v27, %v2566_v21  ;;  %v2585_v31 = vpop.f32.mrf.mxu0 }
 0x164   :  { %v2697_v34 = vpop.f32.mrf.mxu1 }
 0x165   :  { %v3515_v35 = vadd.f32 %v2568_v30, %v2456_v26  ;;  %v2586_v38 = vpop.f32.mrf.mxu0 }
 0x166   :  { %v2587_v39 = vadd.f32 %v2586_v38, %v2585_v31  ;;  %v2698_v42 = vpop.f32.mrf.mxu1 }
 0x167   :  { %v2588_v44 = vpop.f32.mrf.mxu0  ;;  %v2699_v47 = vadd.f32 %v2698_v42, %v2697_v34 }
 0x168   :  { %v1730_v46 = vadd.f32 %v2587_v39, %v3393_v29  ;;  %v2700_v48 = vpop.f32.mrf.mxu1 }
 0x169   :  { %v2589_v54 = vpop.f32.mrf.mxu0 }
 0x16a   :  { %v1891_v55 = vadd.f32 %v2699_v47, %v1730_v46  ;;  %v2590_v57 = vadd.f32 %v2589_v54, %v2588_v44  ;;  %v2701_v58 = vpop.f32.mrf.mxu1 }
 0x16b   :  { %v2591_v60 = vpop.f32.mrf.mxu0  ;;  %v2702_v3 = vadd.f32 %v2701_v58, %v2700_v48 }
 0x16c   :  { %v2017_v61 = vadd.f32 %v3521_v49, %v1891_v55  ;;  %v1733_v2 = vadd.f32 %v2590_v57, %v3395_v37  ;;  %v2703_v4 = vpop.f32.mrf.mxu1 }
 0x16d   :  { %v2592_v5 = vpop.f32.mrf.mxu0 }
 0x16e   :  { %2116 = vst [vmem:[%s3685_s3] sm:$0xff] %v2017_v61  ;;  %v1894_v29 = vadd.f32 %v2702_v3, %v1733_v2  ;;  %v2593_v7 = vadd.f32 %v2592_v5, %v2591_v60  ;;  %v2704_v10 = vpop.f32.mrf.mxu1 }
 0x16f   :  { %v2594_v12 = vpop.f32.mrf.mxu0  ;;  %v2705_v18 = vadd.f32 %v2704_v10, %v2703_v4 }
 0x170   :  { %v2018_v13 = vadd.f32 %v3521_v49, %v1894_v29  ;;  %v1738_v15 = vadd.f32 %v2593_v7, %v3409_v51  ;;  %v2706_v20 = vpop.f32.mrf.mxu1 }
 0x171   :  { %v2595_v21 = vpop.f32.mrf.mxu0 }
 0x172   :  { %2117 = vst [vmem:[%s3685_s3 + $0x8] sm:$0xff] %v2018_v13  ;;  %v1899_v37 = vadd.f32 %v2705_v18, %v1738_v15  ;;  %v2596_v24 = vadd.f32 %v2595_v21, %v2594_v12  ;;  %v2707_v26 = vpop.f32.mrf.mxu1 }
 0x173   :  { %v2597_v27 = vpop.f32.mrf.mxu0  ;;  %v2708_v34 = vadd.f32 %v2707_v26, %v2706_v20 }
 0x174   :  { %v2019_v30 = vadd.f32 %v3521_v49, %v1899_v37  ;;  %v1741_v31 = vadd.f32 %v2596_v24, %v3411_v59  ;;  %v2709_v38 = vpop.f32.mrf.mxu1 }
 0x175   :  { %v2598_v39 = vpop.f32.mrf.mxu0 }
 0x176   :  { %2118 = vst [vmem:[%s3685_s3 + $0x10] sm:$0xff] %v2019_v30  ;;  %v1902_v51 = vadd.f32 %v2708_v34, %v1741_v31  ;;  %v2599_v42 = vadd.f32 %v2598_v39, %v2597_v27  ;;  %v2710_v44 = vpop.f32.mrf.mxu1 }
 0x177   :  { %v2600_v46 = vpop.f32.mrf.mxu0  ;;  %v2711_v54 = vadd.f32 %v2710_v44, %v2709_v38 }
 0x178   :  { %v2020_v47 = vadd.f32 %v3521_v49, %v1902_v51  ;;  %v1746_v48 = vadd.f32 %v2599_v42, %v3425_v9  ;;  %v2712_v55 = vpop.f32.mrf.mxu1 }
 0x179   :  { %v2601_v57 = vpop.f32.mrf.mxu0 }
 0x17a   :  { %2119 = vst [vmem:[%s3685_s3 + $0x18] sm:$0xff] %v2020_v47  ;;  %v1907_v59 = vadd.f32 %v2711_v54, %v1746_v48  ;;  %v2602_v58 = vadd.f32 %v2601_v57, %v2600_v46  ;;  %v2713_v60 = vpop.f32.mrf.mxu1 }
 0x17b   :  { %v2603_v61 = vpop.f32.mrf.mxu0  ;;  %v2714_v4 = vadd.f32 %v2713_v60, %v2712_v55 }
 0x17c   :  { %v2021_v2 = vadd.f32 %v3521_v49, %v1907_v59  ;;  %v1749_v3 = vadd.f32 %v2602_v58, %v3427_v17  ;;  %v2715_v5 = vpop.f32.mrf.mxu1 }
 0x17d   :  { %v2604_v29 = vpop.f32.mrf.mxu0 }
 0x17e   :  { %2120 = vst [vmem:[%s3685_s3 + $0x20] sm:$0xff] %v2021_v2  ;;  %v1910_v9 = vadd.f32 %v2714_v4, %v1749_v3  ;;  %v2605_v7 = vadd.f32 %v2604_v29, %v2603_v61  ;;  %v2716_v10 = vpop.f32.mrf.mxu1 }
 0x17f   :  { %v2606_v12 = vpop.f32.mrf.mxu0  ;;  %v2717_v18 = vadd.f32 %v2716_v10, %v2715_v5 }
 0x180   :  { %v2022_v13 = vadd.f32 %v3521_v49, %v1910_v9  ;;  %v1754_v15 = vadd.f32 %v2605_v7, %v3441_v32  ;;  %v2718_v20 = vpop.f32.mrf.mxu1 }
 0x181   :  { %v2607_v21 = vpop.f32.mrf.mxu0 }
 0x182   :  { %2121 = vst [vmem:[%s3685_s3 + $0x28] sm:$0xff] %v2022_v13  ;;  %v1915_v17 = vadd.f32 %v2717_v18, %v1754_v15  ;;  %v2608_v37 = vadd.f32 %v2607_v21, %v2606_v12  ;;  %v2719_v24 = vpop.f32.mrf.mxu1 }
 0x183   :  { %v2609_v26 = vpop.f32.mrf.mxu0  ;;  %v2720_v31 = vadd.f32 %v2719_v24, %v2718_v20 }
 0x184   :  { %v2023_v27 = vadd.f32 %v3521_v49, %v1915_v17  ;;  %v1757_v30 = vadd.f32 %v2608_v37, %v3443_v41  ;;  %v2721_v34 = vpop.f32.mrf.mxu1 }
 0x185   :  { %v2610_v38 = vpop.f32.mrf.mxu0 }
 0x186   :  { %2122 = vst [vmem:[%s3685_s3 + $0x30] sm:$0xff] %v2023_v27  ;;  %v1918_v32 = vadd.f32 %v2720_v31, %v1757_v30  ;;  %v2611_v39 = vadd.f32 %v2610_v38, %v2609_v26  ;;  %v2722_v51 = vpop.f32.mrf.mxu1 }
 0x187   :  { %v2612_v42 = vpop.f32.mrf.mxu0  ;;  %v2723_v47 = vadd.f32 %v2722_v51, %v2721_v34 }
 0x188   :  { %v2024_v44 = vadd.f32 %v3521_v49, %v1918_v32  ;;  %v1762_v46 = vadd.f32 %v2611_v39, %v3457_v56  ;;  %v2724_v48 = vpop.f32.mrf.mxu1 }
 0x189   :  { %v2613_v54 = vpop.f32.mrf.mxu0 }
 0x18a   :  { %2123 = vst [vmem:[%s3685_s3 + $0x38] sm:$0xff] %v2024_v44  ;;  %v1923_v41 = vadd.f32 %v2723_v47, %v1762_v46  ;;  %v2614_v55 = vadd.f32 %v2613_v54, %v2612_v42  ;;  %v2725_v57 = vpop.f32.mrf.mxu1 }
 0x18b   :  { %v2615_v59 = vpop.f32.mrf.mxu0  ;;  %v2726_v61 = vadd.f32 %v2725_v57, %v2724_v48 }
 0x18c   :  { %v2025_v58 = vadd.f32 %v3521_v49, %v1923_v41  ;;  %v1765_v60 = vadd.f32 %v2614_v55, %v3459_v1  ;;  %v2727_v2 = vpop.f32.mrf.mxu1 }
 0x18d   :  { %v2616_v3 = vpop.f32.mrf.mxu0 }
 0x18e   :  { %2124 = vst [vmem:[%s3685_s3 + $0x40] sm:$0xff] %v2025_v58  ;;  %v1926_v56 = vadd.f32 %v2726_v61, %v1765_v60  ;;  %v2617_v4 = vadd.f32 %v2616_v3, %v2615_v59  ;;  %v2728_v5 = vpop.f32.mrf.mxu1 }
 0x18f   :  { %v2618_v29 = vpop.f32.mrf.mxu0  ;;  %v2729_v10 = vadd.f32 %v2728_v5, %v2727_v2 }
 0x190   :  { %v2026_v9 = vadd.f32 %v3521_v49, %v1926_v56  ;;  %v1770_v7 = vadd.f32 %v2617_v4, %v3473_v16  ;;  %v2730_v12 = vpop.f32.mrf.mxu1 }
 0x191   :  { %v2619_v13 = vpop.f32.mrf.mxu0 }
 0x192   :  { %2125 = vst [vmem:[%s3685_s3 + $0x48] sm:$0xff] %v2026_v9  ;;  %v1931_v1 = vadd.f32 %v2729_v10, %v1770_v7  ;;  %v2620_v15 = vadd.f32 %v2619_v13, %v2618_v29  ;;  %v2731_v18 = vpop.f32.mrf.mxu1 }
 0x193   :  { %v2621_v20 = vpop.f32.mrf.mxu0  ;;  %v2732_v37 = vadd.f32 %v2731_v18, %v2730_v12 }
 0x194   :  { %v2027_v21 = vadd.f32 %v3521_v49, %v1931_v1  ;;  %v1773_v17 = vadd.f32 %v2620_v15, %v3475_v25  ;;  %v2733_v24 = vpop.f32.mrf.mxu1 }
 0x195   :  { %v2622_v26 = vpop.f32.mrf.mxu0 }
 0x196   :  { %2126 = vst [vmem:[%s3685_s3 + $0x50] sm:$0xff] %v2027_v21  ;;  %v1934_v16 = vadd.f32 %v2732_v37, %v1773_v17  ;;  %v2623_v27 = vadd.f32 %v2622_v26, %v2621_v20  ;;  %v2734_v30 = vpop.f32.mrf.mxu1 }
 0x197   :  { %v2624_v31 = vpop.f32.mrf.mxu0  ;;  %v2735_v32 = vadd.f32 %v2734_v30, %v2733_v24 }
 0x198   :  { %v2028_v34 = vadd.f32 %v3521_v49, %v1934_v16  ;;  %v1778_v38 = vadd.f32 %v2623_v27, %v3477_v36  ;;  %v2736_v39 = vpop.f32.mrf.mxu1 }
 0x199   :  { %v2625_v51 = vpop.f32.mrf.mxu0 }
 0x19a   :  { %2127 = vst [vmem:[%s3685_s3 + $0x58] sm:$0xff] %v2028_v34  ;;  %v1939_v25 = vadd.f32 %v2735_v32, %v1778_v38  ;;  %v2626_v42 = vadd.f32 %v2625_v51, %v2624_v31  ;;  %v2737_v44 = vpop.f32.mrf.mxu1 }
 0x19b   :  { %v2627_v46 = vpop.f32.mrf.mxu0  ;;  %v2738_v54 = vadd.f32 %v2737_v44, %v2736_v39 }
 0x19c   :  { %v2029_v47 = vadd.f32 %v3521_v49, %v1939_v25  ;;  %v1781_v48 = vadd.f32 %v2626_v42, %v3479_v45  ;;  %v2739_v41 = vpop.f32.mrf.mxu1 }
 0x19d   :  { %v2628_v55 = vpop.f32.mrf.mxu0 }
 0x19e   :  { %2128 = vst [vmem:[%s3685_s3 + $0x60] sm:$0xff] %v2029_v47  ;;  %v1942_v36 = vadd.f32 %v2738_v54, %v1781_v48  ;;  %v2629_v57 = vadd.f32 %v2628_v55, %v2627_v46  ;;  %v2740_v59 = vpop.f32.mrf.mxu1 }
 0x19f   :  { %v2630_v58 = vpop.f32.mrf.mxu0  ;;  %v2741_v2 = vadd.f32 %v2740_v59, %v2739_v41 }
 0x1a0   :  { %v2030_v60 = vadd.f32 %v3521_v49, %v1942_v36  ;;  %v1786_v61 = vadd.f32 %v2629_v57, %v3481_v53  ;;  %v2742_v3 = vpop.f32.mrf.mxu1 }
 0x1a1   :  { %v2631_v56 = vpop.f32.mrf.mxu0 }
 0x1a2   :  { %2129 = vst [vmem:[%s3685_s3 + $0x68] sm:$0xff] %v2030_v60  ;;  %v1947_v45 = vadd.f32 %v2741_v2, %v1786_v61  ;;  %v2632_v4 = vadd.f32 %v2631_v56, %v2630_v58  ;;  %v2743_v5 = vpop.f32.mrf.mxu1 }
 0x1a3   :  { %v2633_v29 = vpop.f32.mrf.mxu0  ;;  %v2744_v10 = vadd.f32 %v2743_v5, %v2742_v3 }
 0x1a4   :  { %v2031_v9 = vadd.f32 %v3521_v49, %v1947_v45  ;;  %v1789_v7 = vadd.f32 %v2632_v4, %v3483_v62  ;;  %v2745_v12 = vpop.f32.mrf.mxu1 }
 0x1a5   :  { %v2634_v13 = vpop.f32.mrf.mxu0 }
 0x1a6   :  { %2130 = vst [vmem:[%s3685_s3 + $0x70] sm:$0xff] %v2031_v9  ;;  %v1950_v53 = vadd.f32 %v2744_v10, %v1789_v7  ;;  %v2635_v1 = vadd.f32 %v2634_v13, %v2633_v29  ;;  %v2746_v15 = vpop.f32.mrf.mxu1 }
 0x1a7   :  { %v2636_v18 = vpop.f32.mrf.mxu0  ;;  %v2747_v17 = vadd.f32 %v2746_v15, %v2745_v12 }
 0x1a8   :  { %v2032_v20 = vadd.f32 %v3521_v49, %v1950_v53  ;;  %v1794_v21 = vadd.f32 %v2635_v1, %v3485_v6  ;;  %v2748_v37 = vpop.f32.mrf.mxu1 }
 0x1a9   :  { %v2637_v24 = vpop.f32.mrf.mxu0 }
 0x1aa   :  { %2131 = vst [vmem:[%s3685_s3 + $0x78] sm:$0xff] %v2032_v20  ;;  %v1955_v62 = vadd.f32 %v2747_v17, %v1794_v21  ;;  %v2638_v26 = vadd.f32 %v2637_v24, %v2636_v18  ;;  %v2749_v16 = vpop.f32.mrf.mxu1 }
 0x1ab   :  { %v2639_v27 = vpop.f32.mrf.mxu0  ;;  %v2750_v34 = vadd.f32 %v2749_v16, %v2748_v37 }
 0x1ac   :  { %v2033_v30 = vadd.f32 %v3521_v49, %v1955_v62  ;;  %v1797_v31 = vadd.f32 %v2638_v26, %v3487_v14  ;;  %v2751_v38 = vpop.f32.mrf.mxu1 }
 0x1ad   :  { %v2640_v32 = vpop.f32.mrf.mxu0 }
 0x1ae   :  { %2132 = vst [vmem:[%s3685_s3 + $0x80] sm:$0xff] %v2033_v30  ;;  %v1958_v6 = vadd.f32 %v2750_v34, %v1797_v31  ;;  %v2641_v39 = vadd.f32 %v2640_v32, %v2639_v27  ;;  %v2752_v51 = vpop.f32.mrf.mxu1 }
 0x1af   :  { %v2642_v25 = vpop.f32.mrf.mxu0  ;;  %v2753_v46 = vadd.f32 %v2752_v51, %v2751_v38 }
 0x1b0   :  { %v2034_v42 = vadd.f32 %v3521_v49, %v1958_v6  ;;  %v1802_v44 = vadd.f32 %v2641_v39, %v3489_v23  ;;  %v2754_v47 = vpop.f32.mrf.mxu1 }
 0x1b1   :  { %v2643_v48 = vpop.f32.mrf.mxu0 }
 0x1b2   :  { %2133 = vst [vmem:[%s3685_s3 + $0x88] sm:$0xff] %v2034_v42  ;;  %v1963_v14 = vadd.f32 %v2753_v46, %v1802_v44  ;;  %v2644_v54 = vadd.f32 %v2643_v48, %v2642_v25  ;;  %v2755_v41 = vpop.f32.mrf.mxu1 }
 0x1b3   :  { %v2645_v55 = vpop.f32.mrf.mxu0  ;;  %v2756_v59 = vadd.f32 %v2755_v41, %v2754_v47 }
 0x1b4   :  { %v2035_v36 = vadd.f32 %v3521_v49, %v1963_v14  ;;  %v1805_v57 = vadd.f32 %v2644_v54, %v3491_v33  ;;  %v2757_v58 = vpop.f32.mrf.mxu1 }
 0x1b5   :  { %v2646_v60 = vpop.f32.mrf.mxu0 }
 0x1b6   :  { %2134 = vst [vmem:[%s3685_s3 + $0x90] sm:$0xff] %v2035_v36  ;;  %v1966_v23 = vadd.f32 %v2756_v59, %v1805_v57  ;;  %v2647_v61 = vadd.f32 %v2646_v60, %v2645_v55  ;;  %v2758_v2 = vpop.f32.mrf.mxu1 }
 0x1b7   :  { %v2648_v3 = vpop.f32.mrf.mxu0  ;;  %v2759_v4 = vadd.f32 %v2758_v2, %v2757_v58 }
 0x1b8   :  { %v2036_v56 = vadd.f32 %v3521_v49, %v1966_v23  ;;  %v1810_v45 = vadd.f32 %v2647_v61, %v3493_v43  ;;  %v2760_v5 = vpop.f32.mrf.mxu1 }
 0x1b9   :  { %v2649_v29 = vpop.f32.mrf.mxu0 }
 0x1ba   :  { %2135 = vst [vmem:[%s3685_s3 + $0x98] sm:$0xff] %v2036_v56  ;;  %v1971_v33 = vadd.f32 %v2759_v4, %v1810_v45  ;;  %v2650_v9 = vadd.f32 %v2649_v29, %v2648_v3  ;;  %v2761_v7 = vpop.f32.mrf.mxu1 }
 0x1bb   :  { %v2651_v10 = vpop.f32.mrf.mxu0  ;;  %v2762_v53 = vadd.f32 %v2761_v7, %v2760_v5 }
 0x1bc   :  { %v2037_v12 = vadd.f32 %v3521_v49, %v1971_v33  ;;  %v1813_v13 = vadd.f32 %v2650_v9, %v3495_v52  ;;  %v2763_v1 = vpop.f32.mrf.mxu1 }
 0x1bd   :  { %v2652_v15 = vpop.f32.mrf.mxu0 }
 0x1be   :  { %2136 = vst [vmem:[%s3685_s3 + $0xa0] sm:$0xff] %v2037_v12  ;;  %v1974_v43 = vadd.f32 %v2762_v53, %v1813_v13  ;;  %v2653_v18 = vadd.f32 %v2652_v15, %v2651_v10  ;;  %v2764_v20 = vpop.f32.mrf.mxu1 }
 0x1bf   :  { %v2654_v21 = vpop.f32.mrf.mxu0  ;;  %v2765_v24 = vadd.f32 %v2764_v20, %v2763_v1 }
 0x1c0   :  { %v2038_v17 = vadd.f32 %v3521_v49, %v1974_v43  ;;  %v1818_v37 = vadd.f32 %v2653_v18, %v3497_v63  ;;  %v2766_v62 = vpop.f32.mrf.mxu1 }
 0x1c1   :  { %v2655_v26 = vpop.f32.mrf.mxu0 }
 0x1c2   :  { %2137 = vst [vmem:[%s3685_s3 + $0xa8] sm:$0xff] %v2038_v17  ;;  %v1979_v52 = vadd.f32 %v2765_v24, %v1818_v37  ;;  %v2656_v16 = vadd.f32 %v2655_v26, %v2654_v21  ;;  %v2767_v27 = vpop.f32.mrf.mxu1 }
 0x1c3   :  { %v2657_v30 = vpop.f32.mrf.mxu0  ;;  %v2768_v38 = vadd.f32 %v2767_v27, %v2766_v62 }
 0x1c4   :  { %v2039_v31 = vadd.f32 %v3521_v49, %v1979_v52  ;;  %v1821_v34 = vadd.f32 %v2656_v16, %v3499_v8  ;;  %v2769_v32 = vpop.f32.mrf.mxu1 }
 0x1c5   :  { %v2658_v6 = vpop.f32.mrf.mxu0 }
 0x1c6   :  { %2138 = vst [vmem:[%s3685_s3 + $0xb0] sm:$0xff] %v2039_v31  ;;  %v1982_v63 = vadd.f32 %v2768_v38, %v1821_v34  ;;  %v2659_v39 = vadd.f32 %v2658_v6, %v2657_v30  ;;  %v2770_v51 = vpop.f32.mrf.mxu1 }
 0x1c7   :  { %v2660_v25 = vpop.f32.mrf.mxu0  ;;  %v2771_v46 = vadd.f32 %v2770_v51, %v2769_v32 }
 0x1c8   :  { %v2040_v42 = vadd.f32 %v3521_v49, %v1982_v63  ;;  %v1826_v44 = vadd.f32 %v2659_v39, %v3501_v19  ;;  %v2772_v47 = vpop.f32.mrf.mxu1 }
 0x1c9   :  { %v2661_v48 = vpop.f32.mrf.mxu0 }
 0x1ca   :  { %2139 = vst [vmem:[%s3685_s3 + $0xb8] sm:$0xff] %v2040_v42  ;;  %v1987_v8 = vadd.f32 %v2771_v46, %v1826_v44  ;;  %v2662_v14 = vadd.f32 %v2661_v48, %v2660_v25  ;;  %v2773_v54 = vpop.f32.mrf.mxu1 }
 0x1cb   :  { %v2663_v41 = vpop.f32.mrf.mxu0  ;;  %v2774_v57 = vadd.f32 %v2773_v54, %v2772_v47 }
 0x1cc   :  { %v2041_v55 = vadd.f32 %v3521_v49, %v1987_v8  ;;  %v1829_v36 = vadd.f32 %v2662_v14, %v3503_v28  ;;  %v2775_v59 = vpop.f32.mrf.mxu1 }
 0x1cd   :  { %v2664_v58 = vpop.f32.mrf.mxu0 }
 0x1ce   :  { %2140 = vst [vmem:[%s3685_s3 + $0xc0] sm:$0xff] %v2041_v55  ;;  %v1990_v19 = vadd.f32 %v2774_v57, %v1829_v36  ;;  %v2665_v60 = vadd.f32 %v2664_v58, %v2663_v41  ;;  %v2776_v23 = vpop.f32.mrf.mxu1 }
 0x1cf   :  { %v2666_v61 = vpop.f32.mrf.mxu0  ;;  %v2777_v56 = vadd.f32 %v2776_v23, %v2775_v59 }
 0x1d0   :  { %v2042_v2 = vadd.f32 %v3521_v49, %v1990_v19  ;;  %v1834_v3 = vadd.f32 %v2665_v60, %v3505_v40  ;;  %v2778_v45 = vpop.f32.mrf.mxu1 }
 0x1d1   :  { %v2667_v4 = vpop.f32.mrf.mxu0 }
 0x1d2   :  { %2141 = vst [vmem:[%s3685_s3 + $0xc8] sm:$0xff] %v2042_v2  ;;  %v1995_v28 = vadd.f32 %v2777_v56, %v1834_v3  ;;  %v2668_v5 = vadd.f32 %v2667_v4, %v2666_v61  ;;  %v2779_v29 = vpop.f32.mrf.mxu1 }
 0x1d3   :  { %v2669_v33 = vpop.f32.mrf.mxu0  ;;  %v2780_v10 = vadd.f32 %v2779_v29, %v2778_v45 }
 0x1d4   :  { %v2043_v9 = vadd.f32 %v3521_v49, %v1995_v28  ;;  %v1837_v7 = vadd.f32 %v2668_v5, %v3507_v50  ;;  %v2781_v12 = vpop.f32.mrf.mxu1 }
 0x1d5   :  { %v2670_v13 = vpop.f32.mrf.mxu0 }
 0x1d6   :  { %2142 = vst [vmem:[%s3685_s3 + $0xd0] sm:$0xff] %v2043_v9  ;;  %v1998_v40 = vadd.f32 %v2780_v10, %v1837_v7  ;;  %v2671_v53 = vadd.f32 %v2670_v13, %v2669_v33  ;;  %v2782_v1 = vpop.f32.mrf.mxu1 }
 0x1d7   :  { %v2672_v15 = vpop.f32.mrf.mxu0  ;;  %v2783_v20 = vadd.f32 %v2782_v1, %v2781_v12 }
 0x1d8   :  { %v2044_v43 = vadd.f32 %v3521_v49, %v1998_v40  ;;  %v1842_v18 = vadd.f32 %v2671_v53, %v3509_v0  ;;  %v2784_v21 = vpop.f32.mrf.mxu1 }
 0x1d9   :  { %v2673_v17 = vpop.f32.mrf.mxu0 }
 0x1da   :  { %2143 = vst [vmem:[%s3685_s3 + $0xd8] sm:$0xff] %v2044_v43  ;;  %v2003_v50 = vadd.f32 %v2783_v20, %v1842_v18  ;;  %v2674_v37 = vadd.f32 %v2673_v17, %v2672_v15  ;;  %v2785_v24 = vpop.f32.mrf.mxu1 }
 0x1db   :  { %v2675_v62 = vpop.f32.mrf.mxu0  ;;  %v2786_v16 = vadd.f32 %v2785_v24, %v2784_v21 }
 0x1dc   :  { %v2045_v26 = vadd.f32 %v3521_v49, %v2003_v50  ;;  %v1845_v52 = vadd.f32 %v2674_v37, %v3511_v11  ;;  %v2787_v27 = vpop.f32.mrf.mxu1 }
 0x1dd   :  { %v2676_v30 = vpop.f32.mrf.mxu0 }
 0x1de   :  { %2144 = vst [vmem:[%s3685_s3 + $0xe0] sm:$0xff] %v2045_v26  ;;  %v2006_v0 = vadd.f32 %v2786_v16, %v1845_v52  ;;  %v2677_v31 = vadd.f32 %v2676_v30, %v2675_v62  ;;  %v2788_v34 = vpop.f32.mrf.mxu1 }
 0x1df   :  { %v2678_v38 = vpop.f32.mrf.mxu0  ;;  %v2789_v63 = vadd.f32 %v2788_v34, %v2787_v27 }
 0x1e0   :  { %v2046_v32 = vadd.f32 %v3521_v49, %v2006_v0  ;;  %v1850_v6 = vadd.f32 %v2677_v31, %v3513_v22  ;;  %v2790_v39 = vpop.f32.mrf.mxu1 }
 0x1e1   :  { %v2679_v51 = vpop.f32.mrf.mxu0 }
 0x1e2   :  { %2145 = vst [vmem:[%s3685_s3 + $0xe8] sm:$0xff] %v2046_v32  ;;  %v2011_v11 = vadd.f32 %v2789_v63, %v1850_v6  ;;  %v2680_v25 = vadd.f32 %v2679_v51, %v2678_v38  ;;  %v2791_v42 = vpop.f32.mrf.mxu1 }
 0x1e3   :  { %v2792_v47 = vadd.f32 %v2791_v42, %v2790_v39 }
 0x1e4   :  { %v2047_v44 = vadd.f32 %v3521_v49, %v2011_v11  ;;  %v1853_v46 = vadd.f32 %v2680_v25, %v3515_v35 }
 0x1e6   :  { %2146 = vst [vmem:[%s3685_s3 + $0xf0] sm:$0xff] %v2047_v44  ;;  %v2014_v22 = vadd.f32 %v2792_v47, %v1853_v46 }
 0x1e8   :  { %v2048_v48 = vadd.f32 %v3521_v49, %v2014_v22 }
 0x1ea   :  { %2147 = vst [vmem:[%s3685_s3 + $0xf8] sm:$0xff] %v2048_v48 }

</bundles_post_ra>
